<compile_context>
chip_gen: v5e
topology: v5e:2x2
jax: 0.10.0
libtpu: 0.0.40
codegen_flags: <defaults>
</compile_context>

<pallas_src>
import math

import jax
import jax.numpy as jnp
from jax.experimental import pallas as pl
from jax.experimental.pallas import tpu as pltpu

EMBED_DIM = 512
N_HEAD = 8
HIDDEN = EMBED_DIM // N_HEAD      # 64
WAY_PAD = 128                     # lane-dense padding of the prototype / way axis
_WAY_PAD_SHIFT = 7                # log2(WAY_PAD)

VMEM = pltpu.MemorySpace.VMEM


def _round_up(x, m):
    return (x + m - 1) // m * m


# ----------------------------------------------------------------------------
# Fused Pallas kernel
# ----------------------------------------------------------------------------
def _make_fused_kernel(ns, ns_pad, ep, way, shot, nq, beta, temp):
    """One fused kernel for the whole MetaBaseline forward (method='cos')."""
    D = EMBED_DIM

    def kern(xall_ref, tt_ref, bias_ref, wenc2_ref, wtext_ref,
             logits_ref, score_ref):
        f32 = jnp.float32

        # ------------------------------------------------------------------
        # encoder stub (real conv backbone is external) + pre-folded Wfc_a
        # term, one bf16 MXU pass over [x_shot ; x_query]:
        #   cols [0:D)  -> encoder features
        #   cols [D:2D) -> x_shot_fea @ Wfc_a   (only the shot rows are used)
        # TODO(synk): the real conv backbone (models.make(encoder)) is external.
        # ------------------------------------------------------------------
        enc_all = jnp.dot(xall_ref[...], wenc2_ref[...],
                          preferred_element_type=f32)              # [ns_pad+nq_tot, 2D]
        b_enc = bias_ref[0:1, :]                                    # [1, D]
        b_fc = bias_ref[1:2, :]                                     # [1, D] (BN+fc+attn folded)

        x_shot = enc_all[:ns_pad, :D] + b_enc                       # [ns_pad, D]
        x_query = enc_all[ns_pad:, :D] + b_enc                      # [nq_tot, D]

        # ------------------------------------------------------------------
        # CrossAttention(k=text, q=x_shot_fea, bi_linear): q_len = k_len = 1,
        # softmax over a length-1 axis == 1, so output == w_k(text); w_k,
        # proj and Wfc_b are pre-folded into W_text. Dropout(0) is identity.
        # fc = Linear(1024,512)+BN(eval, folded)+ReLU; Dropout(0.1) identity.
        # ------------------------------------------------------------------
        txt = tt_ref[:ns_pad, :]                                     # [ns_pad, D] f32
        txt_term = jnp.dot(txt.astype(jnp.bfloat16), wtext_ref[...],
                           preferred_element_type=f32)              # [ns_pad, D]
        refuse = jnp.maximum(enc_all[:ns_pad, D:] + txt_term + b_fc, 0.0)

        blend = refuse * beta + x_shot * (1.0 - beta)                # [ns_pad, D]

        # ------------------------------------------------------------------
        # prototypes: mean over shot + zero-pad to WAY_PAD rows per episode.
        # The averaging / scatter matrix is built in-registers (iota, shifts,
        # compares only -- no HBM input, no integer division).
        # ------------------------------------------------------------------
        rows = jax.lax.broadcasted_iota(jnp.int32, (ep * WAY_PAD, ns_pad), 0)
        cols = jax.lax.broadcasted_iota(jnp.int32, (ep * WAY_PAD, ns_pad), 1)
        r_ep = jnp.right_shift(rows, _WAY_PAD_SHIFT)
        r_way = jnp.bitwise_and(rows, WAY_PAD - 1)
        base = r_ep * (way * shot) + r_way * shot
        sel = (r_way < way) & (cols >= base) & (cols < base + shot) & (cols < ns)
        avg = sel.astype(f32) * (1.0 / shot)                         # [ep*WAY_PAD, ns_pad]

        proto = jnp.dot(avg, blend, preferred_element_type=f32)      # [ep*WAY_PAD, D]
        proto = proto * jax.lax.rsqrt(
            jnp.sum(proto * proto, axis=-1, keepdims=True) + 1e-24)
        q = x_query * jax.lax.rsqrt(
            jnp.sum(x_query * x_query, axis=-1, keepdims=True) + 1e-24)

        # ------------------------------------------------------------------
        # cosine logits: one lane/sublane-dense (ep*nq, WAY_PAD) slab, no
        # explicit transposes (einsum contracts on the last dim of both sides).
        # ------------------------------------------------------------------
        parts = []
        for e in range(ep):                     # ep is tiny & static: unrolled
            qe = q[e * nq:(e + 1) * nq]                               # [nq, D]
            pe = proto[e * WAY_PAD:(e + 1) * WAY_PAD]                 # [WAY_PAD, D]
            parts.append(jnp.einsum('qd,kd->qk', qe, pe,
                                    preferred_element_type=f32))
        logits_ref[...] = temp * jnp.concatenate(parts, axis=0)      # [ep*nq, WAY_PAD]

        # ------------------------------------------------------------------
        # text drift score: 1 - mean cosine(text, text_old). Both sides are
        # unit-normalised, so CosineSimilarity's denominator max(1, 1e-7) == 1.
        # Zero padding rows contribute exactly 0 (epsilon-protected rsqrt).
        # ------------------------------------------------------------------
        a = tt_ref[:ns_pad, :]
        b = tt_ref[ns_pad:, :]
        a = a * jax.lax.rsqrt(jnp.sum(a * a, axis=-1, keepdims=True) + 1e-24)
        b = b * jax.lax.rsqrt(jnp.sum(b * b, axis=-1, keepdims=True) + 1e-24)
        cos = jnp.sum(a * b, axis=-1, keepdims=True)                  # [ns_pad, 1]
        score_ref[...] = 1.0 - jnp.sum(cos, axis=0, keepdims=True) * (1.0 / ns)

    return kern


def _fused_forward(params, xs_img, xq_img, text, text_old, ep, way, shot, nq):
    ns = xs_img.shape[0]
    nq_tot = xq_img.shape[0]
    ns_pad = _round_up(ns, 8)                 # sublane-align the shot rows
    feat = xs_img.shape[1]
    pad_s = ns_pad - ns

    # 5 input DMAs total: activation slab (bf16), text slab (f32), bias pack,
    # and the two folded bf16 weight matrices.
    xall = jnp.concatenate(
        [xs_img, jnp.zeros((pad_s, feat), xs_img.dtype), xq_img],
        axis=0).astype(jnp.bfloat16)                                  # [ns_pad+nq_tot, feat]
    tt = jnp.concatenate(
        [jnp.pad(text, ((0, pad_s), (0, 0))),
         jnp.pad(text_old, ((0, pad_s), (0, 0)))],
        axis=0).astype(jnp.float32)                                   # [2*ns_pad, D]

    kern = _make_fused_kernel(ns, ns_pad, ep, way, shot, nq,
                              float(params["beta"]), float(params["temp"]))
    logits_pad, score = pl.pallas_call(
        kern,
        out_shape=(
            jax.ShapeDtypeStruct((nq_tot, WAY_PAD), jnp.float32),
            jax.ShapeDtypeStruct((1, 1), jnp.float32),
        ),
        in_specs=[pl.BlockSpec(memory_space=VMEM)] * 5,
        out_specs=(
            pl.BlockSpec(memory_space=VMEM),
            pl.BlockSpec(memory_space=VMEM),
        ),
    )(xall, tt, params["bias_pack"], params["W_enc2"], params["W_text"])
    return logits_pad, score


# ----------------------------------------------------------------------------
# Parameter construction (deterministic, synthetic) + algebraic folding
# ----------------------------------------------------------------------------
def init_params(key, img_feat_dim, n_classes):
    ks = jax.random.split(key, 16)
    u = lambda k, shape, s: jax.random.uniform(k, shape, jnp.float32, -s, s)
    stdv_attn = 1.0 / math.sqrt(HIDDEN)
    params = {
        # encoder stub (real conv backbone is external)
        "W_enc": u(ks[0], (img_feat_dim, EMBED_DIM), 1.0 / math.sqrt(img_feat_dim)),
        "b_enc": u(ks[1], (EMBED_DIM,), 1.0 / math.sqrt(img_feat_dim)),
        # Attention(embed_dim=512, n_head=8, score_function='bi_linear').
        # w_q / W_bil are kept for parameter fidelity but are numerically dead
        # in this forward path (softmax over a length-1 axis).
        "Wk": u(ks[2], (EMBED_DIM, N_HEAD * HIDDEN), 1.0 / math.sqrt(EMBED_DIM)),
        "bk": u(ks[3], (N_HEAD * HIDDEN,), 1.0 / math.sqrt(EMBED_DIM)),
        "Wq": u(ks[4], (EMBED_DIM, N_HEAD * HIDDEN), 1.0 / math.sqrt(EMBED_DIM)),
        "bq": u(ks[5], (N_HEAD * HIDDEN,), 1.0 / math.sqrt(EMBED_DIM)),
        "W_bil": u(ks[6], (HIDDEN, HIDDEN), stdv_attn),
        "Wproj": u(ks[7], (N_HEAD * HIDDEN, EMBED_DIM), 1.0 / math.sqrt(N_HEAD * HIDDEN)),
        "bproj": u(ks[8], (EMBED_DIM,), 1.0 / math.sqrt(N_HEAD * HIDDEN)),
        # fc = Linear(1024, 512) + BatchNorm1d(512) + ReLU + Dropout(0.1)
        "Wfc": u(ks[9], (2 * EMBED_DIM, EMBED_DIM), 1.0 / math.sqrt(2 * EMBED_DIM)),
        "bfc": u(ks[10], (EMBED_DIM,), 1.0 / math.sqrt(2 * EMBED_DIM)),
        "bn_gamma": jnp.ones((EMBED_DIM,), jnp.float32),
        "bn_beta": jnp.zeros((EMBED_DIM,), jnp.float32),
        "bn_rmean": jnp.zeros((EMBED_DIM,), jnp.float32),
        "bn_rvar": jnp.ones((EMBED_DIM,), jnp.float32),
        # TODO(synk): PromptLearner + CLIP TextEncoder are external; replaced by
        # deterministic per-class text-feature tables of the same shape.
        "text_table": jax.random.normal(ks[11], (n_classes, EMBED_DIM), jnp.float32),
        "text_def_fea": jax.random.normal(ks[12], (n_classes, EMBED_DIM), jnp.float32),
        "ori_embedding": jax.random.normal(ks[13], (n_classes, EMBED_DIM), jnp.float32),
        # scalars
        "temp": 10.0,
        "alpha": 0.6,
        "beta": 0.5,
        "args_epoch": 5,
    }

    # ---- algebraic folding (eval mode), done once at parameter-prep time ----
    # eval-mode BatchNorm1d folded into the fc Linear:
    scale = params["bn_gamma"] * jax.lax.rsqrt(params["bn_rvar"] + 1e-5)
    wfc_fold = params["Wfc"] * scale[None, :]
    bfc_fold = (params["bfc"] - params["bn_rmean"]) * scale + params["bn_beta"]
    wfc_a = wfc_fold[:EMBED_DIM]          # multiplies x_shot_fea
    wfc_b = wfc_fold[EMBED_DIM:]          # multiplies fusion_fea

    # dead cross-attention fold: fusion @ Wfc_b == text @ (Wk @ Wproj @ Wfc_b) + b_text
    w_text = params["Wk"] @ params["Wproj"] @ wfc_b
    b_text = (params["bk"] @ params["Wproj"] + params["bproj"]) @ wfc_b
    # encoder fold: x_shot_fea @ Wfc_a == xs_img @ (W_enc @ Wfc_a) + b_enc @ Wfc_a
    w_enc_a = params["W_enc"] @ wfc_a
    b_enc_a = params["b_enc"] @ wfc_a

    params["W_enc2"] = jnp.concatenate(
        [params["W_enc"], w_enc_a], axis=1).astype(jnp.bfloat16)      # [feat, 2D]
    params["W_text"] = w_text.astype(jnp.bfloat16)                    # [D, D]
    params["bias_pack"] = jnp.stack(
        [params["b_enc"], bfc_fold + b_text + b_enc_a]).astype(jnp.float32)  # [2, D]
    return params


# ----------------------------------------------------------------------------
# MetaBaseline forward (method='cos')
# ----------------------------------------------------------------------------
def meta_baseline_forward(params, epoch, labels, x_shot, x_query):
    shot_shape = x_shot.shape[:-3]      # (ep, way, shot)
    query_shape = x_query.shape[:-3]    # (ep, nq)
    ep, way, shot = shot_shape
    nq = query_shape[1]

    xs_img = x_shot.reshape(ep * way * shot, -1).astype(jnp.float32)
    xq_img = x_query.reshape(ep * nq, -1).astype(jnp.float32)

    # text features (prompt learner + text encoder stub), indexed by labels.
    # NOTE: Python-level branch on epoch, same as the reference module.
    text_features = params["text_table"][labels]
    if epoch > params["args_epoch"]:
        text_features = (text_features * params["alpha"]
                         + params["text_def_fea"][labels] * (1.0 - params["alpha"]))
    text_features = text_features.astype(jnp.float32)
    text_features_old = params["ori_embedding"][labels].astype(jnp.float32)

    logits_pad, score = _fused_forward(
        params, xs_img, xq_img, text_features, text_features_old,
        ep, way, shot, nq)

    logits = logits_pad[:, :way].reshape(ep, nq, way)   # strip lane padding
    return logits, score[0, 0]


# ----------------------------------------------------------------------------
if __name__ == "__main__":
    key = jax.random.PRNGKey(0)
    k_p, k_s, k_q, k_l = jax.random.split(key, 4)

    # small few-shot episode: 2 episodes, 3-way, 1-shot, 4 queries, 3x8x8 images
    ep, way, shot, nq = 2, 3, 1, 4
    C, H, W = 3, 8, 8
    n_classes = 10

    x_shot = jax.random.normal(k_s, (ep, way, shot, C, H, W), jnp.float32)
    x_query = jax.random.normal(k_q, (ep, nq, C, H, W), jnp.float32)
    labels = jax.random.randint(k_l, (ep * way * shot,), 0, n_classes)

    params = init_params(k_p, C * H * W, n_classes)

    epoch = 10  # > args_epoch -> alpha-blend branch taken
    logits, score = meta_baseline_forward(params, epoch, labels, x_shot, x_query)
    jax.block_until_ready((logits, score))

    assert logits.shape == (ep, nq, way)
    assert score.shape == ()
    print("KERNEL_OK")
</pallas_src>

<mosaic_0001>
module attributes {stable_mosaic.version = 11 : i64} {
  func.func @kern(%arg0: memref<16x192xbf16, #tpu.memory_space<vmem>>, %arg1: memref<16x512xf32, #tpu.memory_space<vmem>>, %arg2: memref<2x512xf32, #tpu.memory_space<vmem>>, %arg3: memref<192x1024xbf16, #tpu.memory_space<vmem>>, %arg4: memref<512x512xbf16, #tpu.memory_space<vmem>>, %arg5: memref<8x128xf32, #tpu.memory_space<vmem>>, %arg6: memref<1x1xf32, #tpu.memory_space<vmem>>) attributes {dimension_semantics = [], scalar_prefetch = 0 : i64, scratch_operands = 0 : i64, tpu.core_type = #tpu.core_type<tc>} {
    %c0 = arith.constant 0 : index
    %c0_0 = arith.constant 0 : index
    %0 = vector.load %arg0[%c0, %c0_0] : memref<16x192xbf16, #tpu.memory_space<vmem>>, vector<16x192xbf16>
    %c0_1 = arith.constant 0 : index
    %c0_2 = arith.constant 0 : index
    %1 = vector.load %arg3[%c0_1, %c0_2] : memref<192x1024xbf16, #tpu.memory_space<vmem>>, vector<192x1024xbf16>
    %cst = arith.constant dense<0.000000e+00> : vector<16x1024xf32>
    %2 = tpu.matmul %0, %1, %cst {dimension_numbers = #tpu.dot_dimension_numbers<[1], [0], [0], [1], [0, 0, 1, 1], [], []>} : vector<16x192xbf16>, vector<192x1024xbf16>, vector<16x1024xf32> -> vector<16x1024xf32>
    %c0_3 = arith.constant 0 : index
    %c0_4 = arith.constant 0 : index
    %3 = vector.load %arg2[%c0_3, %c0_4] : memref<2x512xf32, #tpu.memory_space<vmem>>, vector<1x512xf32>
    %c1 = arith.constant 1 : index
    %c0_5 = arith.constant 0 : index
    %4 = vector.load %arg2[%c1, %c0_5] : memref<2x512xf32, #tpu.memory_space<vmem>>, vector<1x512xf32>
    %5 = vector.extract_strided_slice %2 {offsets = [0, 0], sizes = [8, 512], strides = [1, 1]} : vector<16x1024xf32> to vector<8x512xf32>
    %6 = vector.broadcast %3 : vector<1x512xf32> to vector<8x512xf32>
    %7 = arith.addf %5, %6 : vector<8x512xf32>
    %8 = vector.extract_strided_slice %2 {offsets = [8, 0], sizes = [8, 512], strides = [1, 1]} : vector<16x1024xf32> to vector<8x512xf32>
    %9 = vector.broadcast %3 : vector<1x512xf32> to vector<8x512xf32>
    %10 = arith.addf %8, %9 : vector<8x512xf32>
    %c0_6 = arith.constant 0 : index
    %c0_7 = arith.constant 0 : index
    %11 = vector.load %arg1[%c0_6, %c0_7] : memref<16x512xf32, #tpu.memory_space<vmem>>, vector<8x512xf32>
    %12 = arith.truncf %11 : vector<8x512xf32> to vector<8x512xbf16>
    %c0_8 = arith.constant 0 : index
    %c0_9 = arith.constant 0 : index
    %13 = vector.load %arg4[%c0_8, %c0_9] : memref<512x512xbf16, #tpu.memory_space<vmem>>, vector<512x512xbf16>
    %cst_10 = arith.constant dense<0.000000e+00> : vector<8x512xf32>
    %14 = tpu.matmul %12, %13, %cst_10 {dimension_numbers = #tpu.dot_dimension_numbers<[1], [0], [0], [1], [0, 0, 1, 1], [], []>} : vector<8x512xbf16>, vector<512x512xbf16>, vector<8x512xf32> -> vector<8x512xf32>
    %15 = vector.extract_strided_slice %2 {offsets = [0, 512], sizes = [8, 512], strides = [1, 1]} : vector<16x1024xf32> to vector<8x512xf32>
    %16 = arith.addf %15, %14 : vector<8x512xf32>
    %17 = vector.broadcast %4 : vector<1x512xf32> to vector<8x512xf32>
    %18 = arith.addf %16, %17 : vector<8x512xf32>
    %cst_11 = arith.constant 0.000000e+00 : f32
    %19 = vector.broadcast %cst_11 : f32 to vector<8x512xf32>
    %20 = arith.maximumf %18, %19 : vector<8x512xf32>
    %cst_12 = arith.constant 5.000000e-01 : f32
    %21 = vector.broadcast %cst_12 : f32 to vector<8x512xf32>
    %22 = arith.mulf %20, %21 : vector<8x512xf32>
    %cst_13 = arith.constant 5.000000e-01 : f32
    %23 = vector.broadcast %cst_13 : f32 to vector<8x512xf32>
    %24 = arith.mulf %7, %23 : vector<8x512xf32>
    %25 = arith.addf %22, %24 : vector<8x512xf32>
    %26 = tpu.iota {dimensions = array<i32: 0>} : vector<256x8xi32>
    %27 = tpu.iota {dimensions = array<i32: 1>} : vector<256x8xi32>
    %c7_i32 = arith.constant 7 : i32
    %28 = vector.broadcast %c7_i32 : i32 to vector<256x8xi32>
    %29 = arith.shrsi %26, %28 : vector<256x8xi32>
    %c127_i32 = arith.constant 127 : i32
    %30 = vector.broadcast %c127_i32 : i32 to vector<256x8xi32>
    %31 = arith.andi %26, %30 : vector<256x8xi32>
    %c3_i32 = arith.constant 3 : i32
    %32 = vector.broadcast %c3_i32 : i32 to vector<256x8xi32>
    %33 = arith.muli %29, %32 : vector<256x8xi32>
    %c1_i32 = arith.constant 1 : i32
    %34 = vector.broadcast %c1_i32 : i32 to vector<256x8xi32>
    %35 = arith.muli %31, %34 : vector<256x8xi32>
    %36 = arith.addi %33, %35 : vector<256x8xi32>
    %c3_i32_14 = arith.constant 3 : i32
    %37 = vector.broadcast %c3_i32_14 : i32 to vector<256x8xi32>
    %38 = arith.cmpi slt, %31, %37 : vector<256x8xi32>
    %39 = arith.cmpi sge, %27, %36 : vector<256x8xi32>
    %40 = arith.andi %38, %39 : vector<256x8xi1>
    %c1_i32_15 = arith.constant 1 : i32
    %41 = vector.broadcast %c1_i32_15 : i32 to vector<256x8xi32>
    %42 = arith.addi %36, %41 : vector<256x8xi32>
    %43 = arith.cmpi slt, %27, %42 : vector<256x8xi32>
    %44 = arith.andi %40, %43 : vector<256x8xi1>
    %c6_i32 = arith.constant 6 : i32
    %45 = vector.broadcast %c6_i32 : i32 to vector<256x8xi32>
    %46 = arith.cmpi slt, %27, %45 : vector<256x8xi32>
    %47 = arith.andi %44, %46 : vector<256x8xi1>
    %48 = arith.extui %47 : vector<256x8xi1> to vector<256x8xi32>
    %49 = arith.sitofp %48 : vector<256x8xi32> to vector<256x8xf32>
    %cst_16 = arith.constant 1.000000e+00 : f32
    %50 = vector.broadcast %cst_16 : f32 to vector<256x8xf32>
    %51 = arith.mulf %49, %50 : vector<256x8xf32>
    %cst_17 = arith.constant dense<0.000000e+00> : vector<256x512xf32>
    %52 = tpu.matmul %51, %25, %cst_17 {dimension_numbers = #tpu.dot_dimension_numbers<[1], [0], [0], [1], [0, 0, 1, 1], [], []>} : vector<256x8xf32>, vector<8x512xf32>, vector<256x512xf32> -> vector<256x512xf32>
    %53 = arith.mulf %52, %52 : vector<256x512xf32>
    %cst_18 = arith.constant dense<0.000000e+00> : vector<256xf32>
    %54 = vector.multi_reduction <add>, %53, %cst_18 [1] : vector<256x512xf32> to vector<256xf32>
    %55 = vector.shape_cast %54 : vector<256xf32> to vector<256x1xf32>
    %cst_19 = arith.constant 1.000000e-24 : f32
    %56 = vector.broadcast %cst_19 : f32 to vector<256x1xf32>
    %57 = arith.addf %55, %56 : vector<256x1xf32>
    %58 = math.rsqrt %57 : vector<256x1xf32>
    %59 = vector.broadcast %58 : vector<256x1xf32> to vector<256x512xf32>
    %60 = arith.mulf %52, %59 : vector<256x512xf32>
    %61 = arith.mulf %10, %10 : vector<8x512xf32>
    %cst_20 = arith.constant dense<0.000000e+00> : vector<8xf32>
    %62 = vector.multi_reduction <add>, %61, %cst_20 [1] : vector<8x512xf32> to vector<8xf32>
    %63 = vector.shape_cast %62 : vector<8xf32> to vector<8x1xf32>
    %cst_21 = arith.constant 1.000000e-24 : f32
    %64 = vector.broadcast %cst_21 : f32 to vector<8x1xf32>
    %65 = arith.addf %63, %64 : vector<8x1xf32>
    %66 = math.rsqrt %65 : vector<8x1xf32>
    %67 = vector.broadcast %66 : vector<8x1xf32> to vector<8x512xf32>
    %68 = arith.mulf %10, %67 : vector<8x512xf32>
    %69 = vector.extract_strided_slice %68 {offsets = [0, 0], sizes = [4, 512], strides = [1, 1]} : vector<8x512xf32> to vector<4x512xf32>
    %70 = vector.extract_strided_slice %60 {offsets = [0, 0], sizes = [128, 512], strides = [1, 1]} : vector<256x512xf32> to vector<128x512xf32>
    "tpu.trace_start"() <{level = 10 : i32, message = "qd,kd->qk"}> : () -> ()
    %cst_22 = arith.constant dense<0.000000e+00> : vector<4x128xf32>
    %71 = tpu.matmul %69, %70, %cst_22 {dimension_numbers = #tpu.dot_dimension_numbers<[1], [1], [0], [0], [0, 0, 1, 0], [], []>} : vector<4x512xf32>, vector<128x512xf32>, vector<4x128xf32> -> vector<4x128xf32>
    "tpu.trace_stop"() : () -> ()
    %72 = vector.extract_strided_slice %68 {offsets = [4, 0], sizes = [4, 512], strides = [1, 1]} : vector<8x512xf32> to vector<4x512xf32>
    %73 = vector.extract_strided_slice %60 {offsets = [128, 0], sizes = [128, 512], strides = [1, 1]} : vector<256x512xf32> to vector<128x512xf32>
    "tpu.trace_start"() <{level = 10 : i32, message = "qd,kd->qk"}> : () -> ()
    %cst_23 = arith.constant dense<0.000000e+00> : vector<4x128xf32>
    %74 = tpu.matmul %72, %73, %cst_23 {dimension_numbers = #tpu.dot_dimension_numbers<[1], [1], [0], [0], [0, 0, 1, 0], [], []>} : vector<4x512xf32>, vector<128x512xf32>, vector<4x128xf32> -> vector<4x128xf32>
    "tpu.trace_stop"() : () -> ()
    %75 = tpu.concatenate %71, %74 in 0 : vector<4x128xf32>, vector<4x128xf32> -> vector<8x128xf32>
    %cst_24 = arith.constant 1.000000e+01 : f32
    %76 = vector.broadcast %cst_24 : f32 to vector<8x128xf32>
    %77 = arith.mulf %76, %75 : vector<8x128xf32>
    %c0_25 = arith.constant 0 : index
    %c0_26 = arith.constant 0 : index
    %78 = vector.load %arg5[%c0_25, %c0_26] : memref<8x128xf32, #tpu.memory_space<vmem>>, vector<8x128xf32>
    tpu.vector_store %arg5[%c0_25, %c0_26], %77 {strides = array<i32>} : memref<8x128xf32, #tpu.memory_space<vmem>>, vector<8x128xf32>,
    %c0_27 = arith.constant 0 : index
    %c0_28 = arith.constant 0 : index
    %79 = vector.load %arg1[%c0_27, %c0_28] : memref<16x512xf32, #tpu.memory_space<vmem>>, vector<8x512xf32>
    %c8 = arith.constant 8 : index
    %c0_29 = arith.constant 0 : index
    %80 = vector.load %arg1[%c8, %c0_29] : memref<16x512xf32, #tpu.memory_space<vmem>>, vector<8x512xf32>
    %81 = arith.mulf %79, %79 : vector<8x512xf32>
    %cst_30 = arith.constant dense<0.000000e+00> : vector<8xf32>
    %82 = vector.multi_reduction <add>, %81, %cst_30 [1] : vector<8x512xf32> to vector<8xf32>
    %83 = vector.shape_cast %82 : vector<8xf32> to vector<8x1xf32>
    %cst_31 = arith.constant 1.000000e-24 : f32
    %84 = vector.broadcast %cst_31 : f32 to vector<8x1xf32>
    %85 = arith.addf %83, %84 : vector<8x1xf32>
    %86 = math.rsqrt %85 : vector<8x1xf32>
    %87 = vector.broadcast %86 : vector<8x1xf32> to vector<8x512xf32>
    %88 = arith.mulf %79, %87 : vector<8x512xf32>
    %89 = arith.mulf %80, %80 : vector<8x512xf32>
    %cst_32 = arith.constant dense<0.000000e+00> : vector<8xf32>
    %90 = vector.multi_reduction <add>, %89, %cst_32 [1] : vector<8x512xf32> to vector<8xf32>
    %91 = vector.shape_cast %90 : vector<8xf32> to vector<8x1xf32>
    %cst_33 = arith.constant 1.000000e-24 : f32
    %92 = vector.broadcast %cst_33 : f32 to vector<8x1xf32>
    %93 = arith.addf %91, %92 : vector<8x1xf32>
    %94 = math.rsqrt %93 : vector<8x1xf32>
    %95 = vector.broadcast %94 : vector<8x1xf32> to vector<8x512xf32>
    %96 = arith.mulf %80, %95 : vector<8x512xf32>
    %97 = arith.mulf %88, %96 : vector<8x512xf32>
    %cst_34 = arith.constant dense<0.000000e+00> : vector<8xf32>
    %98 = vector.multi_reduction <add>, %97, %cst_34 [1] : vector<8x512xf32> to vector<8xf32>
    %99 = vector.shape_cast %98 : vector<8xf32> to vector<8x1xf32>
    %cst_35 = arith.constant dense<0.000000e+00> : vector<1xf32>
    %100 = vector.multi_reduction <add>, %99, %cst_35 [0] : vector<8x1xf32> to vector<1xf32>
    %101 = vector.shape_cast %100 : vector<1xf32> to vector<1x1xf32>
    %cst_36 = arith.constant 0.166666672 : f32
    %102 = vector.broadcast %cst_36 : f32 to vector<1x1xf32>
    %103 = arith.mulf %101, %102 : vector<1x1xf32>
    %cst_37 = arith.constant 1.000000e+00 : f32
    %104 = vector.broadcast %cst_37 : f32 to vector<1x1xf32>
    %105 = arith.subf %104, %103 : vector<1x1xf32>
    %c0_38 = arith.constant 0 : index
    %c0_39 = arith.constant 0 : index
    %106 = vector.load %arg6[%c0_38, %c0_39] : memref<1x1xf32, #tpu.memory_space<vmem>>, vector<1x1xf32>
    tpu.vector_store %arg6[%c0_38, %c0_39], %105 {strides = array<i32>} : memref<1x1xf32, #tpu.memory_space<vmem>>, vector<1x1xf32>,
    return
  }
}

</mosaic_0001>

<bundles_post_ra>
// kernel: tpu_custom_call.1
= control target key start
LH: loop header
LB: loop body
LE: loop exit
PB: predicated region body
PF: predicated region fallthrough
CT: control target
= control target key end

     0   :  { %12 = vsyncpa [#allocation3], 0  ;;  %s7085_s0 = inlined_call_operand.hbm [shape: bf16[16,192], index: 0, kind: input, shape index: {}]   ;;  %s7086_s1 = inlined_call_operand.hbm [shape: f32[16,512], index: 1, kind: input, shape index: {}]   ;;  %s7087_s2 = inlined_call_operand.hbm [shape: f32[2,512], index: 2, kind: input, shape index: {}]   ;;  %s7088_s3 = inlined_call_operand.hbm [shape: bf16[192,1024], index: 3, kind: input, shape index: {}]   ;;  %s7089_s4 = inlined_call_operand.hbm [shape: bf16[512,512], index: 4, kind: input, shape index: {}]   ;;  %s7090_s5 = inlined_call_operand.hbm [shape: f32[8,128], index: 5, kind: output, shape index: {0}]   ;;  %s7091_s6 = inlined_call_operand.hbm [shape: f32[1,1], index: 6, kind: output, shape index: {1}]  }
   0x1   :  { %13 = vsyncpa [#allocation6], 0 }
   0x2   :  { %14 = vsyncpa [#allocation9], 0 }
   0x3   :  { %15 = vsyncpa [#allocation4], 0  ;;  %s34_s23 = sshll.u32 %s7086_s1, 4  ;;  %s35_s23 = int_to_ptr.hbm [resolvable:$true] %s34_s23 }
   0x4   :  { %16 = vsyncpa [#allocation13], 0  ;;  %s5437_s24 = smov [#allocation5]   ;;  %s58_s28 = sshll.u32 %s7088_s3, 4  ;;  %s59_s28 = int_to_ptr.hbm [resolvable:$true] %s58_s28 }
   0x5   :  { %s36_s25 = sshll.u32 %s5437_s24, 4  ;;  %s5438_s29 = smov 512   ;;  %s37_s25 = int_to_ptr.vmem [resolvable:$true] %s36_s25 }
   0x6   :  { %s5439_s30 = smov 32   ;;  %s5440_s7 = smov [#allocation8]  }
   0x7   :  { %42 = dma.hbm_to_vmem [thread:$0]  %s35_s23, 1024, %s37_s25, [#allocation6], %s5438_s29, %s5438_s29, %s5439_s30  }
   0x8   :  { %s60_s8 = sshll.u32 %s5440_s7, 4  ;;  %s21_s11 = sshll.u32 %s7085_s0, 4  ;;  %s61_s8 = int_to_ptr.vmem [resolvable:$true] %s60_s8  ;;  %s22_s11 = int_to_ptr.hbm [resolvable:$true] %s21_s11 }
   0x9   :  { %66 = dma.hbm_to_vmem [thread:$0]  %s59_s28, 12288, %s61_s8, [#allocation9], %s5438_s29, %s5438_s29, %s5439_s30  }
   0xa   :  { %s5441_s1 = smov [#allocation2]   ;;  %s48_s3 = sshll.u32 %s7087_s2, 4  ;;  %s49_s3 = int_to_ptr.hbm [resolvable:$true] %s48_s3 }
   0xb   :  { %s23_s12 = sshll.u32 %s5441_s1, 4  ;;  %s5442_s15 = smov 128   ;;  %s24_s12 = int_to_ptr.vmem [resolvable:$true] %s23_s12 }
   0xc   :  { %s5443_s16 = smov 8   ;;  %s5444_s17 = smov [#allocation7]  }
   0xd   :  { %29 = dma.hbm_to_vmem [thread:$0]  %s22_s11, 256, %s24_s12, [#allocation3], %s5442_s15, %s5442_s15, %s5443_s16  }
   0xe   :  { %s50_s18 = sshll.u32 %s5444_s17, 4  ;;  %s71_s0 = sshll.u32 %s7089_s4, 4  ;;  %s51_s18 = int_to_ptr.vmem [resolvable:$true] %s50_s18  ;;  %s72_s0 = int_to_ptr.hbm [resolvable:$true] %s71_s0 }
   0xf   :  { %53 = dma.hbm_to_vmem [thread:$0]  %s49_s3, 128, %s51_s18, [#allocation6]  }
  0x10   :  { %s5445_s21 = smov [#allocation10]   ;;  %s5446_s23 = smov 256  }
  0x11   :  { %s73_s22 = sshll.u32 %s5445_s21, 4  ;;  %s5447_s24 = smov 16   ;;  %s74_s22 = int_to_ptr.vmem [resolvable:$true] %s73_s22 }
  0x12   :  { %79 = dma.hbm_to_vmem [thread:$0]  %s72_s0, 16384, %s74_s22, [#allocation9], %s5446_s23, %s5446_s23, %s5447_s24  }
  0x13   :  { %5427 = dma.done.wait [#allocation3], 256  }
  0x14   :  { %5428 = vsyncadd [#allocation3], 4294967040 }
  0x15   :  { %5429 = dma.done.wait [#allocation6], 1152  }
  0x16   :  { %5430 = vsyncadd [#allocation6], 4294966144 }
  0x17   :  { %5431 = dma.done.wait [#allocation9], 28672  }
  0x18   :  { %5432 = vsyncadd [#allocation9], 4294938624  ;;  %v4261_v0 = vld [vmem:[#allocation8 + $0x1c0] sm:$0xf]  ;;  %v5007_v5 = vld [vmem:[#allocation8 + $0x1c4] sm:$0xf] }
  0x19   :  { %v5011_v1 = vld [vmem:[#allocation8 + $0x1dc] sm:$0xf0]  ;;  %v4263_v6 = vld [vmem:[#allocation8 + $0x1e0] sm:$0xf0]  ;;  %v4269_v44 = vld [vmem:[#allocation8 + $0x1c8] sm:$0xf] }
  0x1a   :  { %v4389_v2 = vld [vmem:[#allocation8 + $0x2c0] sm:$0xf]  ;;  %v4262_v3 = vor.u32 %v5011_v1, %v4261_v0  ;;  %v4266_v8 = vor.u32 %v5007_v5, %v4263_v6  ;;  %v5039_v9 = vld [vmem:[#allocation8 + $0x2c4] sm:$0xf]  ;;  %v5012_v46 = vld [vmem:[#allocation8 + $0x1e4] sm:$0xf0] }
  0x1b   :  { %v5043_v4 = vld [vmem:[#allocation8 + $0x2dc] sm:$0xf0]  ;;  %v4391_v10 = vld [vmem:[#allocation8 + $0x2e0] sm:$0xf0]  ;;  %v4397_v47 = vld [vmem:[#allocation8 + $0x2c8] sm:$0xf]  ;;  %v4270_v54 = vor.u32 %v5012_v46, %v4269_v44 }
  0x1c   :  { %v4390_v7 = vor.u32 %v5043_v4, %v4389_v2  ;;  %v4229_v11 = vld [vmem:[#allocation8 + $0x180] sm:$0xf]  ;;  %692 = vmatpush.bf16.msra.mxu0 %v4262_v3  ;;  %v4394_v12 = vor.u32 %v5039_v9, %v4391_v10  ;;  %720 = vmatpush.bf16.msra.mxu2 %v4266_v8  ;;  %v4999_v18 = vld [vmem:[#allocation8 + $0x184] sm:$0xf]  ;;  %v5044_v48 = vld [vmem:[#allocation8 + $0x2e4] sm:$0xf0] }
  0x1d   :  { %v5003_v13 = vld [vmem:[#allocation8 + $0x19c] sm:$0xf0]  ;;  %v4231_v19 = vld [vmem:[#allocation8 + $0x1a0] sm:$0xf0]  ;;  %v4398_v57 = vor.u32 %v5044_v48, %v4397_v47  ;;  %v4237_v58 = vld [vmem:[#allocation8 + $0x188] sm:$0xf] }
  0x1e   :  { %v4357_v14 = vld [vmem:[#allocation8 + $0x280] sm:$0xf]  ;;  %710 = vmatpush.bf16.msra.mxu1 %v4390_v7  ;;  %v4230_v16 = vor.u32 %v5003_v13, %v4229_v11  ;;  %v5031_v20 = vld [vmem:[#allocation8 + $0x284] sm:$0xf]  ;;  %738 = vmatpush.bf16.msra.mxu3 %v4394_v12  ;;  %v4234_v21 = vor.u32 %v4999_v18, %v4231_v19  ;;  %v5004_v59 = vld [vmem:[#allocation8 + $0x1a4] sm:$0xf0] }
  0x1f   :  { %v5035_v15 = vld [vmem:[#allocation8 + $0x29c] sm:$0xf0]  ;;  %v4359_v22 = vld [vmem:[#allocation8 + $0x2a0] sm:$0xf0]  ;;  %v4949_v60 = vld [vmem:[#allocation2 + $0x4] sm:$0xf]  ;;  %v4238_v5 = vor.u32 %v5004_v59, %v4237_v58 }
  0x20   :  { %v4358_v17 = vor.u32 %v5035_v15, %v4357_v14  ;;  %v4197_v23 = vld [vmem:[#allocation8 + $0x140] sm:$0xf]  ;;  %v4362_v25 = vor.u32 %v5031_v20, %v4359_v22  ;;  %v4991_v28 = vld [vmem:[#allocation8 + $0x144] sm:$0xf]  ;;  %693 = vmatpush.bf16.msra.mxu0 %v4230_v16  ;;  %721 = vmatpush.bf16.msra.mxu2 %v4234_v21  ;;  %v4365_v62 = vld [vmem:[#allocation8 + $0x288] sm:$0xf] }
  0x21   :  { %v4995_v24 = vld [vmem:[#allocation8 + $0x15c] sm:$0xf0]  ;;  %v4199_v30 = vld [vmem:[#allocation8 + $0x160] sm:$0xf0]  ;;  %v5036_v63 = vld [vmem:[#allocation8 + $0x2a4] sm:$0xf0] }
  0x22   :  { %v4325_v26 = vld [vmem:[#allocation8 + $0x240] sm:$0xf]  ;;  %v4198_v29 = vor.u32 %v4995_v24, %v4197_v23  ;;  %v5023_v31 = vld [vmem:[#allocation8 + $0x244] sm:$0xf]  ;;  %711 = vmatpush.bf16.msra.mxu1 %v4358_v17  ;;  %v4202_v34 = vor.u32 %v4991_v28, %v4199_v30  ;;  %739 = vmatpush.bf16.msra.mxu3 %v4362_v25  ;;  %v4031_v0 = vld [vmem:[#allocation2 + $0x8] sm:$0xf0]  ;;  %v4366_v8 = vor.u32 %v5036_v63, %v4365_v62 }
  0x23   :  { %v5027_v27 = vld [vmem:[#allocation8 + $0x25c] sm:$0xf0]  ;;  %v4327_v32 = vld [vmem:[#allocation8 + $0x260] sm:$0xf0]  ;;  %v5501_v2 = vor.u32 %v4949_v60, %v4031_v0  ;;  %vm688_vm0 = vcmask 523264   ;;  %vm2397_vm8 = vcmask 64512  }
  0x24   :  { %v4326_v33 = vor.u32 %v5027_v27, %v4325_v26  ;;  %v4165_v35 = vld [vmem:[#allocation8 + $0x100] sm:$0xf]  ;;  %v4330_v38 = vor.u32 %v5023_v31, %v4327_v32  ;;  %v4983_v40 = vld [vmem:[#allocation8 + $0x104] sm:$0xf]  ;;  %694 = vmatpush.bf16.msra.mxu0 %v4198_v29  ;;  %722 = vmatpush.bf16.msra.mxu2 %v4202_v34  ;;  %v4205_v9 = vld [vmem:[#allocation8 + $0x148] sm:$0xf] }
  0x25   :  { %v4987_v36 = vld [vmem:[#allocation8 + $0x11c] sm:$0xf0]  ;;  %v4167_v41 = vld [vmem:[#allocation8 + $0x120] sm:$0xf0]  ;;  %v4996_v10 = vld [vmem:[#allocation8 + $0x164] sm:$0xf0] }
  0x26   :  { %v4293_v37 = vld [vmem:[#allocation8 + $0x200] sm:$0xf]  ;;  %v5015_v42 = vld [vmem:[#allocation8 + $0x204] sm:$0xf]  ;;  %v4166_v45 = vor.u32 %v4987_v36, %v4165_v35  ;;  %712 = vmatpush.bf16.msra.mxu1 %v4326_v33  ;;  %v4170_v50 = vor.u32 %v4983_v40, %v4167_v41  ;;  %740 = vmatpush.bf16.msra.mxu3 %v4330_v38  ;;  %v4333_v12 = vld [vmem:[#allocation8 + $0x248] sm:$0xf]  ;;  %v4206_v17 = vor.u32 %v4996_v10, %v4205_v9 }
  0x27   :  { %v5019_v39 = vld [vmem:[#allocation8 + $0x21c] sm:$0xf0]  ;;  %v4295_v43 = vld [vmem:[#allocation8 + $0x220] sm:$0xf0]  ;;  %v5028_v13 = vld [vmem:[#allocation8 + $0x264] sm:$0xf0] }
  0x28   :  { %v4294_v49 = vor.u32 %v5019_v39, %v4293_v37  ;;  %v4133_v51 = vld [vmem:[#allocation8 + $0xc0] sm:$0xf]  ;;  %v4298_v53 = vor.u32 %v5015_v42, %v4295_v43  ;;  %v4975_v55 = vld [vmem:[#allocation8 + $0xc4] sm:$0xf]  ;;  %695 = vmatpush.bf16.msra.mxu0 %v4166_v45  ;;  %723 = vmatpush.bf16.msra.mxu2 %v4170_v50  ;;  %v4173_v20 = vld [vmem:[#allocation8 + $0x108] sm:$0xf]  ;;  %v4334_v21 = vor.u32 %v5028_v13, %v4333_v12 }
  0x29   :  { %v4979_v52 = vld [vmem:[#allocation8 + $0xdc] sm:$0xf0]  ;;  %v4135_v56 = vld [vmem:[#allocation8 + $0xe0] sm:$0xf0]  ;;  %v4988_v22 = vld [vmem:[#allocation8 + $0x124] sm:$0xf0] }
  0x2a   :  { %v4134_v61 = vor.u32 %v4979_v52, %v4133_v51  ;;  %713 = vmatpush.bf16.msra.mxu1 %v4294_v49  ;;  %v4138_v1 = vor.u32 %v4975_v55, %v4135_v56  ;;  %v4101_v3 = vld [vmem:[#allocation8 + $0x80] sm:$0xf]  ;;  %741 = vmatpush.bf16.msra.mxu3 %v4298_v53  ;;  %v4967_v6 = vld [vmem:[#allocation8 + $0x84] sm:$0xf]  ;;  %v4301_v23 = vld [vmem:[#allocation8 + $0x208] sm:$0xf]  ;;  %v4174_v33 = vor.u32 %v4988_v22, %v4173_v20 }
  0x2b   :  { %v4971_v4 = vld [vmem:[#allocation8 + $0x9c] sm:$0xf0]  ;;  %v4103_v7 = vld [vmem:[#allocation8 + $0xa0] sm:$0xf0]  ;;  %v5020_v24 = vld [vmem:[#allocation8 + $0x224] sm:$0xf0] }
  0x2c   :  { %696 = vmatpush.bf16.msra.mxu0 %v4134_v61  ;;  %v4102_v11 = vor.u32 %v4971_v4, %v4101_v3  ;;  %724 = vmatpush.bf16.msra.mxu2 %v4138_v1  ;;  %v4106_v14 = vor.u32 %v4967_v6, %v4103_v7  ;;  %v4069_v15 = vld [vmem:[#allocation8 + $0x40] sm:$0xf]  ;;  %v4959_v18 = vld [vmem:[#allocation8 + $0x44] sm:$0xf]  ;;  %v4277_v26 = vld [vmem:[#allocation8 + $0x1d0] sm:$0xf]  ;;  %v4302_v37 = vor.u32 %v5020_v24, %v4301_v23 }
  0x2d   :  { %4419 = vmatmul.msk.bf16.vlgmr.msra.gmra.mxu1 %vm688_vm0, %v5501_v2  ;;  %4420 = vmatmul.msk.bf16.vlgmr.msra.gmra.mxu3 %vm688_vm0, %v5501_v2  ;;  %v4963_v16 = vld [vmem:[#allocation8 + $0x5c] sm:$0xf0]  ;;  %v4071_v19 = vld [vmem:[#allocation8 + $0x60] sm:$0xf0]  ;;  %v5013_v27 = vld [vmem:[#allocation8 + $0x1ec] sm:$0xf0] }
  0x2e   :  { %748 = vmatpush.bf16.msrb.mxu1 %v4270_v54  ;;  %766 = vmatpush.bf16.msrb.mxu3 %v4398_v57  ;;  %v4070_v25 = vor.u32 %v4963_v16, %v4069_v15  ;;  %v4037_v28 = vld [vmem:[#allocation8] sm:$0xf]  ;;  %v4074_v29 = vor.u32 %v4959_v18, %v4071_v19  ;;  %v4951_v31 = vld [vmem:[#allocation8 + $0x4] sm:$0xf]  ;;  %v4141_v34 = vld [vmem:[#allocation8 + $0xc8] sm:$0xf]  ;;  %v4278_v41 = vor.u32 %v5013_v27, %v4277_v26 }
  0x2f   :  { %v4955_v30 = vld [vmem:[#allocation8 + $0x1c] sm:$0xf0]  ;;  %v4039_v32 = vld [vmem:[#allocation8 + $0x20] sm:$0xf0]  ;;  %v5008_v35 = vld [vmem:[#allocation8 + $0x1cc] sm:$0xf] }
  0x30   :  { %697 = vmatpush.bf16.msra.mxu0 %v4102_v11  ;;  %725 = vmatpush.bf16.msra.mxu2 %v4106_v14  ;;  %v4271_v36 = vld [vmem:[#allocation8 + $0x1e8] sm:$0xf0]  ;;  %v4980_v38 = vld [vmem:[#allocation8 + $0xe4] sm:$0xf0]  ;;  %v4038_v42 = vor.u32 %v4955_v30, %v4037_v28  ;;  %v4245_v43 = vld [vmem:[#allocation8 + $0x190] sm:$0xf]  ;;  %v4042_v44 = vor.u32 %v4951_v31, %v4039_v32 }
  0x31   :  { %v5040_v39 = vld [vmem:[#allocation8 + $0x2cc] sm:$0xf]  ;;  %v4274_v45 = vor.u32 %v5008_v35, %v4271_v36  ;;  %v5005_v46 = vld [vmem:[#allocation8 + $0x1ac] sm:$0xf0]  ;;  %v4029_v47 = vld [vmem:[#allocation2] sm:$0xf]  ;;  %v4142_v49 = vor.u32 %v4980_v38, %v4141_v34 }
  0x32   :  { %749 = vmatpush.bf16.msrb.mxu1 %v4238_v5  ;;  %767 = vmatpush.bf16.msrb.mxu3 %v4366_v8  ;;  %v4399_v40 = vld [vmem:[#allocation8 + $0x2e8] sm:$0xf0]  ;;  %v4950_v48 = vld [vmem:[#allocation2 + $0x4] sm:$0xf0]  ;;  %v4109_v51 = vld [vmem:[#allocation8 + $0x88] sm:$0xf]  ;;  %v4246_v57 = vor.u32 %v5005_v46, %v4245_v43 }
  0x33   :  { %v4402_v50 = vor.u32 %v5040_v39, %v4399_v40  ;;  %v5000_v52 = vld [vmem:[#allocation8 + $0x18c] sm:$0xf]  ;;  %v4972_v54 = vld [vmem:[#allocation8 + $0xa4] sm:$0xf0]  ;;  %v5507_v58 = vor.u32 %v4950_v48, %v4029_v47  ;;  %v4213_v60 = vld [vmem:[#allocation8 + $0x150] sm:$0xf] }
  0x34   :  { %698 = vmatpush.bf16.msra.mxu0 %v4070_v25  ;;  %726 = vmatpush.bf16.msra.mxu2 %v4074_v29  ;;  %v4239_v53 = vld [vmem:[#allocation8 + $0x1a8] sm:$0xf0]  ;;  %v4997_v61 = vld [vmem:[#allocation8 + $0x16c] sm:$0xf0]  ;;  %v4110_v62 = vor.u32 %v4972_v54, %v4109_v51  ;;  %v4077_v0 = vld [vmem:[#allocation8 + $0x48] sm:$0xf] }
  0x35   :  { %v5032_v55 = vld [vmem:[#allocation8 + $0x28c] sm:$0xf]  ;;  %v4242_v59 = vor.u32 %v5000_v52, %v4239_v53  ;;  %v4964_v4 = vld [vmem:[#allocation8 + $0x64] sm:$0xf0]  ;;  %v4214_v7 = vor.u32 %v4997_v61, %v4213_v60  ;;  %v4181_v9 = vld [vmem:[#allocation8 + $0x110] sm:$0xf] }
  0x36   :  { %750 = vmatpush.bf16.msrb.mxu1 %v4206_v17  ;;  %768 = vmatpush.bf16.msrb.mxu3 %v4334_v21  ;;  %v4367_v56 = vld [vmem:[#allocation8 + $0x2a8] sm:$0xf0]  ;;  %v4989_v10 = vld [vmem:[#allocation8 + $0x12c] sm:$0xf0]  ;;  %v4045_v11 = vld [vmem:[#allocation8 + $0x8] sm:$0xf]  ;;  %v4078_v12 = vor.u32 %v4964_v4, %v4077_v0 }
  0x37   :  { %v4370_v63 = vor.u32 %v5032_v55, %v4367_v56  ;;  %v4992_v1 = vld [vmem:[#allocation8 + $0x14c] sm:$0xf]  ;;  %v4956_v14 = vld [vmem:[#allocation8 + $0x24] sm:$0xf0]  ;;  %v4405_v19 = vld [vmem:[#allocation8 + $0x2d0] sm:$0xf]  ;;  %v4182_v20 = vor.u32 %v4989_v10, %v4181_v9 }
  0x38   :  { %699 = vmatpush.bf16.msra.mxu0 %v4038_v42  ;;  %727 = vmatpush.bf16.msra.mxu2 %v4042_v44  ;;  %v4207_v3 = vld [vmem:[#allocation8 + $0x168] sm:$0xf0]  ;;  %v5045_v21 = vld [vmem:[#allocation8 + $0x2ec] sm:$0xf0]  ;;  %v5009_v22 = vld [vmem:[#allocation8 + $0x1d4] sm:$0xf]  ;;  %v4046_v27 = vor.u32 %v4956_v14, %v4045_v11 }
  0x39   :  { %v5024_v5 = vld [vmem:[#allocation8 + $0x24c] sm:$0xf]  ;;  %v4210_v8 = vor.u32 %v4992_v1, %v4207_v3  ;;  %v4279_v23 = vld [vmem:[#allocation8 + $0x1f0] sm:$0xf0]  ;;  %v4149_v25 = vld [vmem:[#allocation8 + $0xd0] sm:$0xf]  ;;  %v4406_v31 = vor.u32 %v5045_v21, %v4405_v19 }
  0x3a   :  { %751 = vmatpush.bf16.msrb.mxu1 %v4174_v33  ;;  %769 = vmatpush.bf16.msrb.mxu3 %v4302_v37  ;;  %v4335_v6 = vld [vmem:[#allocation8 + $0x268] sm:$0xf0]  ;;  %v4981_v26 = vld [vmem:[#allocation8 + $0xec] sm:$0xf0]  ;;  %v4282_v32 = vor.u32 %v5009_v22, %v4279_v23  ;;  %v5001_v36 = vld [vmem:[#allocation8 + $0x194] sm:$0xf] }
  0x3b   :  { %700 = vmatmul.bf16.vlgmr.msra.gmra.mxu0 %v5507_v58  ;;  %728 = vmatmul.bf16.vlgmr.msra.gmra.mxu2 %v5507_v58  ;;  %v4338_v13 = vor.u32 %v5024_v5, %v4335_v6  ;;  %v4984_v15 = vld [vmem:[#allocation8 + $0x10c] sm:$0xf]  ;;  %v4373_v33 = vld [vmem:[#allocation8 + $0x290] sm:$0xf]  ;;  %v4150_v34 = vor.u32 %v4981_v26, %v4149_v25  ;;  %v4247_v37 = vld [vmem:[#allocation8 + $0x1b0] sm:$0xf0] }
  0x3c   :  { %776 = vmatpush.bf16.msrb.mxu0 %v4274_v45  ;;  %794 = vmatpush.bf16.msrb.mxu2 %v4402_v50  ;;  %v4175_v16 = vld [vmem:[#allocation8 + $0x128] sm:$0xf0]  ;;  %v5037_v35 = vld [vmem:[#allocation8 + $0x2ac] sm:$0xf0]  ;;  %v4250_v44 = vor.u32 %v5001_v36, %v4247_v37  ;;  %v4993_v48 = vld [vmem:[#allocation8 + $0x154] sm:$0xf] }
  0x3d   :  { %4421 = vmatmul.msk.bf16.vlgmr.msrb.gmra.mxu3 %vm688_vm0, %v5501_v2  ;;  %v5016_v17 = vld [vmem:[#allocation8 + $0x20c] sm:$0xf]  ;;  %v4178_v24 = vor.u32 %v4984_v15, %v4175_v16  ;;  %v4117_v39 = vld [vmem:[#allocation8 + $0x90] sm:$0xf]  ;;  %v4374_v43 = vor.u32 %v5037_v35, %v4373_v33  ;;  %v4183_v0 = vld [vmem:[#allocation8 + $0x130] sm:$0xf0] }
  0x3e   :  { %804 = vmatpush.bf16.msra.mxu3 %v4278_v41  ;;  %752 = vmatpush.bf16.msrb.mxu1 %v4142_v49  ;;  %v4303_v18 = vld [vmem:[#allocation8 + $0x228] sm:$0xf0]  ;;  %v4973_v40 = vld [vmem:[#allocation8 + $0xac] sm:$0xf0]  ;;  %v4215_v49 = vld [vmem:[#allocation8 + $0x170] sm:$0xf0] }
  0x3f   :  { %v4306_v28 = vor.u32 %v5016_v17, %v4303_v18  ;;  %v4976_v29 = vld [vmem:[#allocation8 + $0xcc] sm:$0xf]  ;;  %v4341_v45 = vld [vmem:[#allocation8 + $0x250] sm:$0xf]  ;;  %v4118_v46 = vor.u32 %v4973_v40, %v4117_v39  ;;  %v4218_v56 = vor.u32 %v4993_v48, %v4215_v49  ;;  %v5041_v3 = vld [vmem:[#allocation8 + $0x2d4] sm:$0xf] }
  0x40   :  { %777 = vmatpush.bf16.msrb.mxu0 %v4242_v59  ;;  %795 = vmatpush.bf16.msrb.mxu2 %v4370_v63  ;;  %v4143_v30 = vld [vmem:[#allocation8 + $0xe8] sm:$0xf0]  ;;  %v5029_v47 = vld [vmem:[#allocation8 + $0x26c] sm:$0xf0]  ;;  %v4985_v63 = vld [vmem:[#allocation8 + $0x114] sm:$0xf] }
  0x41   :  { %v4146_v38 = vor.u32 %v4976_v29, %v4143_v30  ;;  %v4968_v41 = vld [vmem:[#allocation8 + $0x8c] sm:$0xf]  ;;  %v4085_v51 = vld [vmem:[#allocation8 + $0x50] sm:$0xf]  ;;  %v4342_v55 = vor.u32 %v5029_v47, %v4341_v45  ;;  %v4285_v4 = vld [vmem:[#allocation8 + $0x1d8] sm:$0xf]  ;;  %v4186_v10 = vor.u32 %v4985_v63, %v4183_v0 }
  0x42   :  { %805 = vmatpush.bf16.msra.mxu3 %v4246_v57  ;;  %753 = vmatpush.bf16.msrb.mxu1 %v4110_v62  ;;  %v4111_v42 = vld [vmem:[#allocation8 + $0xa8] sm:$0xf0]  ;;  %v4965_v52 = vld [vmem:[#allocation8 + $0x6c] sm:$0xf0]  ;;  %v5014_v5 = vld [vmem:[#allocation8 + $0x1f4] sm:$0xf0] }
  0x43   :  { %v4114_v50 = vor.u32 %v4968_v41, %v4111_v42  ;;  %v4960_v53 = vld [vmem:[#allocation8 + $0x4c] sm:$0xf]  ;;  %v4053_v57 = vld [vmem:[#allocation8 + $0x10] sm:$0xf]  ;;  %v4086_v61 = vor.u32 %v4965_v52, %v4085_v51  ;;  %v4407_v6 = vld [vmem:[#allocation8 + $0x2f0] sm:$0xf0]  ;;  %v4286_v14 = vor.u32 %v5014_v5, %v4285_v4 }
  0x44   :  { %778 = vmatpush.bf16.msrb.mxu0 %v4210_v8  ;;  %796 = vmatpush.bf16.msrb.mxu2 %v4338_v13  ;;  %v4079_v54 = vld [vmem:[#allocation8 + $0x68] sm:$0xf0]  ;;  %v4957_v59 = vld [vmem:[#allocation8 + $0x2c] sm:$0xf0]  ;;  %v5010_v11 = vld [vmem:[#allocation8 + $0x1dc] sm:$0xf]  ;;  %v4410_v17 = vor.u32 %v5041_v3, %v4407_v6 }
  0x45   :  { %v4309_v60 = vld [vmem:[#allocation8 + $0x210] sm:$0xf]  ;;  %v4082_v1 = vor.u32 %v4960_v53, %v4079_v54  ;;  %v4047_v8 = vld [vmem:[#allocation8 + $0x28] sm:$0xf0]  ;;  %v4054_v13 = vor.u32 %v4957_v59, %v4053_v57  ;;  %v4977_v15 = vld [vmem:[#allocation8 + $0xd4] sm:$0xf] }
  0x46   :  { %806 = vmatpush.bf16.msra.mxu3 %v4214_v7  ;;  %754 = vmatpush.bf16.msrb.mxu1 %v4078_v12  ;;  %v5021_v62 = vld [vmem:[#allocation8 + $0x22c] sm:$0xf0]  ;;  %v4952_v7 = vld [vmem:[#allocation8 + $0xc] sm:$0xf]  ;;  %v4287_v12 = vld [vmem:[#allocation8 + $0x1f8] sm:$0xf0] }
  0x47   :  { %v4310_v9 = vor.u32 %v5021_v62, %v4309_v60  ;;  %v4151_v16 = vld [vmem:[#allocation8 + $0xf0] sm:$0xf0]  ;;  %v4050_v18 = vor.u32 %v4952_v7, %v4047_v8  ;;  %v4253_v19 = vld [vmem:[#allocation8 + $0x198] sm:$0xf]  ;;  %v4290_v21 = vor.u32 %v5010_v11, %v4287_v12  ;;  %v5002_v25 = vld [vmem:[#allocation8 + $0x19c] sm:$0xf] }
  0x48   :  { %779 = vmatpush.bf16.msrb.mxu0 %v4178_v24  ;;  %797 = vmatpush.bf16.msrb.mxu2 %v4306_v28  ;;  %v5033_v22 = vld [vmem:[#allocation8 + $0x294] sm:$0xf]  ;;  %v4154_v24 = vor.u32 %v4977_v15, %v4151_v16  ;;  %v4255_v26 = vld [vmem:[#allocation8 + $0x1b8] sm:$0xf0]  ;;  %v4413_v48 = vld [vmem:[#allocation8 + $0x2d8] sm:$0xf] }
  0x49   :  { %v4375_v23 = vld [vmem:[#allocation8 + $0x2b0] sm:$0xf0]  ;;  %v4258_v33 = vor.u32 %v5002_v25, %v4255_v26  ;;  %v4994_v37 = vld [vmem:[#allocation8 + $0x15c] sm:$0xf]  ;;  %v4982_v59 = vld [vmem:[#allocation8 + $0xf4] sm:$0xf0] }
  0x4a   :  { %807 = vmatpush.bf16.msra.mxu3 %v4182_v20  ;;  %755 = vmatpush.bf16.msrb.mxu1 %v4046_v27  ;;  %v5006_v20 = vld [vmem:[#allocation8 + $0x1b4] sm:$0xf0]  ;;  %v4969_v28 = vld [vmem:[#allocation8 + $0x94] sm:$0xf]  ;;  %v4378_v30 = vor.u32 %v5033_v22, %v4375_v23  ;;  %v4986_v51 = vld [vmem:[#allocation8 + $0x11c] sm:$0xf] }
  0x4b   :  { %4422 = vmatmul.msk.bf16.vlgmr.msrb.gmra.mxu2 %vm688_vm0, %v5501_v2  ;;  %v4254_v27 = vor.u32 %v5006_v20, %v4253_v19  ;;  %v4119_v29 = vld [vmem:[#allocation8 + $0xb0] sm:$0xf0]  ;;  %v4191_v52 = vld [vmem:[#allocation8 + $0x138] sm:$0xf0]  ;;  %v4381_v0 = vld [vmem:[#allocation8 + $0x298] sm:$0xf] }
  0x4c   :  { %830 = vmatpush.bf16.msra.mxu2 %v4282_v32  ;;  %780 = vmatpush.bf16.msrb.mxu0 %v4146_v38  ;;  %v4998_v32 = vld [vmem:[#allocation8 + $0x174] sm:$0xf0]  ;;  %v4343_v35 = vld [vmem:[#allocation8 + $0x270] sm:$0xf0]  ;;  %v4122_v36 = vor.u32 %v4969_v28, %v4119_v29  ;;  %v4223_v38 = vld [vmem:[#allocation8 + $0x178] sm:$0xf0]  ;;  %v4194_v63 = vor.u32 %v4986_v51, %v4191_v52 }
  0x4d   :  { %756 = vmatmul.bf16.vlgmr.msrb.gmra.mxu1 %v5507_v58  ;;  %v4961_v40 = vld [vmem:[#allocation8 + $0x54] sm:$0xf]  ;;  %v4226_v45 = vor.u32 %v4994_v37, %v4223_v38  ;;  %v5042_v60 = vld [vmem:[#allocation8 + $0x2dc] sm:$0xf]  ;;  %v5038_v3 = vld [vmem:[#allocation8 + $0x2b4] sm:$0xf0] }
  0x4e   :  { %821 = vmatpush.bf16.msra.mxu1 %v4406_v31  ;;  %808 = vmatpush.bf16.msra.mxu3 %v4150_v34  ;;  %v4221_v31 = vld [vmem:[#allocation8 + $0x158] sm:$0xf]  ;;  %v5025_v34 = vld [vmem:[#allocation8 + $0x254] sm:$0xf]  ;;  %v4978_v4 = vld [vmem:[#allocation8 + $0xdc] sm:$0xf]  ;;  %v4382_v12 = vor.u32 %v5038_v3, %v4381_v0 }
  0x4f   :  { %v4222_v39 = vor.u32 %v4998_v32, %v4221_v31  ;;  %v4087_v41 = vld [vmem:[#allocation8 + $0x70] sm:$0xf0]  ;;  %v4346_v42 = vor.u32 %v5025_v34, %v4343_v35  ;;  %v4159_v5 = vld [vmem:[#allocation8 + $0xf8] sm:$0xf0]  ;;  %v4125_v8 = vld [vmem:[#allocation8 + $0x98] sm:$0xf] }
  0x50   :  { %831 = vmatpush.bf16.msra.mxu2 %v4250_v44  ;;  %781 = vmatpush.bf16.msrb.mxu0 %v4114_v50  ;;  %v4990_v44 = vld [vmem:[#allocation8 + $0x134] sm:$0xf0]  ;;  %v4311_v47 = vld [vmem:[#allocation8 + $0x230] sm:$0xf0]  ;;  %v4090_v49 = vor.u32 %v4961_v40, %v4087_v41  ;;  %v4383_v11 = vld [vmem:[#allocation8 + $0x2b8] sm:$0xf0] }
  0x51   :  { %v5046_v50 = vld [vmem:[#allocation8 + $0x2f4] sm:$0xf0]  ;;  %v4953_v54 = vld [vmem:[#allocation8 + $0x14] sm:$0xf]  ;;  %v4970_v16 = vld [vmem:[#allocation8 + $0x9c] sm:$0xf] }
  0x52   :  { %822 = vmatpush.bf16.msra.mxu1 %v4374_v43  ;;  %809 = vmatpush.bf16.msra.mxu3 %v4118_v46  ;;  %v4189_v43 = vld [vmem:[#allocation8 + $0x118] sm:$0xf]  ;;  %v5017_v46 = vld [vmem:[#allocation8 + $0x214] sm:$0xf]  ;;  %v4414_v62 = vor.u32 %v5046_v50, %v4413_v48  ;;  %v5026_v22 = vld [vmem:[#allocation8 + $0x25c] sm:$0xf] }
  0x53   :  { %v4190_v53 = vor.u32 %v4990_v44, %v4189_v43  ;;  %v4314_v57 = vor.u32 %v5017_v46, %v4311_v47  ;;  %v5030_v15 = vld [vmem:[#allocation8 + $0x274] sm:$0xf0]  ;;  %v4351_v23 = vld [vmem:[#allocation8 + $0x278] sm:$0xf0]  ;;  %v4541_v28 = vld [vmem:[#allocation10 + $0xe0] sm:$0xf] }
  0x54   :  { %832 = vmatpush.bf16.msra.mxu2 %v4218_v56  ;;  %782 = vmatpush.bf16.msrb.mxu0 %v4082_v1  ;;  %v4157_v56 = vld [vmem:[#allocation8 + $0xd8] sm:$0xf]  ;;  %v4962_v29 = vld [vmem:[#allocation8 + $0x5c] sm:$0xf]  ;;  %v4354_v32 = vor.u32 %v5026_v22, %v4351_v23  ;;  %v4669_v38 = vld [vmem:[#allocation10 + $0x1e0] sm:$0xf] }
  0x55   :  { %v4158_v6 = vor.u32 %v4982_v59, %v4157_v56  ;;  %v4093_v20 = vld [vmem:[#allocation8 + $0x58] sm:$0xf]  ;;  %v4319_v37 = vld [vmem:[#allocation8 + $0x238] sm:$0xf0]  ;;  %v5109_v41 = vld [vmem:[#allocation10 + $0x1ec] sm:$0xf0] }
  0x56   :  { %823 = vmatpush.bf16.msra.mxu1 %v4342_v55  ;;  %810 = vmatpush.bf16.msra.mxu3 %v4086_v61  ;;  %v4055_v55 = vld [vmem:[#allocation8 + $0x30] sm:$0xf0]  ;;  %v4415_v61 = vld [vmem:[#allocation8 + $0x2f8] sm:$0xf0]  ;;  %v4317_v26 = vld [vmem:[#allocation8 + $0x218] sm:$0xf] }
  0x57   :  { %v4058_v1 = vor.u32 %v4953_v54, %v4055_v55  ;;  %v4418_v7 = vor.u32 %v5042_v60, %v4415_v61  ;;  %v4061_v34 = vld [vmem:[#allocation8 + $0x18] sm:$0xf]  ;;  %v5141_v43 = vld [vmem:[#allocation10 + $0x2ec] sm:$0xf0]  ;;  %v4954_v46 = vld [vmem:[#allocation8 + $0x1c] sm:$0xf] }
  0x58   :  { %833 = vmatpush.bf16.msra.mxu2 %v4186_v10  ;;  %783 = vmatpush.bf16.msrb.mxu0 %v4050_v18  ;;  %v5034_v10 = vld [vmem:[#allocation8 + $0x29c] sm:$0xf]  ;;  %v4958_v35 = vld [vmem:[#allocation8 + $0x34] sm:$0xf0]  ;;  %v5073_v50 = vld [vmem:[#allocation10 + $0xcc] sm:$0xf0] }
  0x59   :  { %v4386_v19 = vor.u32 %v5034_v10, %v4383_v11  ;;  %v4063_v47 = vld [vmem:[#allocation8 + $0x38] sm:$0xf0]  ;;  %v4062_v48 = vor.u32 %v4958_v35, %v4061_v34  ;;  %v4925_v51 = vld [vmem:[#allocation10 + $0x3e0] sm:$0xf]  ;;  %v5173_v52 = vld [vmem:[#allocation10 + $0x3ec] sm:$0xf0] }
  0x5a   :  { %824 = vmatpush.bf16.msra.mxu1 %v4310_v9  ;;  %811 = vmatpush.bf16.msra.mxu3 %v4054_v13  ;;  %v4974_v9 = vld [vmem:[#allocation8 + $0xb4] sm:$0xf0]  ;;  %v4162_v13 = vor.u32 %v4978_v4, %v4159_v5  ;;  %v4653_v55 = vld [vmem:[#allocation10 + $0x1c0] sm:$0xf]  ;;  %v4066_v56 = vor.u32 %v4954_v46, %v4063_v47  ;;  %v5137_v60 = vld [vmem:[#allocation10 + $0x2cc] sm:$0xf0] }
  0x5b   :  { %784 = vmatmul.bf16.vlgmr.msrb.gmra.mxu0 %v5507_v58  ;;  %v4126_v18 = vor.u32 %v4974_v9, %v4125_v8  ;;  %v4781_v59 = vld [vmem:[#allocation10 + $0x2c0] sm:$0xf]  ;;  %v5069_v0 = vld [vmem:[#allocation10 + $0xac] sm:$0xf0]  ;;  %s5449_s2 = smov [#allocation12]   ;;  %s4010_s27 = sshll.u32 %s7091_s6, 4  ;;  %s4011_s27 = int_to_ptr.hbm [resolvable:$true] %s4010_s27 }
  0x5c   :  { %882 = vmatpush.bf16.msra.mxu0 %v4290_v21  ;;  %834 = vmatpush.bf16.msra.mxu2 %v4154_v24  ;;  %v4966_v21 = vld [vmem:[#allocation8 + $0x74] sm:$0xf0]  ;;  %v5169_v3 = vld [vmem:[#allocation10 + $0x3cc] sm:$0xf0]  ;;  %v4782_v5 = vor.u32 %v5137_v60, %v4781_v59  ;;  %v4765_v8 = vld [vmem:[#allocation10 + $0x2a0] sm:$0xf] }
  0x5d   :  { %812 = vmatmul.bf16.vlgmr.msra.gmra.mxu3 %v5507_v58  ;;  %4423 = vmatmul.msk.bf16.vlgmr.msra.gmra.mxu1 %vm688_vm0, %v5501_v2  ;;  %v4094_v31 = vor.u32 %v4966_v21, %v4093_v20  ;;  %v5133_v9 = vld [vmem:[#allocation10 + $0x2ac] sm:$0xf0]  ;;  %v4749_v20 = vld [vmem:[#allocation10 + $0x280] sm:$0xf]  ;;  %s4008_s4 = sshll.u32 %s5449_s2, 4  ;;  %s5450_s6 = smov [#allocation11]   ;;  %s4009_s4 = int_to_ptr.vmem [resolvable:$true] %s4008_s4 }
  0x5e   :  { %856 = vmatpush.bf16.msrb.mxu1 %v4286_v14  ;;  %847 = vmatpush.bf16.msrb.mxu3 %v4410_v17  ;;  %v4349_v14 = vld [vmem:[#allocation8 + $0x258] sm:$0xf]  ;;  %v4127_v17 = vld [vmem:[#allocation8 + $0xb8] sm:$0xf0]  ;;  %v5129_v21 = vld [vmem:[#allocation10 + $0x28c] sm:$0xf0] }
  0x5f   :  { %v4350_v24 = vor.u32 %v5030_v15, %v4349_v14  ;;  %v4130_v25 = vor.u32 %v4970_v16, %v4127_v17  ;;  %v4893_v14 = vld [vmem:[#allocation10 + $0x3a0] sm:$0xf]  ;;  %v5165_v15 = vld [vmem:[#allocation10 + $0x3ac] sm:$0xf0]  ;;  %v4766_v17 = vor.u32 %v5133_v9, %v4765_v8  ;;  %v928_v8 = vld [vmem:[#allocation5] sm:$0xff]  ;;  %s3997_s28 = sshll.u32 %s5450_s6, 4  ;;  %s3998_s28 = int_to_ptr.vmem [resolvable:$true] %s3997_s28 }
  0x60   :  { %883 = vmatpush.bf16.msra.mxu0 %v4258_v33  ;;  %835 = vmatpush.bf16.msra.mxu2 %v4122_v36  ;;  %v5077_v33 = vld [vmem:[#allocation10 + $0xec] sm:$0xf0]  ;;  %v5018_v36 = vld [vmem:[#allocation8 + $0x21c] sm:$0xf]  ;;  %v4894_v23 = vor.u32 %v5165_v15, %v4893_v14  ;;  %v4461_v35 = vld [vmem:[#allocation10 + $0x40] sm:$0xf] }
  0x61   :  { %v4542_v44 = vor.u32 %v5077_v33, %v4541_v28  ;;  %v4445_v46 = vld [vmem:[#allocation10 + $0x20] sm:$0xf]  ;;  %v5053_v47 = vld [vmem:[#allocation10 + $0x2c] sm:$0xf0]  ;;  %v4799_v15 = vld [vmem:[#allocation10 + $0x2f0] sm:$0xf0] }
  0x62   :  { %857 = vmatpush.bf16.msrb.mxu1 %v4254_v27  ;;  %848 = vmatpush.bf16.msrb.mxu3 %v4378_v30  ;;  %v5022_v27 = vld [vmem:[#allocation8 + $0x234] sm:$0xf0]  ;;  %v4095_v30 = vld [vmem:[#allocation8 + $0x78] sm:$0xf0]  ;;  %v4429_v59 = vld [vmem:[#allocation10] sm:$0xf] }
  0x63   :  { %v4098_v40 = vor.u32 %v4962_v29, %v4095_v30  ;;  %v4750_v29 = vor.u32 %v5129_v21, %v4749_v20  ;;  %v4605_v30 = vld [vmem:[#allocation10 + $0x160] sm:$0xf]  ;;  %v5049_v60 = vld [vmem:[#allocation10 + $0xc] sm:$0xf0]  ;;  %v5071_v20 = vld [vmem:[#allocation10 + $0xc4] sm:$0xf] }
  0x64   :  { %884 = vmatpush.bf16.msra.mxu0 %v4226_v45  ;;  %836 = vmatpush.bf16.msra.mxu2 %v4090_v49  ;;  %v4525_v45 = vld [vmem:[#allocation10 + $0xc0] sm:$0xf]  ;;  %v4322_v49 = vor.u32 %v5018_v36, %v4319_v37  ;;  %v5057_v36 = vld [vmem:[#allocation10 + $0x4c] sm:$0xf0]  ;;  %v4430_v9 = vor.u32 %v5049_v60, %v4429_v59  ;;  %v4527_v21 = vld [vmem:[#allocation10 + $0xd0] sm:$0xf0] }
  0x65   :  { %v4526_v61 = vor.u32 %v5073_v50, %v4525_v45  ;;  %v4861_v37 = vld [vmem:[#allocation10 + $0x360] sm:$0xf]  ;;  %v5127_v60 = vld [vmem:[#allocation10 + $0x284] sm:$0xf]  ;;  %s3999_s7 = sshll.u32 %s7090_s5, 4  ;;  %s4000_s7 = int_to_ptr.hbm [resolvable:$true] %s3999_s7 }
  0x66   :  { %858 = vmatpush.bf16.msrb.mxu1 %v4222_v39  ;;  %849 = vmatpush.bf16.msrb.mxu3 %v4346_v42  ;;  %v4318_v39 = vor.u32 %v5022_v27, %v4317_v26  ;;  %v4797_v42 = vld [vmem:[#allocation10 + $0x2e0] sm:$0xf]  ;;  %v5161_v27 = vld [vmem:[#allocation10 + $0x38c] sm:$0xf0] }
  0x67   :  { %v4798_v54 = vor.u32 %v5141_v43, %v4797_v42  ;;  %v4877_v26 = vld [vmem:[#allocation10 + $0x380] sm:$0xf]  ;;  %v5121_v43 = vld [vmem:[#allocation10 + $0x24c] sm:$0xf0] }
  0x68   :  { %885 = vmatpush.bf16.msra.mxu0 %v4194_v63  ;;  %837 = vmatpush.bf16.msra.mxu2 %v4058_v1  ;;  %v4509_v63 = vld [vmem:[#allocation10 + $0xa0] sm:$0xf]  ;;  %v4878_v34 = vor.u32 %v5161_v27, %v4877_v26  ;;  %v4927_v26 = vld [vmem:[#allocation10 + $0x3f0] sm:$0xf0] }
  0x69   :  { %v4909_v1 = vld [vmem:[#allocation10 + $0x3c0] sm:$0xf]  ;;  %v4510_v10 = vor.u32 %v5069_v0, %v4509_v63  ;;  %v5149_v63 = vld [vmem:[#allocation10 + $0x32c] sm:$0xf0] }
  0x6a   :  { %859 = vmatpush.bf16.msrb.mxu1 %v4190_v53  ;;  %850 = vmatpush.bf16.msrb.mxu3 %v4314_v57  ;;  %v4670_v53 = vor.u32 %v5109_v41, %v4669_v38  ;;  %v5105_v57 = vld [vmem:[#allocation10 + $0x1cc] sm:$0xf0]  ;;  %v4910_v11 = vor.u32 %v5169_v3, %v4909_v1  ;;  %v4717_v42 = vld [vmem:[#allocation10 + $0x240] sm:$0xf]  ;;  %v4543_v3 = vld [vmem:[#allocation10 + $0xf0] sm:$0xf0] }
  0x6b   :  { %838 = vmatmul.bf16.vlgmr.msra.gmra.mxu2 %v5507_v58  ;;  %v4654_v4 = vor.u32 %v5105_v57, %v4653_v55  ;;  %v5157_v38 = vld [vmem:[#allocation10 + $0x36c] sm:$0xf0]  ;;  %v929_v27 = vld [vmem:[#allocation5 + $0x8] sm:$0xff] }
  0x6c   :  { %899 = vmatpush.bf16.msrb.mxu2 %v4418_v7  ;;  %886 = vmatpush.bf16.msra.mxu0 %v4162_v13  ;;  %v5101_v7 = vld [vmem:[#allocation10 + $0x1ac] sm:$0xf0]  ;;  %v4862_v45 = vor.u32 %v5157_v38, %v4861_v37  ;;  %v5067_v37 = vld [vmem:[#allocation10 + $0xa4] sm:$0xf]  ;;  %v4511_v38 = vld [vmem:[#allocation10 + $0xb0] sm:$0xf0] }
  0x6d   :  { %4424 = vmatmul.msk.bf16.vlgmr.msrb.gmra.mxu3 %vm688_vm0, %v5501_v2  ;;  %v5065_v13 = vld [vmem:[#allocation10 + $0x8c] sm:$0xf0] }
  0x6e   :  { %873 = vmatpush.bf16.msra.mxu3 %v4414_v62  ;;  %860 = vmatpush.bf16.msrb.mxu1 %v4158_v6  ;;  %v4926_v62 = vor.u32 %v5173_v52, %v4925_v51  ;;  %v4637_v6 = vld [vmem:[#allocation10 + $0x1a0] sm:$0xf]  ;;  %v5089_v41 = vld [vmem:[#allocation10 + $0x14c] sm:$0xf0]  ;;  %v4718_v51 = vor.u32 %v5121_v43, %v4717_v42 }
  0x6f   :  { %v4638_v16 = vor.u32 %v5101_v7, %v4637_v6  ;;  %v4573_v52 = vld [vmem:[#allocation10 + $0x120] sm:$0xf]  ;;  %v5117_v55 = vld [vmem:[#allocation10 + $0x22c] sm:$0xf0] }
  0x70   :  { %900 = vmatpush.bf16.msrb.mxu2 %v4386_v19  ;;  %887 = vmatpush.bf16.msra.mxu0 %v4130_v25  ;;  %v5097_v19 = vld [vmem:[#allocation10 + $0x18c] sm:$0xf0]  ;;  %v4685_v6 = vld [vmem:[#allocation10 + $0x200] sm:$0xf] }
  0x71   :  { %v5061_v25 = vld [vmem:[#allocation10 + $0x6c] sm:$0xf0] }
  0x72   :  { %874 = vmatpush.bf16.msra.mxu3 %v4382_v12  ;;  %861 = vmatpush.bf16.msrb.mxu1 %v4126_v18  ;;  %v4493_v12 = vld [vmem:[#allocation10 + $0x80] sm:$0xf]  ;;  %v5113_v7 = vld [vmem:[#allocation10 + $0x20c] sm:$0xf0] }
  0x73   :  { %v4621_v18 = vld [vmem:[#allocation10 + $0x180] sm:$0xf]  ;;  %v4494_v22 = vor.u32 %v5065_v13, %v4493_v12  ;;  %v4671_v12 = vld [vmem:[#allocation10 + $0x1f0] sm:$0xf0]  ;;  %v5139_v13 = vld [vmem:[#allocation10 + $0x2e4] sm:$0xf] }
  0x74   :  { %901 = vmatpush.bf16.msrb.mxu2 %v4354_v32  ;;  %888 = vmatpush.bf16.msra.mxu0 %v4098_v40  ;;  %v4622_v28 = vor.u32 %v5097_v19, %v4621_v18  ;;  %v5125_v32 = vld [vmem:[#allocation10 + $0x26c] sm:$0xf0]  ;;  %v4589_v40 = vld [vmem:[#allocation10 + $0x140] sm:$0xf]  ;;  %v4686_v19 = vor.u32 %v5113_v7, %v4685_v6  ;;  %v5091_v6 = vld [vmem:[#allocation10 + $0x164] sm:$0xf] }
  0x75   :  { %v4590_v50 = vor.u32 %v5089_v41, %v4589_v40  ;;  %v5167_v40 = vld [vmem:[#allocation10 + $0x3c4] sm:$0xf]  ;;  %v4911_v41 = vld [vmem:[#allocation10 + $0x3d0] sm:$0xf0] }
  0x76   :  { %875 = vmatpush.bf16.msra.mxu3 %v4350_v24  ;;  %862 = vmatpush.bf16.msrb.mxu1 %v4094_v31  ;;  %v4477_v24 = vld [vmem:[#allocation10 + $0x60] sm:$0xf]  ;;  %v4607_v7 = vld [vmem:[#allocation10 + $0x170] sm:$0xf0] }
  0x77   :  { %v4733_v31 = vld [vmem:[#allocation10 + $0x260] sm:$0xf]  ;;  %v4478_v33 = vor.u32 %v5061_v25, %v4477_v24  ;;  %v5171_v25 = vld [vmem:[#allocation10 + $0x3e4] sm:$0xf] }
  0x78   :  { %902 = vmatpush.bf16.msrb.mxu2 %v4322_v49  ;;  %889 = vmatpush.bf16.msra.mxu0 %v4066_v56  ;;  %v5153_v49 = vld [vmem:[#allocation10 + $0x34c] sm:$0xf0]  ;;  %v4446_v56 = vor.u32 %v5053_v47, %v4445_v46  ;;  %v4514_v46 = vor.u32 %v5067_v37, %v4511_v38  ;;  %v5131_v47 = vld [vmem:[#allocation10 + $0x2a4] sm:$0xf]  ;;  %v4431_v38 = vld [vmem:[#allocation10 + $0x10] sm:$0xf0] }
  0x79   :  { %v5047_v37 = vld [vmem:[#allocation10 + $0x4] sm:$0xf] }
  0x7a   :  { %876 = vmatpush.bf16.msra.mxu3 %v4318_v39  ;;  %863 = vmatpush.bf16.msrb.mxu1 %v4062_v48  ;;  %v4734_v39 = vor.u32 %v5125_v32, %v4733_v31  ;;  %v4845_v48 = vld [vmem:[#allocation10 + $0x340] sm:$0xf]  ;;  %v931_v31 = vld [vmem:[#allocation5 + $0x18] sm:$0xff]  ;;  %v4530_v32 = vor.u32 %v5071_v20, %v4527_v21  ;;  %v5119_v21 = vld [vmem:[#allocation10 + $0x244] sm:$0xf] }
  0x7b   :  { %890 = vmatmul.bf16.vlgmr.msra.gmra.mxu0 %v5507_v58  ;;  %4426 = vmatmul.msk.bf16.vlgmr.msrb.gmra.mxu2 %vm688_vm0, %v5501_v2  ;;  %v4846_v57 = vor.u32 %v5153_v49, %v4845_v48  ;;  %v5536_v42 = vpack.c.bf16 %v931_v31, %v931_v31  ;;  %v4767_v48 = vld [vmem:[#allocation10 + $0x2b0] sm:$0xf0]  ;;  %v4914_v49 = vor.u32 %v5167_v40, %v4911_v41  ;;  %v5078_v41 = vld [vmem:[#allocation10 + $0xf4] sm:$0xf0] }
  0x7c   :  { %1730 = vmatpush.bf16.msra.mxu2 %v4798_v54  ;;  %1743 = vmatpush.bf16.msrb.mxu0 %v4926_v62  ;;  %v4701_v54 = vld [vmem:[#allocation10 + $0x220] sm:$0xf]  ;;  %v4575_v31 = vld [vmem:[#allocation10 + $0x130] sm:$0xf0] }
  0x7d   :  { %864 = vmatmul.bf16.vlgmr.msrb.gmra.mxu1 %v5507_v58  ;;  %4425 = vmatmul.msk.bf16.vlgmr.msra.gmra.mxu3 %vm688_vm0, %v5501_v2  ;;  %v5093_v58 = vld [vmem:[#allocation10 + $0x16c] sm:$0xf0]  ;;  %v4829_v62 = vld [vmem:[#allocation10 + $0x320] sm:$0xf]  ;;  %v4702_v1 = vor.u32 %v5117_v55, %v4701_v54  ;;  %v4895_v54 = vld [vmem:[#allocation10 + $0x3b0] sm:$0xf0]  ;;  %v4770_v55 = vor.u32 %v5131_v47, %v4767_v48 }
  0x7e   :  { %1704 = vmatpush.bf16.msrb.mxu3 %v4542_v44  ;;  %1717 = vmatpush.bf16.msra.mxu1 %v4670_v53  ;;  %v4606_v2 = vor.u32 %v5093_v58, %v4605_v30  ;;  %v4462_v44 = vor.u32 %v5057_v36, %v4461_v35  ;;  %v5085_v53 = vld [vmem:[#allocation10 + $0x12c] sm:$0xf0]  ;;  %v5103_v30 = vld [vmem:[#allocation10 + $0x1c4] sm:$0xf]  ;;  %v4655_v58 = vld [vmem:[#allocation10 + $0x1d0] sm:$0xf0]  ;;  %v4930_v36 = vor.u32 %v5171_v25, %v4927_v26 }
  0x7f   :  { %v4574_v0 = vor.u32 %v5085_v53, %v4573_v52  ;;  %v4783_v35 = vld [vmem:[#allocation10 + $0x2d0] sm:$0xf0]  ;;  %v5163_v53 = vld [vmem:[#allocation10 + $0x3a4] sm:$0xf] }
  0x80   :  { %1731 = vmatpush.bf16.msra.mxu2 %v4782_v5  ;;  %1744 = vmatpush.bf16.msrb.mxu0 %v4910_v11  ;;  %v5081_v5 = vld [vmem:[#allocation10 + $0x10c] sm:$0xf0]  ;;  %v5107_v11 = vld [vmem:[#allocation10 + $0x1e4] sm:$0xf]  ;;  %v4447_v26 = vld [vmem:[#allocation10 + $0x30] sm:$0xf0] }
  0x81   :  { %v4674_v24 = vor.u32 %v5107_v11, %v4671_v12  ;;  %v5055_v12 = vld [vmem:[#allocation10 + $0x44] sm:$0xf]  ;;  %v4559_v47 = vld [vmem:[#allocation10 + $0x110] sm:$0xf0] }
  0x82   :  { %1705 = vmatpush.bf16.msrb.mxu3 %v4526_v61  ;;  %1718 = vmatpush.bf16.msra.mxu1 %v4654_v4  ;;  %v5075_v61 = vld [vmem:[#allocation10 + $0xe4] sm:$0xf]  ;;  %v4557_v4 = vld [vmem:[#allocation10 + $0x100] sm:$0xf] }
  0x83   :  { %v4546_v14 = vor.u32 %v5075_v61, %v4543_v3  ;;  %v4558_v18 = vor.u32 %v5081_v5, %v4557_v4  ;;  %v4751_v61 = vld [vmem:[#allocation10 + $0x290] sm:$0xf0]  ;;  %v5159_v3 = vld [vmem:[#allocation10 + $0x384] sm:$0xf] }
  0x84   :  { %1732 = vmatpush.bf16.msra.mxu2 %v4766_v17  ;;  %1745 = vmatpush.bf16.msrb.mxu0 %v4894_v23  ;;  %v5145_v17 = vld [vmem:[#allocation10 + $0x30c] sm:$0xf0]  ;;  %v5529_v23 = vpack.c.bf16 %v928_v8, %v928_v8  ;;  %v4879_v4 = vld [vmem:[#allocation10 + $0x390] sm:$0xf0]  ;;  %v4754_v5 = vor.u32 %v5127_v60, %v4751_v61  ;;  %v5051_v25 = vld [vmem:[#allocation10 + $0x24] sm:$0xf] }
  0x85   :  { %v4882_v11 = vor.u32 %v5159_v3, %v4879_v4  ;;  %v5111_v48 = vld [vmem:[#allocation10 + $0x204] sm:$0xf]  ;;  %v5074_v60 = vld [vmem:[#allocation10 + $0xd4] sm:$0xf0] }
  0x86   :  { %1706 = vmatpush.bf16.msrb.mxu3 %v4510_v10  ;;  %1719 = vmatpush.bf16.msra.mxu1 %v4638_v16  ;;  %v4830_v10 = vor.u32 %v5149_v63, %v4829_v62  ;;  %v4813_v16 = vld [vmem:[#allocation10 + $0x300] sm:$0xf]  ;;  %v4898_v62 = vor.u32 %v5163_v53, %v4895_v54  ;;  %v5059_v63 = vld [vmem:[#allocation10 + $0x64] sm:$0xf] }
  0x87   :  { %v5143_v61 = vld [vmem:[#allocation10 + $0x304] sm:$0xf] }
  0x88   :  { %1733 = vmatpush.bf16.msra.mxu2 %v4750_v29  ;;  %1746 = vmatpush.bf16.msrb.mxu0 %v4878_v34  ;;  %v4814_v29 = vor.u32 %v5145_v17, %v4813_v16  ;;  %v5135_v34 = vld [vmem:[#allocation10 + $0x2c4] sm:$0xf]  ;;  %v4863_v16 = vld [vmem:[#allocation10 + $0x370] sm:$0xf0] }
  0x89   :  { %v4786_v43 = vor.u32 %v5135_v34, %v4783_v35  ;;  %v5115_v34 = vld [vmem:[#allocation10 + $0x224] sm:$0xf]  ;;  %v4703_v35 = vld [vmem:[#allocation10 + $0x230] sm:$0xf0] }
  0x8a   :  { %1707 = vmatpush.bf16.msrb.mxu3 %v4494_v22  ;;  %1720 = vmatpush.bf16.msra.mxu1 %v4622_v28  ;;  %v930_v22 = vld [vmem:[#allocation5 + $0x10] sm:$0xff]  ;;  %v4802_v28 = vor.u32 %v5139_v13, %v4799_v15  ;;  %v4463_v13 = vld [vmem:[#allocation10 + $0x50] sm:$0xf0]  ;;  %v5155_v15 = vld [vmem:[#allocation10 + $0x364] sm:$0xf] }
  0x8b   :  { %v4466_v20 = vor.u32 %v5055_v12, %v4463_v13  ;;  %v4517_v12 = vld [vmem:[#allocation10 + $0xa8] sm:$0xf]  ;;  %v5070_v13 = vld [vmem:[#allocation10 + $0xb4] sm:$0xf0] }
  0x8c   :  { %1734 = vmatpush.bf16.msra.mxu2 %v4734_v39  ;;  %1747 = vmatpush.bf16.msrb.mxu0 %v4862_v45  ;;  %v4658_v39 = vor.u32 %v5103_v30, %v4655_v58  ;;  %v4639_v45 = vld [vmem:[#allocation10 + $0x1b0] sm:$0xf0]  ;;  %v5083_v58 = vld [vmem:[#allocation10 + $0x124] sm:$0xf] }
  0x8d   :  { %v4578_v40 = vor.u32 %v5083_v58, %v4575_v31  ;;  %v4629_v58 = vld [vmem:[#allocation10 + $0x188] sm:$0xf] }
  0x8e   :  { %1708 = vmatpush.bf16.msrb.mxu3 %v4478_v33  ;;  %1721 = vmatpush.bf16.msra.mxu1 %v4606_v2  ;;  %v5531_v33 = vpack.c.bf16 %v930_v22, %v930_v22  ;;  %v5533_v2 = vpack.c.bf16 %v929_v27, %v929_v27  ;;  %v4719_v22 = vld [vmem:[#allocation10 + $0x250] sm:$0xf0] }
  0x8f   :  { %v4722_v30 = vor.u32 %v5119_v21, %v4719_v22  ;;  %v4773_v21 = vld [vmem:[#allocation10 + $0x2a8] sm:$0xf]  ;;  %v5134_v22 = vld [vmem:[#allocation10 + $0x2b4] sm:$0xf0] }
  0x90   :  { %1735 = vmatpush.bf16.msra.mxu2 %v4718_v51  ;;  %1748 = vmatpush.bf16.msrb.mxu0 %v4846_v57  ;;  %v4495_v51 = vld [vmem:[#allocation10 + $0x90] sm:$0xf0] }
  0x91   :  { %v4623_v57 = vld [vmem:[#allocation10 + $0x190] sm:$0xf0] }
  0x92   :  { %1709 = vmatpush.bf16.msrb.mxu3 %v4462_v44  ;;  %1722 = vmatpush.bf16.msra.mxu1 %v4590_v50  ;;  %v5099_v44 = vld [vmem:[#allocation10 + $0x1a4] sm:$0xf] }
  0x93   :  { %v5063_v50 = vld [vmem:[#allocation10 + $0x84] sm:$0xf]  ;;  %v4642_v52 = vor.u32 %v5099_v44, %v4639_v45  ;;  %v4831_v44 = vld [vmem:[#allocation10 + $0x330] sm:$0xf0]  ;;  %v4706_v45 = vor.u32 %v5115_v34, %v4703_v35  ;;  %v4757_v34 = vld [vmem:[#allocation10 + $0x288] sm:$0xf] }
  0x94   :  { %1736 = vmatpush.bf16.msra.mxu2 %v4702_v1  ;;  %1749 = vmatpush.bf16.msrb.mxu0 %v4830_v10  ;;  %v4498_v59 = vor.u32 %v5063_v50, %v4495_v51  ;;  %v4735_v10 = vld [vmem:[#allocation10 + $0x270] sm:$0xf0]  ;;  %v4677_v51 = vld [vmem:[#allocation10 + $0x1e8] sm:$0xf]  ;;  %v5130_v35 = vld [vmem:[#allocation10 + $0x294] sm:$0xf0] }
  0x95   :  { %v4687_v50 = vld [vmem:[#allocation10 + $0x210] sm:$0xf0] }
  0x96   :  { %1710 = vmatpush.bf16.msrb.mxu3 %v4446_v56  ;;  %1723 = vmatpush.bf16.msra.mxu1 %v4574_v0  ;;  %v5095_v56 = vld [vmem:[#allocation10 + $0x184] sm:$0xf]  ;;  %v4479_v0 = vld [vmem:[#allocation10 + $0x70] sm:$0xf0] }
  0x97   :  { %v4626_v1 = vor.u32 %v5095_v56, %v4623_v57  ;;  %v4482_v8 = vor.u32 %v5059_v63, %v4479_v0  ;;  %v5142_v56 = vld [vmem:[#allocation10 + $0x2f4] sm:$0xf0]  ;;  %v4533_v57 = vld [vmem:[#allocation10 + $0xc8] sm:$0xf]  ;;  %v4690_v63 = vor.u32 %v5111_v48, %v4687_v50 }
  0x98   :  { %1737 = vmatpush.bf16.msra.mxu2 %v4686_v19  ;;  %1750 = vmatpush.bf16.msrb.mxu0 %v4814_v29  ;;  %v4591_v19 = vld [vmem:[#allocation10 + $0x150] sm:$0xf0]  ;;  %v4933_v0 = vld [vmem:[#allocation10 + $0x3e8] sm:$0xf] }
  0x99   :  { %v4847_v29 = vld [vmem:[#allocation10 + $0x350] sm:$0xf0]  ;;  %v4741_v48 = vld [vmem:[#allocation10 + $0x268] sm:$0xf] }
  0x9a   :  { %1711 = vmatpush.bf16.msrb.mxu3 %v4430_v9  ;;  %1724 = vmatpush.bf16.msra.mxu1 %v4558_v18  ;;  %v5123_v9 = vld [vmem:[#allocation10 + $0x264] sm:$0xf] }
  0x9b   :  { %1738 = vmatmul.bf16.vlgmr.msra.gmra.mxu2 %v5531_v33  ;;  %1751 = vmatmul.bf16.vlgmr.msrb.gmra.mxu0 %v5536_v42  ;;  %v4738_v17 = vor.u32 %v5123_v9, %v4735_v10  ;;  %v5087_v18 = vld [vmem:[#allocation10 + $0x144] sm:$0xf]  ;;  %v4789_v9 = vld [vmem:[#allocation10 + $0x2c8] sm:$0xf]  ;;  %v5138_v10 = vld [vmem:[#allocation10 + $0x2d4] sm:$0xf0] }
  0x9c   :  { %1782 = vmatpush.bf16.msrb.mxu2 %v4802_v28  ;;  %1795 = vmatpush.bf16.msra.mxu0 %v4930_v36  ;;  %v4594_v27 = vor.u32 %v5087_v18, %v4591_v19  ;;  %v5151_v28 = vld [vmem:[#allocation10 + $0x344] sm:$0xf]  ;;  %v4645_v18 = vld [vmem:[#allocation10 + $0x1a8] sm:$0xf]  ;;  %v4518_v19 = vor.u32 %v5070_v13, %v4517_v12  ;;  %v5118_v13 = vld [vmem:[#allocation10 + $0x234] sm:$0xf0] }
  0x9d   :  { %1712 = vmatmul.bf16.vlgmr.msrb.gmra.mxu3 %v5529_v23  ;;  %1725 = vmatmul.bf16.vlgmr.msra.gmra.mxu1 %v5533_v2  ;;  %v4850_v36 = vor.u32 %v5151_v28, %v4847_v29  ;;  %v5166_v28 = vld [vmem:[#allocation10 + $0x3b4] sm:$0xf0]  ;;  %v4709_v12 = vld [vmem:[#allocation10 + $0x228] sm:$0xf] }
  0x9e   :  { %1756 = vmatpush.bf16.msra.mxu3 %v4546_v14  ;;  %1769 = vmatpush.bf16.msrb.mxu1 %v4674_v24  ;;  %v4610_v14 = vor.u32 %v5091_v6, %v4607_v7  ;;  %v4866_v24 = vor.u32 %v5155_v15, %v4863_v16  ;;  %v4534_v6 = vor.u32 %v5074_v60, %v4533_v57  ;;  %v5170_v15 = vld [vmem:[#allocation10 + $0x3d4] sm:$0xf0] }
  0xa0   :  { %1783 = vmatpush.bf16.msrb.mxu2 %v4786_v43  ;;  %1796 = vmatpush.bf16.msra.mxu0 %v4914_v49  ;;  %v5147_v43 = vld [vmem:[#allocation10 + $0x324] sm:$0xf]  ;;  %v4434_v49 = vor.u32 %v5047_v37, %v4431_v38  ;;  %v4485_v38 = vld [vmem:[#allocation10 + $0x68] sm:$0xf] }
  0xa1   :  { %v4834_v54 = vor.u32 %v5147_v43, %v4831_v44  ;;  %v4758_v44 = vor.u32 %v5130_v35, %v4757_v34  ;;  %v5140_v34 = vld [vmem:[#allocation10 + $0x2ec] sm:$0xf]  ;;  %v4807_v35 = vld [vmem:[#allocation10 + $0x2f8] sm:$0xf0] }
  0xa2   :  { %1757 = vmatpush.bf16.msra.mxu3 %v4530_v32  ;;  %1770 = vmatpush.bf16.msrb.mxu1 %v4658_v39  ;;  %v4450_v32 = vor.u32 %v5051_v25, %v4447_v26  ;;  %v4549_v39 = vld [vmem:[#allocation10 + $0xe8] sm:$0xf]  ;;  %v5066_v26 = vld [vmem:[#allocation10 + $0x94] sm:$0xf0] }
  0xa3   :  { %v4550_v53 = vor.u32 %v5078_v41, %v4549_v39  ;;  %v4501_v25 = vld [vmem:[#allocation10 + $0x88] sm:$0xf]  ;;  %v5062_v39 = vld [vmem:[#allocation10 + $0x74] sm:$0xf0] }
  0xa4   :  { %1784 = vmatpush.bf16.msrb.mxu2 %v4770_v55  ;;  %1797 = vmatpush.bf16.msra.mxu0 %v4898_v62  ;;  %v4805_v55 = vld [vmem:[#allocation10 + $0x2e8] sm:$0xf]  ;;  %v4815_v62 = vld [vmem:[#allocation10 + $0x310] sm:$0xf0]  ;;  %v4502_v31 = vor.u32 %v5066_v26, %v4501_v25  ;;  %v5162_v41 = vld [vmem:[#allocation10 + $0x394] sm:$0xf0] }
  0xa5   :  { %v4806_v4 = vor.u32 %v5142_v56, %v4805_v55  ;;  %v4818_v7 = vor.u32 %v5143_v61, %v4815_v62  ;;  %v5158_v55 = vld [vmem:[#allocation10 + $0x374] sm:$0xf0]  ;;  %v4725_v62 = vld [vmem:[#allocation10 + $0x248] sm:$0xf] }
  0xa6   :  { %1758 = vmatpush.bf16.msra.mxu3 %v4514_v46  ;;  %1771 = vmatpush.bf16.msrb.mxu1 %v4642_v52  ;;  %v5079_v46 = vld [vmem:[#allocation10 + $0x104] sm:$0xf]  ;;  %v5110_v52 = vld [vmem:[#allocation10 + $0x1f4] sm:$0xf0]  ;;  %v4565_v25 = vld [vmem:[#allocation10 + $0x108] sm:$0xf] }
  0xa7   :  { %v4678_v3 = vor.u32 %v5110_v52, %v4677_v51  ;;  %v4469_v52 = vld [vmem:[#allocation10 + $0x48] sm:$0xf]  ;;  %v5090_v61 = vld [vmem:[#allocation10 + $0x154] sm:$0xf0] }
  0xa8   :  { %1785 = vmatpush.bf16.msrb.mxu2 %v4754_v5  ;;  %1798 = vmatpush.bf16.msra.mxu0 %v4882_v11  ;;  %v4661_v5 = vld [vmem:[#allocation10 + $0x1c8] sm:$0xf] }
  0xaa   :  { %1759 = vmatpush.bf16.msra.mxu3 %v4498_v59  ;;  %1772 = vmatpush.bf16.msrb.mxu1 %v4626_v1  ;;  %v4562_v59 = vor.u32 %v5079_v46, %v4559_v47  ;;  %v5174_v1 = vld [vmem:[#allocation10 + $0x3f4] sm:$0xf0]  ;;  %v4486_v46 = vor.u32 %v5062_v39, %v4485_v38  ;;  %v4535_v38 = vld [vmem:[#allocation10 + $0xd8] sm:$0xf0] }
  0xab   :  { %v4934_v11 = vor.u32 %v5174_v1, %v4933_v0  ;;  %v5094_v47 = vld [vmem:[#allocation10 + $0x174] sm:$0xf0]  ;;  %v4453_v1 = vld [vmem:[#allocation10 + $0x28] sm:$0xf] }
  0xac   :  { %1786 = vmatpush.bf16.msrb.mxu2 %v4738_v17  ;;  %1799 = vmatpush.bf16.msra.mxu0 %v4866_v24  ;;  %v4790_v17 = vor.u32 %v5138_v10, %v4789_v9  ;;  %v4581_v9 = vld [vmem:[#allocation10 + $0x128] sm:$0xf] }
  0xae   :  { %1760 = vmatpush.bf16.msra.mxu3 %v4482_v8  ;;  %1773 = vmatpush.bf16.msrb.mxu1 %v4610_v14  ;;  %v5106_v8 = vld [vmem:[#allocation10 + $0x1d4] sm:$0xf0]  ;;  %v4917_v14 = vld [vmem:[#allocation10 + $0x3c8] sm:$0xf] }
  0xaf   :  { %v4662_v16 = vor.u32 %v5106_v8, %v4661_v5  ;;  %v4918_v24 = vor.u32 %v5170_v15, %v4917_v14  ;;  %v5154_v5 = vld [vmem:[#allocation10 + $0x354] sm:$0xf0]  ;;  %v4437_v15 = vld [vmem:[#allocation10 + $0x8] sm:$0xf] }
  0xb0   :  { %1787 = vmatpush.bf16.msrb.mxu2 %v4722_v30  ;;  %1800 = vmatpush.bf16.msra.mxu0 %v4850_v36  ;;  %v4774_v30 = vor.u32 %v5134_v22, %v4773_v21  ;;  %v5545_v36 = vpop.f32.mrf.mxu1  ;;  %v5547_v50 = vpop.f32.mrf.mxu3 }
  0xb2   :  { %1761 = vmatpush.bf16.msra.mxu3 %v4466_v20  ;;  %1774 = vmatpush.bf16.msrb.mxu1 %v4594_v27  ;;  %v5102_v20 = vld [vmem:[#allocation10 + $0x1b4] sm:$0xf0]  ;;  %v4901_v27 = vld [vmem:[#allocation10 + $0x3a8] sm:$0xf] }
  0xb3   :  { %v4646_v29 = vor.u32 %v5102_v20, %v4645_v18  ;;  %v4902_v37 = vor.u32 %v5166_v28, %v4901_v27  ;;  %v4551_v18 = vld [vmem:[#allocation10 + $0xf8] sm:$0xf0]  ;;  %v5150_v20 = vld [vmem:[#allocation10 + $0x334] sm:$0xf0]  ;;  %v4693_v28 = vld [vmem:[#allocation10 + $0x208] sm:$0xf] }
  0xb4   :  { %1788 = vmatpush.bf16.msrb.mxu2 %v4706_v45  ;;  %1801 = vmatpush.bf16.msra.mxu0 %v4834_v54  ;;  %v4613_v45 = vld [vmem:[#allocation10 + $0x168] sm:$0xf]  ;;  %v5082_v27 = vld [vmem:[#allocation10 + $0x114] sm:$0xf0] }
  0xb5   :  { %v4869_v54 = vld [vmem:[#allocation10 + $0x368] sm:$0xf]  ;;  %v4614_v56 = vor.u32 %v5094_v47, %v4613_v45  ;;  %v4566_v39 = vor.u32 %v5082_v27, %v4565_v25  ;;  %v5172_v45 = vld [vmem:[#allocation10 + $0x3ec] sm:$0xf] }
  0xb6   :  { %1762 = vmatpush.bf16.msra.mxu3 %v4450_v32  ;;  %1775 = vmatpush.bf16.msrb.mxu1 %v4578_v40  ;;  %v5098_v32 = vld [vmem:[#allocation10 + $0x194] sm:$0xf0]  ;;  %v4885_v40 = vld [vmem:[#allocation10 + $0x388] sm:$0xf]  ;;  %v4870_v0 = vor.u32 %v5158_v55, %v4869_v54  ;;  %v5136_v54 = vld [vmem:[#allocation10 + $0x2cc] sm:$0xf] }
  0xb7   :  { %v4630_v43 = vor.u32 %v5098_v32, %v4629_v58  ;;  %v4886_v51 = vor.u32 %v5162_v41, %v4885_v40  ;;  %v4679_v32 = vld [vmem:[#allocation10 + $0x1f8] sm:$0xf0]  ;;  %v4821_v41 = vld [vmem:[#allocation10 + $0x308] sm:$0xf]  ;;  %v5060_v25 = vld [vmem:[#allocation10 + $0x6c] sm:$0xf] }
  0xb8   :  { %1789 = vmatpush.bf16.msrb.mxu2 %v4690_v63  ;;  %1802 = vmatpush.bf16.msra.mxu0 %v4818_v7  ;;  %v5122_v63 = vld [vmem:[#allocation10 + $0x254] sm:$0xf0]  ;;  %v5551_v21 = vpop.f32.mrf.mxu3 }
  0xb9   :  { %v4726_v8 = vor.u32 %v5122_v63, %v4725_v62  ;;  %v5168_v63 = vld [vmem:[#allocation10 + $0x3cc] sm:$0xf] }
  0xba   :  { %1763 = vmatpush.bf16.msra.mxu3 %v4434_v49  ;;  %1776 = vmatpush.bf16.msrb.mxu1 %v4562_v59  ;;  %v5126_v49 = vld [vmem:[#allocation10 + $0x274] sm:$0xf0]  ;;  %v4597_v59 = vld [vmem:[#allocation10 + $0x148] sm:$0xf] }
  0xbb   :  { %1790 = vmatmul.bf16.vlgmr.msrb.gmra.mxu2 %v5531_v33  ;;  %1803 = vmatmul.bf16.vlgmr.msra.gmra.mxu0 %v5536_v42  ;;  %v4742_v57 = vor.u32 %v5126_v49, %v4741_v48  ;;  %v4598_v7 = vor.u32 %v5090_v61, %v4597_v59  ;;  %v4810_v49 = vor.u32 %v5140_v34, %v4807_v35  ;;  %v4519_v59 = vld [vmem:[#allocation10 + $0xb8] sm:$0xf0]  ;;  %v5092_v35 = vld [vmem:[#allocation10 + $0x16c] sm:$0xf] }
  0xbc   :  { %1834 = vmatpush.bf16.msra.mxu2 %v4806_v4  ;;  %1847 = vmatpush.bf16.msrb.mxu0 %v4934_v11  ;;  %v4853_v4 = vld [vmem:[#allocation10 + $0x348] sm:$0xf]  ;;  %v5086_v11 = vld [vmem:[#allocation10 + $0x134] sm:$0xf0] }
  0xbd   :  { %1764 = vmatmul.bf16.vlgmr.msra.gmra.mxu3 %v5529_v23  ;;  %1777 = vmatmul.bf16.vlgmr.msrb.gmra.mxu1 %v5533_v2  ;;  %v4854_v14 = vor.u32 %v5154_v5, %v4853_v4  ;;  %v4582_v22 = vor.u32 %v5086_v11, %v4581_v9  ;;  %v5100_v4 = vld [vmem:[#allocation10 + $0x1ac] sm:$0xf]  ;;  %v4647_v5 = vld [vmem:[#allocation10 + $0x1b8] sm:$0xf0] }
  0xbe   :  { %1808 = vmatpush.bf16.msrb.mxu3 %v4550_v53  ;;  %1821 = vmatpush.bf16.msra.mxu1 %v4678_v3  ;;  %v5058_v53 = vld [vmem:[#allocation10 + $0x54] sm:$0xf0]  ;;  %v5553_v47 = vpop.f32.mrf.mxu2  ;;  %v5064_v9 = vld [vmem:[#allocation10 + $0x8c] sm:$0xf] }
  0xbf   :  { %v4470_v60 = vor.u32 %v5058_v53, %v4469_v52  ;;  %v5054_v3 = vld [vmem:[#allocation10 + $0x34] sm:$0xf0]  ;;  %v5104_v52 = vld [vmem:[#allocation10 + $0x1cc] sm:$0xf]  ;;  %v4663_v53 = vld [vmem:[#allocation10 + $0x1d8] sm:$0xf0] }
  0xc0   :  { %1835 = vmatpush.bf16.msra.mxu2 %v4790_v17  ;;  %1848 = vmatpush.bf16.msrb.mxu0 %v4918_v24  ;;  %v4454_v10 = vor.u32 %v5054_v3, %v4453_v1  ;;  %v5076_v17 = vld [vmem:[#allocation10 + $0xec] sm:$0xf]  ;;  %v4710_v24 = vor.u32 %v5118_v13, %v4709_v12  ;;  %v4666_v62 = vor.u32 %v5104_v52, %v4663_v53  ;;  %v4599_v53 = vld [vmem:[#allocation10 + $0x158] sm:$0xf0] }
  0xc1   :  { %v4650_v12 = vor.u32 %v5100_v4, %v4647_v5  ;;  %v5164_v13 = vld [vmem:[#allocation10 + $0x3ac] sm:$0xf] }
  0xc2   :  { %1809 = vmatpush.bf16.msrb.mxu3 %v4534_v6  ;;  %1822 = vmatpush.bf16.msra.mxu1 %v4662_v16  ;;  %v5549_v6 = vpop.f32.mrf.mxu1  ;;  %v5050_v16 = vld [vmem:[#allocation10 + $0x14] sm:$0xf0]  ;;  %v5088_v52 = vld [vmem:[#allocation10 + $0x14c] sm:$0xf] }
  0xc3   :  { %v4438_v26 = vor.u32 %v5050_v16, %v4437_v15 }
  0xc4   :  { %1836 = vmatpush.bf16.msra.mxu2 %v4774_v30  ;;  %1849 = vmatpush.bf16.msrb.mxu0 %v4902_v37  ;;  %v4554_v30 = vor.u32 %v5076_v17, %v4551_v18  ;;  %v5072_v37 = vld [vmem:[#allocation10 + $0xcc] sm:$0xf] }
  0xc5   :  { %v5096_v18 = vld [vmem:[#allocation10 + $0x18c] sm:$0xf] }
  0xc6   :  { %1810 = vmatpush.bf16.msrb.mxu3 %v4518_v19  ;;  %1823 = vmatpush.bf16.msra.mxu1 %v4646_v29  ;;  %v4837_v19 = vld [vmem:[#allocation10 + $0x328] sm:$0xf]  ;;  %v5114_v29 = vld [vmem:[#allocation10 + $0x214] sm:$0xf0]  ;;  %v5567_v27 = vpop.f32.mrf.mxu2 }
  0xc7   :  { %v4838_v58 = vor.u32 %v5150_v20, %v4837_v19  ;;  %v4694_v40 = vor.u32 %v5114_v29, %v4693_v28  ;;  %v4631_v19 = vld [vmem:[#allocation10 + $0x198] sm:$0xf0]  ;;  %v5128_v20 = vld [vmem:[#allocation10 + $0x28c] sm:$0xf] }
  0xc8   :  { %1837 = vmatpush.bf16.msra.mxu2 %v4758_v44  ;;  %1850 = vmatpush.bf16.msrb.mxu0 %v4886_v51  ;;  %v4538_v51 = vor.u32 %v5072_v37, %v4535_v38  ;;  %v4634_v29 = vor.u32 %v5096_v18, %v4631_v19  ;;  %v4615_v37 = vld [vmem:[#allocation10 + $0x178] sm:$0xf0]  ;;  %v5124_v38 = vld [vmem:[#allocation10 + $0x26c] sm:$0xf] }
  0xc9   :  { %v4839_v18 = vld [vmem:[#allocation10 + $0x338] sm:$0xf0] }
  0xca   :  { %1811 = vmatpush.bf16.msrb.mxu3 %v4502_v31  ;;  %1824 = vmatpush.bf16.msra.mxu1 %v4630_v43  ;;  %v5108_v31 = vld [vmem:[#allocation10 + $0x1ec] sm:$0xf]  ;;  %v5146_v43 = vld [vmem:[#allocation10 + $0x314] sm:$0xf0]  ;;  %v5555_v48 = vpop.f32.mrf.mxu1 }
  0xcb   :  { %v4682_v44 = vor.u32 %v5108_v31, %v4679_v32  ;;  %v4822_v55 = vor.u32 %v5146_v43, %v4821_v41  ;;  %v4471_v41 = vld [vmem:[#allocation10 + $0x58] sm:$0xf0] }
  0xcc   :  { %1838 = vmatpush.bf16.msra.mxu2 %v4742_v57  ;;  %1851 = vmatpush.bf16.msrb.mxu0 %v4870_v0  ;;  %v5068_v57 = vld [vmem:[#allocation10 + $0xac] sm:$0xf]  ;;  %v4919_v0 = vld [vmem:[#allocation10 + $0x3d8] sm:$0xf0] }
  0xcd   :  { %v4522_v3 = vor.u32 %v5068_v57, %v4519_v59  ;;  %v4922_v11 = vor.u32 %v5168_v63, %v4919_v0  ;;  %v5052_v57 = vld [vmem:[#allocation10 + $0x2c] sm:$0xf]  ;;  %v4455_v59 = vld [vmem:[#allocation10 + $0x38] sm:$0xf0]  ;;  %v4602_v0 = vor.u32 %v5088_v52, %v4599_v53 }
  0xce   :  { %1812 = vmatpush.bf16.msrb.mxu3 %v4486_v46  ;;  %1825 = vmatpush.bf16.msra.mxu1 %v4614_v56  ;;  %v4935_v46 = vld [vmem:[#allocation10 + $0x3f8] sm:$0xf0] }
  0xcf   :  { %v4791_v56 = vld [vmem:[#allocation10 + $0x2d8] sm:$0xf0]  ;;  %v4938_v61 = vor.u32 %v5172_v45, %v4935_v46  ;;  %v5156_v45 = vld [vmem:[#allocation10 + $0x36c] sm:$0xf] }
  0xd0   :  { %1839 = vmatpush.bf16.msra.mxu2 %v4726_v8  ;;  %1852 = vmatpush.bf16.msrb.mxu0 %v4854_v14  ;;  %v4794_v1 = vor.u32 %v5136_v54, %v4791_v56  ;;  %v4775_v8 = vld [vmem:[#allocation10 + $0x2b8] sm:$0xf0]  ;;  %v5120_v54 = vld [vmem:[#allocation10 + $0x24c] sm:$0xf] }
  0xd1   :  { %v4903_v14 = vld [vmem:[#allocation10 + $0x3b8] sm:$0xf0] }
  0xd2   :  { %1813 = vmatpush.bf16.msrb.mxu3 %v4470_v60  ;;  %1826 = vmatpush.bf16.msra.mxu1 %v4598_v7  ;;  %v5557_v60 = vpop.f32.mrf.mxu3  ;;  %v5132_v7 = vld [vmem:[#allocation10 + $0x2ac] sm:$0xf]  ;;  %v5562_v15 = vpop.f32.mrf.mxu1  ;;  %v4906_v28 = vor.u32 %v5164_v13, %v4903_v14  ;;  %v4871_v46 = vld [vmem:[#allocation10 + $0x378] sm:$0xf0] }
  0xd3   :  { %v4778_v16 = vor.u32 %v5132_v7, %v4775_v8  ;;  %v4727_v56 = vld [vmem:[#allocation10 + $0x258] sm:$0xf0]  ;;  %v4458_v7 = vor.u32 %v5052_v57, %v4455_v59  ;;  %v5084_v8 = vld [vmem:[#allocation10 + $0x12c] sm:$0xf] }
  0xd4   :  { %1840 = vmatpush.bf16.msra.mxu2 %v4710_v24  ;;  %1853 = vmatpush.bf16.msrb.mxu0 %v4838_v58  ;;  %v4759_v24 = vld [vmem:[#allocation10 + $0x298] sm:$0xf0]  ;;  %v4730_v5 = vor.u32 %v5120_v54, %v4727_v56 }
  0xd5   :  { %v4887_v58 = vld [vmem:[#allocation10 + $0x398] sm:$0xf0]  ;;  %v4762_v32 = vor.u32 %v5128_v20, %v4759_v24  ;;  %v5080_v24 = vld [vmem:[#allocation10 + $0x10c] sm:$0xf] }
  0xd6   :  { %1814 = vmatpush.bf16.msrb.mxu3 %v4454_v10  ;;  %1827 = vmatpush.bf16.msra.mxu1 %v4582_v22  ;;  %v4503_v10 = vld [vmem:[#allocation10 + $0x98] sm:$0xf0]  ;;  %v5564_v22 = vpop.f32.mrf.mxu0 }
  0xd7   :  { %v4506_v17 = vor.u32 %v5064_v9, %v4503_v10  ;;  %v4583_v9 = vld [vmem:[#allocation10 + $0x138] sm:$0xf0]  ;;  %v5116_v10 = vld [vmem:[#allocation10 + $0x22c] sm:$0xf] }
  0xd8   :  { %1841 = vmatpush.bf16.msra.mxu2 %v4694_v40  ;;  %1854 = vmatpush.bf16.msrb.mxu0 %v4822_v55  ;;  %v5056_v40 = vld [vmem:[#allocation10 + $0x4c] sm:$0xf]  ;;  %v4439_v13 = vld [vmem:[#allocation10 + $0x18] sm:$0xf0] }
  0xda   :  { %1815 = vmatpush.bf16.msrb.mxu3 %v4438_v26  ;;  %1828 = vmatpush.bf16.msra.mxu1 %v4566_v39  ;;  %v4487_v26 = vld [vmem:[#allocation10 + $0x78] sm:$0xf0]  ;;  %v5569_v31 = vpop.f32.mrf.mxu3  ;;  %v5571_v55 = vpop.f32.mrf.mxu1 }
  0xdb   :  { %1842 = vmatmul.bf16.vlgmr.msra.gmra.mxu2 %v5531_v33  ;;  %1855 = vmatmul.bf16.vlgmr.msrb.gmra.mxu0 %v5536_v42  ;;  %v4490_v34 = vor.u32 %v5060_v25, %v4487_v26  ;;  %v4743_v39 = vld [vmem:[#allocation10 + $0x278] sm:$0xf0] }
  0xdc   :  { %1886 = vmatpush.bf16.msrb.mxu2 %v4810_v49  ;;  %1899 = vmatpush.bf16.msra.mxu0 %v4938_v61  ;;  %v4746_v49 = vor.u32 %v5124_v38, %v4743_v39  ;;  %v5573_v61 = vpop.f32.mrf.mxu2  ;;  %v4567_v25 = vld [vmem:[#allocation10 + $0x118] sm:$0xf0] }
  0xdd   :  { %1816 = vmatmul.bf16.vlgmr.msrb.gmra.mxu3 %v5529_v23  ;;  %1829 = vmatmul.bf16.vlgmr.msra.gmra.mxu1 %v5533_v2 }
  0xde   :  { %1860 = vmatpush.bf16.msra.mxu3 %v4554_v30  ;;  %1873 = vmatpush.bf16.msrb.mxu1 %v4682_v44  ;;  %v5160_v30 = vld [vmem:[#allocation10 + $0x38c] sm:$0xf]  ;;  %v4618_v44 = vor.u32 %v5092_v35, %v4615_v37  ;;  %v5575_v63 = vpop.f32.mrf.mxu0  ;;  %v4823_v35 = vld [vmem:[#allocation10 + $0x318] sm:$0xf0] }
  0xdf   :  { %v4890_v43 = vor.u32 %v5160_v30, %v4887_v58 }
  0xe0   :  { %1887 = vmatpush.bf16.msrb.mxu2 %v4794_v1  ;;  %1900 = vmatpush.bf16.msra.mxu0 %v4922_v11  ;;  %v5152_v1 = vld [vmem:[#allocation10 + $0x34c] sm:$0xf]  ;;  %v4711_v11 = vld [vmem:[#allocation10 + $0x238] sm:$0xf0] }
  0xe1   :  { %v4714_v19 = vor.u32 %v5116_v10, %v4711_v11 }
  0xe2   :  { %1861 = vmatpush.bf16.msra.mxu3 %v4538_v51  ;;  %1874 = vmatpush.bf16.msrb.mxu1 %v4666_v62  ;;  %v4474_v51 = vor.u32 %v5056_v40, %v4471_v41  ;;  %v4874_v62 = vor.u32 %v5156_v45, %v4871_v46  ;;  %v5577_v4 = vpop.f32.mrf.mxu3  ;;  %v828_v26 = vpop.f32.mrf.mxu1 }
  0xe4   :  { %1888 = vmatpush.bf16.msrb.mxu2 %v4778_v16  ;;  %1901 = vmatpush.bf16.msra.mxu0 %v4906_v28  ;;  %v4586_v16 = vor.u32 %v5084_v8, %v4583_v9  ;;  %v5112_v28 = vld [vmem:[#allocation10 + $0x20c] sm:$0xf]  ;;  %v5581_v37 = vpop.f32.mrf.mxu2  ;;  %v827_v8 = vadd.f32 %v5571_v55, %v5577_v4 }
  0xe6   :  { %1862 = vmatpush.bf16.msra.mxu3 %v4522_v3  ;;  %1875 = vmatpush.bf16.msrb.mxu1 %v4650_v12  ;;  %v4855_v3 = vld [vmem:[#allocation10 + $0x358] sm:$0xf0]  ;;  %v5048_v12 = vld [vmem:[#allocation10 + $0xc] sm:$0xf]  ;;  %v5579_v58 = vpop.f32.mrf.mxu0 }
  0xe7   :  { %v4858_v14 = vor.u32 %v5152_v1, %v4855_v3  ;;  %v4442_v20 = vor.u32 %v5048_v12, %v4439_v13  ;;  %v5599_v1 = vld [vmem:[#allocation7] ss:$2 sm:$0xf] }
  0xe8   :  { %1889 = vmatpush.bf16.msrb.mxu2 %v4762_v32  ;;  %1902 = vmatpush.bf16.msra.mxu0 %v4890_v43  ;;  %v4570_v32 = vor.u32 %v5080_v24, %v4567_v25 }
  0xea   :  { %1863 = vmatpush.bf16.msra.mxu3 %v4506_v17  ;;  %1876 = vmatpush.bf16.msrb.mxu1 %v4634_v29  ;;  %v5148_v17 = vld [vmem:[#allocation10 + $0x32c] sm:$0xf]  ;;  %v4695_v29 = vld [vmem:[#allocation10 + $0x218] sm:$0xf0]  ;;  %v815_v38 = vpop.f32.mrf.mxu3 }
  0xeb   :  { %v4842_v30 = vor.u32 %v5148_v17, %v4839_v18  ;;  %v4698_v39 = vor.u32 %v5112_v28, %v4695_v29  ;;  %v7095_v29 = vperm.slane %v5599_v1, 1 }
  0xec   :  { %1890 = vmatpush.bf16.msrb.mxu2 %v4746_v49  ;;  %1903 = vmatpush.bf16.msra.mxu0 %v4874_v62 }
  0xee   :  { %1864 = vmatpush.bf16.msra.mxu3 %v4490_v34  ;;  %1877 = vmatpush.bf16.msrb.mxu1 %v4618_v44  ;;  %v5144_v34 = vld [vmem:[#allocation10 + $0x30c] sm:$0xf]  ;;  %v839_v43 = vpop.f32.mrf.mxu2  ;;  %v5586_v44 = vpop.f32.mrf.mxu0 }
  0xef   :  { %v4826_v40 = vor.u32 %v5144_v34, %v4823_v35 }
  0xf0   :  { %1891 = vmatpush.bf16.msrb.mxu2 %v4730_v5  ;;  %1904 = vmatpush.bf16.msra.mxu0 %v4858_v14  ;;  %v7094_v5 = vperm.slane %v5599_v1, 0 }
  0xf2   :  { %1865 = vmatpush.bf16.msra.mxu3 %v4474_v51  ;;  %1878 = vmatpush.bf16.msrb.mxu1 %v4602_v0  ;;  %v852_v41 = vpop.f32.mrf.mxu3 }
  0xf4   :  { %1892 = vmatpush.bf16.msrb.mxu2 %v4714_v19  ;;  %1905 = vmatpush.bf16.msra.mxu0 %v4842_v30  ;;  %v744_v30 = vadd.f32 %v5547_v50, %v5553_v47 }
  0xf6   :  { %1866 = vmatpush.bf16.msra.mxu3 %v4458_v7  ;;  %1879 = vmatpush.bf16.msrb.mxu1 %v4586_v16  ;;  %v841_v49 = vpop.f32.mrf.mxu2  ;;  %v716_v7 = vadd.f32 %v5545_v36, %v5564_v22 }
  0xf7   :  { %v921_v49 = vadd.f32 %v7095_v29, %v744_v30 }
  0xf8   :  { %1893 = vmatpush.bf16.msrb.mxu2 %v4698_v39  ;;  %1906 = vmatpush.bf16.msra.mxu0 %v4826_v40  ;;  %v5591_v51 = vpop.f32.mrf.mxu0  ;;  %v920_v16 = vadd.f32 %v7094_v5, %v716_v7 }
  0xfa   :  { %1867 = vmatpush.bf16.msra.mxu3 %v4442_v20  ;;  %1880 = vmatpush.bf16.msrb.mxu1 %v4570_v32  ;;  %v5589_v45 = vpop.f32.mrf.mxu1  ;;  %v854_v46 = vpop.f32.mrf.mxu3  ;;  %v1937_v20 = vmul.f32 0.5, %v920_v16  ;;  %v853_v32 = vadd.f32 %v852_v41, %v839_v43 }
  0xfb   :  { %1894 = vmatmul.bf16.vlgmr.msrb.gmra.mxu2 %v5531_v33  ;;  %1907 = vmatmul.bf16.vlgmr.msra.gmra.mxu0 %v5536_v42  ;;  %v5597_v42 = vld [vmem:[#allocation7 + $0x1] ss:$2 sm:$0xf] }
  0xfc   :  { %v1917_v10 = vperm.slane %v5597_v42, 0  ;;  %v1918_v35 = vperm.slane %v5597_v42, 1 }
  0xfd   :  { %1868 = vmatmul.bf16.vlgmr.msra.gmra.mxu3 %v5529_v23  ;;  %1881 = vmatmul.bf16.vlgmr.msrb.gmra.mxu1 %v5533_v2 }
  0xfe   :  { %v5595_v53 = vpop.f32.mrf.mxu2 }
 0x100   :  { %v893_v2 = vpop.f32.mrf.mxu0 }
 0x102   :  { %v867_v23 = vpop.f32.mrf.mxu1  ;;  %v5593_v52 = vpop.f32.mrf.mxu3 }
 0x106   :  { %v906_v33 = vpop.f32.mrf.mxu2 }
 0x107   :  { %v1938_v33 = vmul.f32 0.5, %v921_v49 }
 0x10a   :  { %v880_v54 = vpop.f32.mrf.mxu3 }
 0x118   :  { %v1752_v57 = vpop.f32.mrf.mxu0 }
 0x11a   :  { %v1726_v56 = vpop.f32.mrf.mxu1 }
 0x11e   :  { %v1739_v0 = vpop.f32.mrf.mxu2 }
 0x120   :  { %v1713_v59 = vpop.f32.mrf.mxu3  ;;  %v1754_v12 = vpop.f32.mrf.mxu0 }
 0x121   :  { %v1727_v62 = vadd.f32 %v1726_v56, %v1713_v59  ;;  %v1945_v59 = vlaneseq }
 0x122   :  { %v1728_v11 = vpop.f32.mrf.mxu1 }
 0x123   :  { %v1740_v3 = vadd.f32 %v1739_v0, %v1727_v62  ;;  %v5615_v50 = vshrl.u32 %v1945_v59, 7 }
 0x125   :  { %v1753_v9 = vadd.f32 %v1752_v57, %v1740_v3  ;;  %v1980_v47 = vshra.s32 %v5615_v50, 7  ;;  %v2012_v41 = vand.u32 127, %v5615_v50  ;;  %v5619_v3 = vand.u32 127, %v1945_v59 }
 0x126   :  { %v1741_v18 = vpop.f32.mrf.mxu2 }
 0x127   :  { %v1912_v13 = vadd.f32 %v1753_v9, %v827_v8  ;;  %v2044_v43 = vmul.u32 3, %v1980_v47  ;;  %vm2108_vm1 = vcmp.lt.s32.totalorder %v2012_v41, 3  ;;  %vm2300_vm6 = vcmp.lt.s32.totalorder %v5619_v3, 6 }
 0x128   :  { %v1715_v14 = vpop.f32.mrf.mxu3  ;;  %v1962_v47 = vadd.s32 128, %v5615_v50 }
 0x129   :  { %v1925_v17 = vadd.f32 %v1917_v10, %v1912_v13  ;;  %v2076_v0 = vadd.s32 %v2044_v43, %v2012_v41  ;;  %v772_v13 = vadd.f32 %v5557_v60, %v5555_v48  ;;  %v879_v14 = vadd.f32 %v5593_v52, %v5589_v45 }
 0x12a   :  { %v7093_v48 = vperm.slane %v5599_v1, 2  ;;  %v1996_v41 = vshra.s32 %v1962_v47, 7  ;;  %v2028_v43 = vand.u32 127, %v1962_v47 }
 0x12b   :  { %v1929_v19 = vmax.f32 %v1925_v17, 0.0  ;;  %v2204_v9 = vadd.s32 1, %v2076_v0  ;;  %vm2140_vm2 = vcmp.ge.s32.totalorder %v5619_v3, %v2076_v0  ;;  %v1919_v17 = vperm.slane %v5597_v42, 2 }
 0x12c   :  { %vm2172_vm3 = vmand %vm2108_vm1, %vm2140_vm2  ;;  %v922_v52 = vadd.f32 %v7093_v48, %v772_v13  ;;  %vm2124_vm9 = vcmp.lt.s32.totalorder %v2028_v43, 3 }
 0x12d   :  { %v1933_v24 = vmul.f32 0.5, %v1929_v19  ;;  %vm2236_vm4 = vcmp.lt.s32.totalorder %v5619_v3, %v2204_v9  ;;  %v7118_v19 = vmov 0.0  }
 0x12e   :  { %vm2268_vm5 = vmand %vm2172_vm3, %vm2236_vm4 }
 0x12f   :  { %v1941_v25 = vadd.f32 %v1937_v20, %v1933_v24  ;;  %vm2301_vm7 = vmand %vm2268_vm5, %vm2300_vm6 }
 0x130   :  { %v4939_v20 = vsel %vm2301_vm7, 1.0, %v7118_v19 }
 0x131   :  { %2509 = vmatpush.msrb.mxu3 %v1941_v25 }
 0x132   :  { %4941 = vmatmul.msk.f32.vlgmr.msrb.gmra.mxu3 %vm2397_vm8, %v4939_v20 }
 0x138   :  { %v1804_v55 = vpop.f32.mrf.mxu0 }
 0x13a   :  { %v1778_v36 = vpop.f32.mrf.mxu1  ;;  %2513 = vmatmul.f32.gmra.mxu3 %v7118_v19 }
 0x13e   :  { %v1791_v26 = vpop.f32.mrf.mxu2 }
 0x140   :  { %v1765_v22 = vpop.f32.mrf.mxu3  ;;  %v1806_v46 = vpop.f32.mrf.mxu0 }
 0x141   :  { %v1779_v4 = vadd.f32 %v1778_v36, %v1765_v22  ;;  %v905_v46 = vadd.f32 %v5595_v53, %v5591_v51 }
 0x142   :  { %v1780_v38 = vpop.f32.mrf.mxu1  ;;  %2516 = vmatmul.f32.gmra.mxu3 %v7118_v19 }
 0x143   :  { %v1792_v28 = vadd.f32 %v1791_v26, %v1779_v4 }
 0x145   :  { %v1805_v34 = vadd.f32 %v1804_v55, %v1792_v28  ;;  %v1939_v55 = vmul.f32 0.5, %v922_v52 }
 0x146   :  { %v1793_v2 = vpop.f32.mrf.mxu2 }
 0x147   :  { %v1913_v39 = vadd.f32 %v1805_v34, %v853_v32 }
 0x148   :  { %v1767_v40 = vpop.f32.mrf.mxu3 }
 0x149   :  { %v1926_v23 = vadd.f32 %v1918_v35, %v1913_v39  ;;  %v800_v40 = vadd.f32 %v5573_v61, %v5579_v58 }
 0x14a   :  { %2519 = vmatmul.f32.gmra.mxu3 %v7118_v19 }
 0x14b   :  { %v1930_v54 = vmax.f32 %v1926_v23, 0.0  ;;  %v1920_v23 = vperm.slane %v5597_v42, 3 }
 0x14d   :  { %v1934_v56 = vmul.f32 0.5, %v1930_v54 }
 0x14f   :  { %v1942_v57 = vadd.f32 %v1938_v33, %v1934_v56  ;;  %v7092_v33 = vperm.slane %v5599_v1, 3 }
 0x151   :  { %2622 = vmatpush.msra.mxu1 %v1942_v57  ;;  %v923_v57 = vadd.f32 %v7092_v33, %v800_v40 }
 0x152   :  { %4943 = vmatmul.msk.f32.vlgmr.msra.gmra.mxu1 %vm2397_vm8, %v4939_v20  ;;  %2522 = vmatmul.f32.gmra.mxu3 %v7118_v19 }
 0x153   :  { %v1940_v51 = vmul.f32 0.5, %v923_v57 }
 0x158   :  { %v1856_v8 = vpop.f32.mrf.mxu0 }
 0x15a   :  { %v1830_v62 = vpop.f32.mrf.mxu1  ;;  %2626 = vmatmul.f32.gmra.mxu1 %v7118_v19  ;;  %2525 = vmatmul.f32.gmra.mxu3 %v7118_v19 }
 0x15e   :  { %v1843_v11 = vpop.f32.mrf.mxu2 }
 0x160   :  { %v1817_v7 = vpop.f32.mrf.mxu3  ;;  %v1858_v45 = vpop.f32.mrf.mxu0 }
 0x161   :  { %v1831_v10 = vadd.f32 %v1830_v62, %v1817_v7  ;;  %v2060_v62 = vmul.u32 3, %v1996_v41 }
 0x162   :  { %v1832_v18 = vpop.f32.mrf.mxu1  ;;  %2629 = vmatmul.f32.gmra.mxu1 %v7118_v19  ;;  %2528 = vmatmul.f32.gmra.mxu3 %v7118_v19 }
 0x163   :  { %v1844_v12 = vadd.f32 %v1843_v11, %v1831_v10  ;;  %v2092_v0 = vadd.s32 %v2060_v62, %v2028_v43 }
 0x165   :  { %v1857_v16 = vadd.f32 %v1856_v8, %v1844_v12  ;;  %vm2156_vm10 = vcmp.ge.s32.totalorder %v5619_v3, %v2092_v0  ;;  %v2220_v7 = vadd.s32 1, %v2092_v0 }
 0x166   :  { %v1845_v36 = vpop.f32.mrf.mxu2  ;;  %vm2188_vm11 = vmand %vm2124_vm9, %vm2156_vm10 }
 0x167   :  { %v1914_v60 = vadd.f32 %v1857_v16, %v879_v14  ;;  %vm2252_vm12 = vcmp.lt.s32.totalorder %v5619_v3, %v2220_v7 }
 0x168   :  { %v1819_v24 = vpop.f32.mrf.mxu3  ;;  %vm2284_vm13 = vmand %vm2188_vm11, %vm2252_vm12 }
 0x169   :  { %v1927_v25 = vadd.f32 %v1919_v17, %v1914_v60  ;;  %vm2317_vm14 = vmand %vm2284_vm13, %vm2300_vm6 }
 0x16a   :  { %2632 = vmatmul.f32.gmra.mxu1 %v7118_v19  ;;  %2531 = vmatmul.f32.gmra.mxu3 %v7118_v19  ;;  %v4940_v50 = vsel %vm2317_vm14, 1.0, %v7118_v19 }
 0x16b   :  { %v1931_v22 = vmax.f32 %v1927_v25, 0.0 }
 0x16d   :  { %v1935_v4 = vmul.f32 0.5, %v1931_v22 }
 0x16f   :  { %v1943_v26 = vadd.f32 %v1939_v55, %v1935_v4 }
 0x171   :  { %2735 = vmatpush.msra.mxu2 %v1943_v26 }
 0x172   :  { %4945 = vmatmul.msk.f32.vlgmr.msra.gmra.mxu2 %vm2397_vm8, %v4939_v20  ;;  %2635 = vmatmul.f32.gmra.mxu1 %v7118_v19 }
 0x173   :  { %2534 = vmatmul.f32.gmra.mxu3 %v7118_v19 }
 0x178   :  { %v1908_v32 = vpop.f32.mrf.mxu0 }
 0x17a   :  { %v1882_v28 = vpop.f32.mrf.mxu1  ;;  %2739 = vmatmul.f32.gmra.mxu2 %v7118_v19  ;;  %2638 = vmatmul.f32.gmra.mxu1 %v7118_v19 }
 0x17b   :  { %2537 = vmatmul.f32.gmra.mxu3 %v7118_v19 }
 0x17e   :  { %v1895_v35 = vpop.f32.mrf.mxu2 }
 0x180   :  { %v1869_v30 = vpop.f32.mrf.mxu3  ;;  %v1910_v54 = vpop.f32.mrf.mxu0 }
 0x181   :  { %v1883_v34 = vadd.f32 %v1882_v28, %v1869_v30 }
 0x182   :  { %v1884_v39 = vpop.f32.mrf.mxu1  ;;  %2742 = vmatmul.f32.gmra.mxu2 %v7118_v19  ;;  %2641 = vmatmul.f32.gmra.mxu1 %v7118_v19 }
 0x183   :  { %v1896_v38 = vadd.f32 %v1895_v35, %v1883_v34  ;;  %2540 = vmatmul.f32.gmra.mxu3 %v7118_v19 }
 0x185   :  { %v1909_v49 = vadd.f32 %v1908_v32, %v1896_v38 }
 0x186   :  { %v1897_v61 = vpop.f32.mrf.mxu2 }
 0x187   :  { %v1915_v56 = vadd.f32 %v1909_v49, %v905_v46 }
 0x188   :  { %v1871_v2 = vpop.f32.mrf.mxu3 }
 0x189   :  { %v1928_v59 = vadd.f32 %v1920_v23, %v1915_v56 }
 0x18a   :  { %2745 = vmatmul.f32.gmra.mxu2 %v7118_v19  ;;  %2644 = vmatmul.f32.gmra.mxu1 %v7118_v19 }
 0x18b   :  { %v1932_v58 = vmax.f32 %v1928_v59, 0.0  ;;  %2543 = vmatmul.f32.gmra.mxu3 %v7118_v19 }
 0x18d   :  { %v1936_v53 = vmul.f32 0.5, %v1932_v58 }
 0x18f   :  { %v1944_v42 = vadd.f32 %v1940_v51, %v1936_v53 }
 0x191   :  { %2848 = vmatpush.msrb.mxu0 %v1944_v42 }
 0x192   :  { %4947 = vmatmul.msk.f32.vlgmr.msrb.gmra.mxu0 %vm2397_vm8, %v4939_v20  ;;  %2748 = vmatmul.f32.gmra.mxu2 %v7118_v19 }
 0x193   :  { %2647 = vmatmul.f32.gmra.mxu1 %v7118_v19  ;;  %2546 = vmatmul.f32.gmra.mxu3 %v7118_v19 }
 0x19a   :  { %2852 = vmatmul.f32.gmra.mxu0 %v7118_v19  ;;  %2751 = vmatmul.f32.gmra.mxu2 %v7118_v19 }
 0x19b   :  { %2650 = vmatmul.f32.gmra.mxu1 %v7118_v19  ;;  %2549 = vmatmul.f32.gmra.mxu3 %v7118_v19 }
 0x1a2   :  { %2855 = vmatmul.f32.gmra.mxu0 %v7118_v19  ;;  %2754 = vmatmul.f32.gmra.mxu2 %v7118_v19 }
 0x1a3   :  { %2653 = vmatmul.f32.gmra.mxu1 %v7118_v19  ;;  %2552 = vmatmul.f32.gmra.mxu3 %v7118_v19 }
 0x1aa   :  { %2858 = vmatmul.f32.gmra.mxu0 %v7118_v19  ;;  %2757 = vmatmul.f32.gmra.mxu2 %v7118_v19 }
 0x1ab   :  { %2656 = vmatmul.f32.gmra.mxu1 %v7118_v19  ;;  %2555 = vmatmul.f32.gmra.mxu3 %v7118_v19 }
 0x1b2   :  { %2861 = vmatmul.f32.gmra.mxu0 %v7118_v19  ;;  %2760 = vmatmul.f32.gmra.mxu2 %v7118_v19 }
 0x1b3   :  { %2659 = vmatmul.f32.gmra.mxu1 %v7118_v19  ;;  %4942 = vmatmul.msk.f32.gmra.mxu3 %vm2397_vm8, %v4940_v50 }
 0x1b5   :  { %v5712_v9 = vpop.f32.mrf.mxu3 }
 0x1b6   :  { %7223 = vst [vmem:[#allocation20_spill] sm:$0xff] %v5712_v9 }
 0x1ba   :  { %2864 = vmatmul.f32.gmra.mxu0 %v7118_v19  ;;  %2763 = vmatmul.f32.gmra.mxu2 %v7118_v19 }
 0x1bb   :  { %2662 = vmatmul.f32.gmra.mxu1 %v7118_v19  ;;  %2561 = vmatmul.f32.gmra.mxu3 %v7118_v19 }
 0x1bd   :  { %v5720_v10 = vpop.f32.mrf.mxu3 }
 0x1be   :  { %7225 = vst [vmem:[#allocation22_spill] sm:$0xff] %v5720_v10 }
 0x1c2   :  { %2867 = vmatmul.f32.gmra.mxu0 %v7118_v19  ;;  %2766 = vmatmul.f32.gmra.mxu2 %v7118_v19 }
 0x1c3   :  { %2665 = vmatmul.f32.gmra.mxu1 %v7118_v19  ;;  %2564 = vmatmul.f32.gmra.mxu3 %v7118_v19 }
 0x1c5   :  { %v5730_v13 = vpop.f32.mrf.mxu3 }
 0x1c6   :  { %7228 = vst [vmem:[#allocation25_spill] sm:$0xff] %v5730_v13 }
 0x1ca   :  { %2870 = vmatmul.f32.gmra.mxu0 %v7118_v19  ;;  %2769 = vmatmul.f32.gmra.mxu2 %v7118_v19 }
 0x1cb   :  { %2668 = vmatmul.f32.gmra.mxu1 %v7118_v19  ;;  %2567 = vmatmul.f32.gmra.mxu3 %v7118_v19 }
 0x1cd   :  { %v5740_v17 = vpop.f32.mrf.mxu3 }
 0x1ce   :  { %7231 = vst [vmem:[#allocation28_spill] sm:$0xff] %v5740_v17 }
 0x1cf   :  { %v5710_v8 = vpop.f32.mrf.mxu1 }
 0x1d0   :  { %7222 = vst [vmem:[#allocation19_spill] sm:$0xff] %v5710_v8 }
 0x1d2   :  { %2873 = vmatmul.f32.gmra.mxu0 %v7118_v19  ;;  %2772 = vmatmul.f32.gmra.mxu2 %v7118_v19 }
 0x1d3   :  { %4944 = vmatmul.msk.f32.gmra.mxu1 %vm2397_vm8, %v4940_v50  ;;  %2570 = vmatmul.f32.gmra.mxu3 %v7118_v19 }
 0x1d5   :  { %v5750_v60 = vpop.f32.mrf.mxu3 }
 0x1d7   :  { %v5718_v3 = vpop.f32.mrf.mxu1 }
 0x1d8   :  { %7224 = vst [vmem:[#allocation21_spill] sm:$0xff] %v5718_v3 }
 0x1da   :  { %2876 = vmatmul.f32.gmra.mxu0 %v7118_v19  ;;  %2775 = vmatmul.f32.gmra.mxu2 %v7118_v19 }
 0x1db   :  { %2674 = vmatmul.f32.gmra.mxu1 %v7118_v19  ;;  %2573 = vmatmul.f32.gmra.mxu3 %v7118_v19 }
 0x1dd   :  { %v5762_v25 = vpop.f32.mrf.mxu3 }
 0x1df   :  { %v5728_v12 = vpop.f32.mrf.mxu1 }
 0x1e0   :  { %7227 = vst [vmem:[#allocation24_spill] sm:$0xff] %v5728_v12 }
 0x1e2   :  { %2879 = vmatmul.f32.gmra.mxu0 %v7118_v19  ;;  %2778 = vmatmul.f32.gmra.mxu2 %v7118_v19 }
 0x1e3   :  { %2677 = vmatmul.f32.gmra.mxu1 %v7118_v19  ;;  %2576 = vmatmul.f32.gmra.mxu3 %v7118_v19 }
 0x1e5   :  { %v5774_v4 = vpop.f32.mrf.mxu3 }
 0x1e7   :  { %v5738_v16 = vpop.f32.mrf.mxu1 }
 0x1e8   :  { %7230 = vst [vmem:[#allocation27_spill] sm:$0xff] %v5738_v16 }
 0x1ea   :  { %2882 = vmatmul.f32.gmra.mxu0 %v7118_v19  ;;  %2781 = vmatmul.f32.gmra.mxu2 %v7118_v19 }
 0x1eb   :  { %2680 = vmatmul.f32.gmra.mxu1 %v7118_v19  ;;  %2579 = vmatmul.f32.gmra.mxu3 %v7118_v19 }
 0x1ed   :  { %v5786_v32 = vpop.f32.mrf.mxu3 }
 0x1ef   :  { %v5748_v20 = vpop.f32.mrf.mxu1 }
 0x1f0   :  { %7233 = vst [vmem:[#allocation30_spill] sm:$0xff] %v5748_v20 }
 0x1f2   :  { %2885 = vmatmul.f32.gmra.mxu0 %v7118_v19  ;;  %4946 = vmatmul.msk.f32.gmra.mxu2 %vm2397_vm8, %v4940_v50 }
 0x1f3   :  { %2683 = vmatmul.f32.gmra.mxu1 %v7118_v19  ;;  %2582 = vmatmul.f32.gmra.mxu3 %v7118_v19 }
 0x1f5   :  { %v5723_v11 = vpop.f32.mrf.mxu2 }
 0x1f6   :  { %7226 = vst [vmem:[#allocation23_spill] sm:$0xff] %v5723_v11  ;;  %v5798_v39 = vpop.f32.mrf.mxu3 }
 0x1f7   :  { %v5760_v52 = vpop.f32.mrf.mxu1  ;;  %7241 = vst [vmem:[#allocation38_spill] sm:$0xff] %v5798_v39 }
 0x1fa   :  { %2888 = vmatmul.f32.gmra.mxu0 %v7118_v19  ;;  %2787 = vmatmul.f32.gmra.mxu2 %v7118_v19 }
 0x1fb   :  { %2686 = vmatmul.f32.gmra.mxu1 %v7118_v19  ;;  %2585 = vmatmul.f32.gmra.mxu3 %v7118_v19 }
 0x1fd   :  { %v5733_v14 = vpop.f32.mrf.mxu2 }
 0x1fe   :  { %7229 = vst [vmem:[#allocation26_spill] sm:$0xff] %v5733_v14  ;;  %v5810_v23 = vpop.f32.mrf.mxu3 }
 0x1ff   :  { %v5772_v55 = vpop.f32.mrf.mxu1  ;;  %7243 = vst [vmem:[#allocation40_spill] sm:$0xff] %v5810_v23  ;;  %v2982_v43 = vmul.f32 %v5810_v23, %v5810_v23 }
 0x202   :  { %2891 = vmatmul.f32.gmra.mxu0 %v7118_v19  ;;  %2790 = vmatmul.f32.gmra.mxu2 %v7118_v19 }
 0x203   :  { %2689 = vmatmul.f32.gmra.mxu1 %v7118_v19  ;;  %2588 = vmatmul.f32.gmra.mxu3 %v7118_v19 }
 0x205   :  { %v5743_v18 = vpop.f32.mrf.mxu2 }
 0x206   :  { %7232 = vst [vmem:[#allocation29_spill] sm:$0xff] %v5743_v18  ;;  %v5822_v57 = vpop.f32.mrf.mxu3 }
 0x207   :  { %v5784_v30 = vpop.f32.mrf.mxu1  ;;  %7246 = vst [vmem:[#allocation43_spill] sm:$0xff] %v5822_v57  ;;  %v2986_v29 = vmul.f32 %v5822_v57, %v5822_v57 }
 0x20a   :  { %2894 = vmatmul.f32.gmra.mxu0 %v7118_v19  ;;  %2793 = vmatmul.f32.gmra.mxu2 %v7118_v19 }
 0x20b   :  { %2692 = vmatmul.f32.gmra.mxu1 %v7118_v19  ;;  %2591 = vmatmul.f32.gmra.mxu3 %v7118_v19 }
 0x20d   :  { %v5755_v45 = vpop.f32.mrf.mxu2 }
 0x20e   :  { %7235 = vst [vmem:[#allocation32_spill] sm:$0xff] %v5755_v45  ;;  %v5834_v51 = vpop.f32.mrf.mxu3 }
 0x20f   :  { %v5753_v24 = vpop.f32.mrf.mxu0  ;;  %7249 = vst [vmem:[#allocation46_spill] sm:$0xff] %v5834_v51 }
 0x210   :  { %7234 = vst [vmem:[#allocation31_spill] sm:$0xff] %v5753_v24  ;;  %v5796_v38 = vpop.f32.mrf.mxu1 }
 0x211   :  { %7240 = vst [vmem:[#allocation37_spill] sm:$0xff] %v5796_v38 }
 0x212   :  { %4948 = vmatmul.msk.f32.gmra.mxu0 %vm2397_vm8, %v4940_v50  ;;  %2796 = vmatmul.f32.gmra.mxu2 %v7118_v19 }
 0x213   :  { %2695 = vmatmul.f32.gmra.mxu1 %v7118_v19  ;;  %2594 = vmatmul.f32.gmra.mxu3 %v7118_v19 }
 0x215   :  { %v5767_v22 = vpop.f32.mrf.mxu2 }
 0x216   :  { %7237 = vst [vmem:[#allocation34_spill] sm:$0xff] %v5767_v22  ;;  %v5846_v41 = vpop.f32.mrf.mxu3 }
 0x217   :  { %v5765_v36 = vpop.f32.mrf.mxu0  ;;  %7252 = vst [vmem:[#allocation49_spill] sm:$0xff] %v5846_v41 }
 0x218   :  { %7236 = vst [vmem:[#allocation33_spill] sm:$0xff] %v5765_v36  ;;  %v5808_v49 = vpop.f32.mrf.mxu1 }
 0x219   :  { %7242 = vst [vmem:[#allocation39_spill] sm:$0xff] %v5808_v49  ;;  %v2983_v62 = vmul.f32 %v5808_v49, %v5808_v49 }
 0x21a   :  { %2900 = vmatmul.f32.gmra.mxu0 %v7118_v19  ;;  %2799 = vmatmul.f32.gmra.mxu2 %v7118_v19 }
 0x21b   :  { %2698 = vmatmul.f32.gmra.mxu1 %v7118_v19  ;;  %2597 = vmatmul.f32.gmra.mxu3 %v7118_v19  ;;  %v3119_v33 = vadd.f32 %v2983_v62, %v2982_v43 }
 0x21d   :  { %v5779_v28 = vpop.f32.mrf.mxu2 }
 0x21e   :  { %v5864_v5 = vpop.f32.mrf.mxu3 }
 0x21f   :  { %v5777_v26 = vpop.f32.mrf.mxu0  ;;  %7256 = vst [vmem:[#allocation53_spill] sm:$0xff] %v5864_v5 }
 0x220   :  { %7238 = vst [vmem:[#allocation35_spill] sm:$0xff] %v5777_v26  ;;  %v5820_v56 = vpop.f32.mrf.mxu1 }
 0x221   :  { %7245 = vst [vmem:[#allocation42_spill] sm:$0xff] %v5820_v56  ;;  %v2987_v24 = vmul.f32 %v5820_v56, %v5820_v56 }
 0x222   :  { %2903 = vmatmul.f32.gmra.mxu0 %v7118_v19  ;;  %2802 = vmatmul.f32.gmra.mxu2 %v7118_v19 }
 0x223   :  { %2701 = vmatmul.f32.gmra.mxu1 %v7118_v19  ;;  %2600 = vmatmul.f32.gmra.mxu3 %v7118_v19  ;;  %v3124_v62 = vadd.f32 %v2987_v24, %v2986_v29 }
 0x225   :  { %v5791_v35 = vpop.f32.mrf.mxu2 }
 0x227   :  { %v5789_v34 = vpop.f32.mrf.mxu0 }
 0x228   :  { %7239 = vst [vmem:[#allocation36_spill] sm:$0xff] %v5789_v34  ;;  %v5832_v58 = vpop.f32.mrf.mxu1 }
 0x229   :  { %7248 = vst [vmem:[#allocation45_spill] sm:$0xff] %v5832_v58 }
 0x22a   :  { %2906 = vmatmul.f32.gmra.mxu0 %v7118_v19  ;;  %2805 = vmatmul.f32.gmra.mxu2 %v7118_v19 }
 0x22b   :  { %2704 = vmatmul.f32.gmra.mxu1 %v7118_v19  ;;  %2603 = vmatmul.f32.gmra.mxu3 %v7118_v19 }
 0x22d   :  { %v5803_v46 = vpop.f32.mrf.mxu2 }
 0x22f   :  { %v5801_v40 = vpop.f32.mrf.mxu0 }
 0x230   :  { %v5844_v47 = vpop.f32.mrf.mxu1 }
 0x231   :  { %7251 = vst [vmem:[#allocation48_spill] sm:$0xff] %v5844_v47 }
 0x232   :  { %2909 = vmatmul.f32.gmra.mxu0 %v7118_v19  ;;  %2808 = vmatmul.f32.gmra.mxu2 %v7118_v19 }
 0x233   :  { %2707 = vmatmul.f32.gmra.mxu1 %v7118_v19 }
 0x235   :  { %v5815_v54 = vpop.f32.mrf.mxu2 }
 0x236   :  { %7244 = vst [vmem:[#allocation41_spill] sm:$0xff] %v5815_v54 }
 0x237   :  { %v5813_v2 = vpop.f32.mrf.mxu0 }
 0x238   :  { %v5862_v48 = vpop.f32.mrf.mxu1 }
 0x239   :  { %7255 = vst [vmem:[#allocation52_spill] sm:$0xff] %v5862_v48 }
 0x23a   :  { %2912 = vmatmul.f32.gmra.mxu0 %v7118_v19  ;;  %2811 = vmatmul.f32.gmra.mxu2 %v7118_v19 }
 0x23b   :  { %2710 = vmatmul.f32.gmra.mxu1 %v7118_v19 }
 0x23d   :  { %v5827_v61 = vpop.f32.mrf.mxu2 }
 0x23e   :  { %7247 = vst [vmem:[#allocation44_spill] sm:$0xff] %v5827_v61  ;;  %v2984_v50 = vmul.f32 %v5827_v61, %v5827_v61 }
 0x23f   :  { %v5825_v59 = vpop.f32.mrf.mxu0 }
 0x240   :  { %v3120_v11 = vadd.f32 %v3119_v33, %v2984_v50  ;;  %v5882_v8 = vpop.f32.mrf.mxu1  ;;  %v5884_v33 = vpop.f32.mrf.mxu3  ;;  %v2990_v50 = vmul.f32 %v5834_v51, %v5834_v51 }
 0x241   :  { %7259 = vst [vmem:[#allocation56_spill] sm:$0xff] %v5882_v8 }
 0x242   :  { %2915 = vmatmul.f32.gmra.mxu0 %v7118_v19  ;;  %2814 = vmatmul.f32.gmra.mxu2 %v7118_v19  ;;  %7260 = vst [vmem:[#allocation57_spill] sm:$0xff] %v5884_v33 }
 0x243   :  { %2713 = vmatmul.f32.gmra.mxu1 %v7118_v19 }
 0x245   :  { %v5839_v42 = vpop.f32.mrf.mxu2 }
 0x246   :  { %7250 = vst [vmem:[#allocation47_spill] sm:$0xff] %v5839_v42  ;;  %v2988_v23 = vmul.f32 %v5839_v42, %v5839_v42 }
 0x247   :  { %v5837_v53 = vpop.f32.mrf.mxu0 }
 0x248   :  { %v3125_v56 = vadd.f32 %v3124_v62, %v2988_v23  ;;  %v5902_v42 = vpop.f32.mrf.mxu1  ;;  %v5904_v23 = vpop.f32.mrf.mxu3  ;;  %v2994_v62 = vmul.f32 %v5846_v41, %v5846_v41 }
 0x249   :  { %7263 = vst [vmem:[#allocation60_spill] sm:$0xff] %v5902_v42 }
 0x24a   :  { %2918 = vmatmul.f32.gmra.mxu0 %v7118_v19  ;;  %2817 = vmatmul.f32.gmra.mxu2 %v7118_v19  ;;  %7264 = vst [vmem:[#allocation61_spill] sm:$0xff] %v5904_v23 }
 0x24b   :  { %2716 = vmatmul.f32.gmra.mxu1 %v7118_v19 }
 0x24d   :  { %v5855_v7 = vpop.f32.mrf.mxu2 }
 0x24e   :  { %7254 = vst [vmem:[#allocation51_spill] sm:$0xff] %v5855_v7 }
 0x24f   :  { %v5853_v0 = vpop.f32.mrf.mxu0 }
 0x250   :  { %7253 = vst [vmem:[#allocation50_spill] sm:$0xff] %v5853_v0 }
 0x252   :  { %2921 = vmatmul.f32.gmra.mxu0 %v7118_v19  ;;  %2820 = vmatmul.f32.gmra.mxu2 %v7118_v19 }
 0x255   :  { %v5873_v49 = vpop.f32.mrf.mxu2 }
 0x256   :  { %7258 = vst [vmem:[#allocation55_spill] sm:$0xff] %v5873_v49 }
 0x257   :  { %v5871_v9 = vpop.f32.mrf.mxu0 }
 0x258   :  { %7257 = vst [vmem:[#allocation54_spill] sm:$0xff] %v5871_v9  ;;  %v2985_v43 = vmul.f32 %v5871_v9, %v5871_v9  ;;  %v2991_v9 = vmul.f32 %v5832_v58, %v5832_v58  ;;  %v5922_v58 = vpop.f32.mrf.mxu3 }
 0x259   :  { %7268 = vst [vmem:[#allocation65_spill] sm:$0xff] %v5922_v58 }
 0x25a   :  { %2924 = vmatmul.f32.gmra.mxu0 %v7118_v19  ;;  %v3121_v61 = vadd.f32 %v3120_v11, %v2985_v43  ;;  %2823 = vmatmul.f32.gmra.mxu2 %v7118_v19  ;;  %v3129_v24 = vadd.f32 %v2991_v9, %v2990_v50  ;;  %v2992_v43 = vmul.f32 %v5855_v7, %v5855_v7  ;;  %v5920_v7 = vpop.f32.mrf.mxu1 }
 0x25b   :  { %7267 = vst [vmem:[#allocation64_spill] sm:$0xff] %v5920_v7 }
 0x25c   :  { %3122 = vadd.xlane.f32.xlu1 %v3121_v61  ;;  %v3130_v34 = vadd.f32 %v3129_v24, %v2992_v43  ;;  %v2998_v24 = vmul.f32 %v5864_v5, %v5864_v5  ;;  %v2999_v43 = vmul.f32 %v5862_v48, %v5862_v48 }
 0x25d   :  { %v5893_v29 = vpop.f32.mrf.mxu2 }
 0x25e   :  { %7262 = vst [vmem:[#allocation59_spill] sm:$0xff] %v5893_v29 }
 0x25f   :  { %v5891_v57 = vpop.f32.mrf.mxu0 }
 0x260   :  { %7261 = vst [vmem:[#allocation58_spill] sm:$0xff] %v5891_v57  ;;  %v2989_v11 = vmul.f32 %v5891_v57, %v5891_v57  ;;  %v2995_v57 = vmul.f32 %v5844_v47, %v5844_v47  ;;  %v5940_v7 = vpop.f32.mrf.mxu3 }
 0x261   :  { %7272 = vst [vmem:[#allocation69_spill] sm:$0xff] %v5940_v7 }
 0x262   :  { %2927 = vmatmul.f32.gmra.mxu0 %v7118_v19  ;;  %v3126_v61 = vadd.f32 %v3125_v56, %v2989_v11  ;;  %2826 = vmatmul.f32.gmra.mxu2 %v7118_v19  ;;  %v3134_v50 = vadd.f32 %v2995_v57, %v2994_v62  ;;  %v3139_v62 = vadd.f32 %v2999_v43, %v2998_v24  ;;  %v5938_v58 = vpop.f32.mrf.mxu1  ;;  %v7275_v24 = vmov 0.0  }
 0x263   :  { %7271 = vst [vmem:[#allocation68_spill] sm:$0xff] %v5938_v58 }
 0x264   :  { %3127 = vadd.xlane.f32.xlu2 %v3126_v61  ;;  %v2996_v61 = vmul.f32 %v5873_v49, %v5873_v49 }
 0x265   :  { %v5913_v9 = vpop.f32.mrf.mxu2 }
 0x266   :  { %7266 = vst [vmem:[#allocation63_spill] sm:$0xff] %v5913_v9 }
 0x267   :  { %v5911_v36 = vpop.f32.mrf.mxu0 }
 0x268   :  { %7265 = vst [vmem:[#allocation62_spill] sm:$0xff] %v5911_v36  ;;  %v2993_v56 = vmul.f32 %v5911_v36, %v5911_v36  ;;  %v3135_v36 = vadd.f32 %v3134_v50, %v2996_v61  ;;  %v3002_v50 = vmul.f32 %v5884_v33, %v5884_v33  ;;  %v3003_v61 = vmul.f32 %v5882_v8, %v5882_v8  ;;  %v5957_v7 = vpop.f32.mrf.mxu3 }
 0x269   :  { %7277 = vst [vmem:[#allocation73_spill] sm:$0xff] %v5957_v7 }
 0x26a   :  { %2930 = vmatmul.f32.gmra.mxu0 %v7118_v19  ;;  %v3131_v11 = vadd.f32 %v3130_v34, %v2993_v56  ;;  %2829 = vmatmul.f32.gmra.mxu2 %v7118_v19  ;;  %v3144_v43 = vadd.f32 %v3003_v61, %v3002_v50  ;;  %v5955_v58 = vpop.f32.mrf.mxu1 }
 0x26b   :  { %7276 = vst [vmem:[#allocation72_spill] sm:$0xff] %v5955_v58 }
 0x26c   :  { %3132 = vadd.xlane.f32.xlu0 %v3131_v11  ;;  %v3000_v11 = vmul.f32 %v5893_v29, %v5893_v29 }
 0x26d   :  { %v5931_v34 = vpop.f32.mrf.mxu2 }
 0x26e   :  { %7270 = vst [vmem:[#allocation67_spill] sm:$0xff] %v5931_v34  ;;  %v3140_v49 = vadd.f32 %v3139_v62, %v3000_v11  ;;  %v3006_v62 = vmul.f32 %v5904_v23, %v5904_v23  ;;  %v3007_v11 = vmul.f32 %v5902_v42, %v5902_v42 }
 0x26f   :  { %v5929_v51 = vpop.f32.mrf.mxu0 }
 0x270   :  { %7269 = vst [vmem:[#allocation66_spill] sm:$0xff] %v5929_v51  ;;  %v2997_v57 = vmul.f32 %v5929_v51, %v5929_v51  ;;  %v3149_v50 = vadd.f32 %v3007_v11, %v3006_v62  ;;  %v5974_v58 = vpop.f32.mrf.mxu3  ;;  %v2980_v62 = vmul.f32 %v5815_v54, %v5815_v54 }
 0x271   :  { %7281 = vst [vmem:[#allocation77_spill] sm:$0xff] %v5974_v58 }
 0x272   :  { %2933 = vmatmul.f32.gmra.mxu0 %v7118_v19  ;;  %v3136_v56 = vadd.f32 %v3135_v36, %v2997_v57 }
 0x274   :  { %3137 = vadd.xlane.f32.xlu2 %v3136_v56  ;;  %v3004_v56 = vmul.f32 %v5913_v9, %v5913_v9 }
 0x275   :  { %v5948_v19 = vpop.f32.mrf.mxu2 }
 0x276   :  { %7274 = vst [vmem:[#allocation71_spill] sm:$0xff] %v5948_v19  ;;  %v3145_v19 = vadd.f32 %v3144_v43, %v3004_v56  ;;  %v2978_v43 = vmul.f32 %v5798_v39, %v5798_v39  ;;  %v2979_v56 = vmul.f32 %v5796_v38, %v5796_v38 }
 0x277   :  { %v5946_v51 = vpop.f32.mrf.mxu0 }
 0x278   :  { %7273 = vst [vmem:[#allocation70_spill] sm:$0xff] %v5946_v51  ;;  %v3001_v36 = vmul.f32 %v5946_v51, %v5946_v51 }
 0x27a   :  { %2936 = vmatmul.f32.gmra.mxu0 %v7275_v24  ;;  %v3141_v57 = vadd.f32 %v3140_v49, %v3001_v36  ;;  %v3008_v36 = vmul.f32 %v5931_v34, %v5931_v34 }
 0x27c   :  { %3142 = vadd.xlane.f32.xlu1 %v3141_v57  ;;  %v5972_v57 = vpop.f32.mrf.mxu1 }
 0x27d   :  { %v5965_v41 = vpop.f32.mrf.mxu2  ;;  %7280 = vst [vmem:[#allocation76_spill] sm:$0xff] %v5972_v57 }
 0x27e   :  { %7279 = vst [vmem:[#allocation75_spill] sm:$0xff] %v5965_v41  ;;  %v3150_v41 = vadd.f32 %v3149_v50, %v3008_v36  ;;  %v2981_v50 = vmul.f32 %v5853_v0, %v5853_v0 }
 0x27f   :  { %v5963_v47 = vpop.f32.mrf.mxu0 }
 0x280   :  { %7278 = vst [vmem:[#allocation74_spill] sm:$0xff] %v5963_v47  ;;  %v3005_v49 = vmul.f32 %v5963_v47, %v5963_v47 }
 0x282   :  { %2939 = vmatmul.f32.gmra.mxu0 %v7275_v24  ;;  %v3146_v61 = vadd.f32 %v3145_v19, %v3005_v49  ;;  %v3114_v49 = vadd.f32 %v2979_v56, %v2978_v43 }
 0x284   :  { %3147 = vadd.xlane.f32.xlu0 %v3146_v61  ;;  %v5989_v61 = vpop.f32.mrf.mxu3  ;;  %v5991_v39 = vpop.f32.mrf.mxu1  ;;  %v3115_v36 = vadd.f32 %v3114_v49, %v2980_v62 }
 0x285   :  { %v5982_v45 = vpop.f32.mrf.mxu2  ;;  %7284 = vst [vmem:[#allocation80_spill] sm:$0xff] %v5989_v61 }
 0x286   :  { %7283 = vst [vmem:[#allocation79_spill] sm:$0xff] %v5982_v45  ;;  %v3116_v51 = vadd.f32 %v3115_v36, %v2981_v50 }
 0x287   :  { %v5980_v7 = vpop.f32.mrf.mxu0  ;;  %7285 = vst [vmem:[#allocation81_spill] sm:$0xff] %v5991_v39 }
 0x288   :  { %7282 = vst [vmem:[#allocation78_spill] sm:$0xff] %v5980_v7  ;;  %v3009_v19 = vmul.f32 %v5980_v7, %v5980_v7 }
 0x28a   :  { %2942 = vmatmul.f32.gmra.mxu0 %v7275_v24  ;;  %v3151_v11 = vadd.f32 %v3150_v41, %v3009_v19 }
 0x28c   :  { %3152 = vadd.xlane.f32.xlu0 %v3151_v11  ;;  %v5999_v54 = vpop.f32.mrf.mxu3  ;;  %v6001_v24 = vpop.f32.mrf.mxu1 }
 0x28d   :  { %v5997_v45 = vpop.f32.mrf.mxu2  ;;  %7288 = vst [vmem:[#allocation84_spill] sm:$0xff] %v5999_v54  ;;  %v718_v54 = vadd.f32 %v5549_v6, %v5575_v63  ;;  %v7327_v63 = vperm.slane %v5599_v1, 0 }
 0x28e   :  { %7287 = vst [vmem:[#allocation83_spill] sm:$0xff] %v5997_v45 }
 0x28f   :  { %v5995_v38 = vpop.f32.mrf.mxu0  ;;  %7289 = vst [vmem:[#allocation85_spill] sm:$0xff] %v6001_v24  ;;  %v746_v24 = vadd.f32 %v5551_v21, %v5567_v27 }
 0x290   :  { %7286 = vst [vmem:[#allocation82_spill] sm:$0xff] %v5995_v38 }
 0x294   :  { %3117 = vadd.xlane.f32.xlu0 %v3116_v51  ;;  %v6011_v11 = vpop.f32.mrf.mxu3  ;;  %v6013_v62 = vpop.f32.mrf.mxu1 }
 0x295   :  { %v6005_v43 = vpop.f32.mrf.mxu2  ;;  %7294 = vst [vmem:[#allocation90_spill] sm:$0xff] %v6011_v11 }
 0x296   :  { %7291 = vst [vmem:[#allocation87_spill] sm:$0xff] %v6005_v43 }
 0x297   :  { %v6003_v41 = vpop.f32.mrf.mxu0  ;;  %7295 = vst [vmem:[#allocation91_spill] sm:$0xff] %v6013_v62 }
 0x298   :  { %7290 = vst [vmem:[#allocation86_spill] sm:$0xff] %v6003_v41 }
 0x29c   :  { %v6019_v51 = vpop.f32.mrf.mxu3  ;;  %v6021_v36 = vpop.f32.mrf.mxu1 }
 0x29d   :  { %v6009_v19 = vpop.f32.mrf.mxu2  ;;  %7298 = vst [vmem:[#allocation94_spill] sm:$0xff] %v6019_v51 }
 0x29e   :  { %7293 = vst [vmem:[#allocation89_spill] sm:$0xff] %v6009_v19 }
 0x29f   :  { %v6007_v56 = vpop.f32.mrf.mxu0  ;;  %7299 = vst [vmem:[#allocation95_spill] sm:$0xff] %v6021_v36 }
 0x2a0   :  { %7292 = vst [vmem:[#allocation88_spill] sm:$0xff] %v6007_v56 }
 0x2a4   :  { %v6027_v0 = vpop.f32.mrf.mxu3  ;;  %v6029_v56 = vpop.f32.mrf.mxu1 }
 0x2a5   :  { %v6017_v50 = vpop.f32.mrf.mxu2  ;;  %7302 = vst [vmem:[#allocation98_spill] sm:$0xff] %v6027_v0 }
 0x2a6   :  { %7297 = vst [vmem:[#allocation93_spill] sm:$0xff] %v6017_v50 }
 0x2a7   :  { %v6015_v49 = vpop.f32.mrf.mxu0  ;;  %7303 = vst [vmem:[#allocation99_spill] sm:$0xff] %v6029_v56 }
 0x2a8   :  { %7296 = vst [vmem:[#allocation92_spill] sm:$0xff] %v6015_v49 }
 0x2ac   :  { %v6035_v61 = vpop.f32.mrf.mxu3  ;;  %v6039_v48 = vpop.f32.mrf.mxu1 }
 0x2ad   :  { %v6025_v41 = vpop.f32.mrf.mxu2  ;;  %7306 = vst [vmem:[#allocation102_spill] sm:$0xff] %v6035_v61 }
 0x2ae   :  { %7301 = vst [vmem:[#allocation97_spill] sm:$0xff] %v6025_v41 }
 0x2af   :  { %v6023_v38 = vpop.f32.mrf.mxu0  ;;  %7308 = vst [vmem:[#allocation104_spill] sm:$0xff] %v6039_v48 }
 0x2b0   :  { %7300 = vst [vmem:[#allocation96_spill] sm:$0xff] %v6023_v38 }
 0x2b4   :  { %v6045_v38 = vpop.f32.mrf.mxu3  ;;  %v6047_v41 = vpop.f32.mrf.mxu1 }
 0x2b5   :  { %v6033_v39 = vpop.f32.mrf.mxu2  ;;  %7311 = vst [vmem:[#allocation107_spill] sm:$0xff] %v6045_v38 }
 0x2b6   :  { %7305 = vst [vmem:[#allocation101_spill] sm:$0xff] %v6033_v39 }
 0x2b7   :  { %v6031_v43 = vpop.f32.mrf.mxu0  ;;  %7312 = vst [vmem:[#allocation108_spill] sm:$0xff] %v6047_v41 }
 0x2b8   :  { %7304 = vst [vmem:[#allocation100_spill] sm:$0xff] %v6031_v43 }
 0x2bc   :  { %v6053_v43 = vpop.f32.mrf.mxu3  ;;  %v6055_v8 = vpop.f32.mrf.mxu1 }
 0x2bd   :  { %v6041_v5 = vpop.f32.mrf.mxu2  ;;  %7314 = vst [vmem:[#allocation110_spill] sm:$0xff] %v6053_v43  ;;  %v3055_v7 = vmul.f32 %v6055_v8, %v6055_v8 }
 0x2be   :  { %7309 = vst [vmem:[#allocation105_spill] sm:$0xff] %v6041_v5 }
 0x2bf   :  { %v6037_v29 = vpop.f32.mrf.mxu0  ;;  %7315 = vst [vmem:[#allocation111_spill] sm:$0xff] %v6055_v8 }
 0x2c0   :  { %7307 = vst [vmem:[#allocation103_spill] sm:$0xff] %v6037_v29 }
 0x2c4   :  { %v6061_v51 = vpop.f32.mrf.mxu3  ;;  %v6063_v49 = vpop.f32.mrf.mxu1 }
 0x2c5   :  { %v6049_v47 = vpop.f32.mrf.mxu2  ;;  %7318 = vst [vmem:[#allocation114_spill] sm:$0xff] %v6061_v51  ;;  %v3059_v8 = vmul.f32 %v6063_v49, %v6063_v49 }
 0x2c6   :  { %7319 = vst [vmem:[#allocation115_spill] sm:$0xff] %v6063_v49  ;;  %v6099_v49 = vadd.f32 %v7327_v63, %v718_v54  ;;  %v2954_v54 = vmul.f32 %v5730_v13, %v5730_v13 }
 0x2c7   :  { %v6043_v19 = vpop.f32.mrf.mxu0 }
 0x2c8   :  { %7310 = vst [vmem:[#allocation106_spill] sm:$0xff] %v6043_v19  ;;  %v3054_v19 = vmul.f32 %v6053_v43, %v6053_v43  ;;  %v3058_v43 = vmul.f32 %v6061_v51, %v6061_v51 }
 0x2c9   :  { %7328 = vst [vmem:[#allocation122_spill] sm:$0xff] %v6099_v49 }
 0x2ca   :  { %v3209_v23 = vadd.f32 %v3055_v7, %v3054_v19  ;;  %v7323_v7 = vperm.slane %v5599_v1, 1 }
 0x2cc   :  { %v6087_v19 = vadd.f32 %v7323_v7, %v746_v24  ;;  %v6093_v27 = vpop.f32.mrf.mxu1 }
 0x2cd   :  { %v6057_v33 = vpop.f32.mrf.mxu2  ;;  %7326 = vst [vmem:[#allocation121_spill] sm:$0xff] %v6093_v27 }
 0x2ce   :  { %7316 = vst [vmem:[#allocation112_spill] sm:$0xff] %v6057_v33 }
 0x2cf   :  { %v6051_v9 = vpop.f32.mrf.mxu0  ;;  %7324 = vst [vmem:[#allocation119_spill] sm:$0xff] %v6087_v19 }
 0x2d0   :  { %7313 = vst [vmem:[#allocation109_spill] sm:$0xff] %v6051_v9  ;;  %v3056_v9 = vmul.f32 %v6057_v33, %v6057_v33  ;;  %v774_v33 = vadd.f32 %v5569_v31, %v5562_v15  ;;  %v3715_v15 = vmul.f32 %v6087_v19, %v6087_v19  ;;  %v7330_v31 = vperm.slane %v5599_v1, 2 }
 0x2d2   :  { %v3210_v45 = vadd.f32 %v3209_v23, %v3056_v9  ;;  %v3214_v23 = vadd.f32 %v3059_v8, %v3058_v43  ;;  %v6109_v51 = vadd.f32 %v7330_v31, %v774_v33  ;;  %v2955_v8 = vmul.f32 %v5728_v12, %v5728_v12 }
 0x2d3   :  { %v3714_v43 = vmul.f32 %v6099_v49, %v6099_v49  ;;  %v3047_v33 = vmul.f32 %v6039_v48, %v6039_v48  ;;  %v7332_v31 = vperm.slane %v5599_v1, 3  ;;  %v2950_v48 = vmul.f32 %v5720_v10, %v5720_v10 }
 0x2d4   :  { %7331 = vst [vmem:[#allocation124_spill] sm:$0xff] %v6109_v51 }
 0x2d5   :  { %v6071_v42 = vpop.f32.mrf.mxu2  ;;  %v3718_v49 = vadd.f32 %v3715_v15, %v3714_v43  ;;  %v3048_v15 = vmul.f32 %v6041_v5, %v6041_v5  ;;  %v6169_v5 = vmul.f32 %v5733_v14, %v5733_v14 }
 0x2d6   :  { %7321 = vst [vmem:[#allocation117_spill] sm:$0xff] %v6071_v42  ;;  %v3060_v24 = vmul.f32 %v6071_v42, %v6071_v42 }
 0x2d7   :  { %v6059_v36 = vpop.f32.mrf.mxu0 }
 0x2d8   :  { %7317 = vst [vmem:[#allocation113_spill] sm:$0xff] %v6059_v36  ;;  %v3215_v63 = vadd.f32 %v3214_v23, %v3060_v24  ;;  %v2956_v23 = vmul.f32 %v5743_v18, %v5743_v18  ;;  %v2963_v24 = vmul.f32 %v5748_v20, %v5748_v20  ;;  %v2959_v18 = vmul.f32 %v5738_v16, %v5738_v16 }
 0x2dd   :  { %v6103_v7 = vpop.f32.mrf.mxu2 }
 0x2de   :  { %7329 = vst [vmem:[#allocation123_spill] sm:$0xff] %v6103_v7 }
 0x2df   :  { %v6069_v34 = vpop.f32.mrf.mxu0 }
 0x2e0   :  { %7320 = vst [vmem:[#allocation116_spill] sm:$0xff] %v6069_v34  ;;  %v6083_v34 = vpop.f32.mrf.mxu3 }
 0x2e1   :  { %7322 = vst [vmem:[#allocation118_spill] sm:$0xff] %v6083_v34 }
 0x2e7   :  { %v6091_v21 = vpop.f32.mrf.mxu0 }
 0x2e8   :  { %7325 = vst [vmem:[#allocation120_spill] sm:$0xff] %v6091_v21  ;;  %v3057_v6 = vmul.f32 %v6091_v21, %v6091_v21  ;;  %v802_v21 = vadd.f32 %v5581_v37, %v5586_v44  ;;  %v3062_v37 = vmul.f32 %v6083_v34, %v6083_v34  ;;  %v3063_v44 = vmul.f32 %v6093_v27, %v6093_v27  ;;  %v6143_v27 = vpop.xlane.xlu2 %3127  ;;  %v6153_v43 = vpop.f32.mrf.mxu3 }
 0x2e9   :  { %v2951_v34 = vmul.f32 %v5718_v3, %v5718_v3  ;;  %7335 = vst [vmem:[#allocation127_spill] sm:$0xff] %v6153_v43  ;;  %v2962_v3 = vmul.f32 %v5750_v60, %v5750_v60  ;;  %v3066_v12 = vmul.f32 %v6153_v43, %v6153_v43 }
 0x2ea   :  { %v3211_v9 = vadd.f32 %v3210_v45, %v3057_v6  ;;  %v6117_v45 = vpop.xlane.xlu1 %3122  ;;  %v3046_v6 = vmul.f32 %v6035_v61, %v6035_v61  ;;  %v6131_v42 = vadd.f32 %v7332_v31, %v802_v21  ;;  %v3716_v61 = vmul.f32 %v6109_v51, %v6109_v51  ;;  %v6155_v51 = vpop.f32.mrf.mxu1 }
 0x2eb   :  { %v3084_v21 = vadd.f32 %v2955_v8, %v2954_v54  ;;  %7336 = vst [vmem:[#allocation128_spill] sm:$0xff] %v6155_v51  ;;  %v3219_v10 = vadd.f32 %v3063_v44, %v3062_v37  ;;  %v3064_v54 = vmul.f32 %v6103_v7, %v6103_v7  ;;  %v2966_v8 = vmul.f32 %v5762_v25, %v5762_v25  ;;  %v6173_v44 = vpop.f32.mrf.mxu2 }
 0x2ec   :  { %3212 = vadd.xlane.f32.xlu2 %v3211_v9  ;;  %7333 = vst [vmem:[#allocation125_spill] sm:$0xff] %v6131_v42  ;;  %v6133_v9 = vpop.xlane.xlu0 %3132  ;;  %v3199_v31 = vadd.f32 %v3047_v33, %v3046_v6  ;;  %v2967_v6 = vmul.f32 %v5760_v52, %v5760_v52  ;;  %v6165_v33 = vadd.f32 %v3718_v49, %v3716_v61 }
 0x2ed   :  { %7337 = vst [vmem:[#allocation129_spill] sm:$0xff] %v6173_v44  ;;  %v2958_v61 = vmul.f32 %v5740_v17, %v5740_v17  ;;  %v3049_v49 = vmul.f32 %v6059_v36, %v6059_v36  ;;  %v3085_v14 = vadd.f32 %v3084_v21, %v2956_v23  ;;  %v3220_v13 = vadd.f32 %v3219_v10, %v3064_v54 }
 0x2ee   :  { %v3200_v7 = vadd.f32 %v3199_v31, %v3048_v15  ;;  %v3094_v16 = vadd.f32 %v2963_v24, %v2962_v3  ;;  %v3099_v21 = vadd.f32 %v2967_v6, %v2966_v8  ;;  %v2970_v23 = vmul.f32 %v5774_v4, %v5774_v4 }
 0x2ef   :  { %v6135_v19 = vpop.f32.mrf.mxu0  ;;  %v2971_v15 = vmul.f32 %v5772_v55, %v5772_v55  ;;  %v2974_v54 = vmul.f32 %v5786_v32, %v5786_v32  ;;  %v2957_v8 = vmul.f32 %v5777_v26, %v5777_v26  ;;  %v3068_v43 = vmul.f32 %v6173_v44, %v6173_v44 }
 0x2f0   :  { %7334 = vst [vmem:[#allocation126_spill] sm:$0xff] %v6135_v19  ;;  %v3061_v1 = vmul.f32 %v6135_v19, %v6135_v19  ;;  %v3138_v10 = vpop.xlane.xlu2 %3137  ;;  %v3201_v36 = vadd.f32 %v3200_v7, %v3049_v49  ;;  %v6221_v7 = vadd.f32 %v2959_v18, %v2958_v61  ;;  %v3034_v49 = vmul.f32 %v6011_v11, %v6011_v11 }
 0x2f1   :  { %v6260_v11 = vadd.f32 1e-24, %v6143_v27 }
 0x2f2   :  { %v3216_v19 = vadd.f32 %v3215_v63, %v3061_v1  ;;  %v3143_v37 = vpop.xlane.xlu1 %3142  ;;  %v6177_v63 = vmul.f32 %v6131_v42, %v6131_v42  ;;  %v6179_v1 = vadd.f32 %v2951_v34, %v2950_v48  ;;  %v2964_v48 = vmul.f32 %v5767_v22, %v5767_v22  ;;  %v6219_v22 = vpop.f32.mrf.mxu1 }
 0x2f3   :  { %v2968_v34 = vmul.f32 %v5779_v28, %v5779_v28  ;;  %v6193_v42 = vadd.f32 1e-24, %v3143_v37  ;;  %v2975_v37 = vmul.f32 %v5784_v30, %v5784_v30  ;;  %7340 = vst [vmem:[#allocation132_spill] sm:$0xff] %v6219_v22  ;;  %v3071_v61 = vmul.f32 %v6219_v22, %v6219_v22 }
 0x2f4   :  { %3217 = vadd.xlane.f32.xlu0 %v3216_v19  ;;  %v3067_v19 = vmul.f32 %v6155_v51, %v6155_v51  ;;  %v3043_v22 = vmul.f32 %v6029_v56, %v6029_v56 }
 0x2f5   :  { %v3100_v20 = vadd.f32 %v3099_v21, %v2968_v34  ;;  %v3104_v34 = vadd.f32 %v2971_v15, %v2970_v23  ;;  %vm3402_vm6 = vweird.f32 %v6193_v42 }
 0x2f6   :  { %v3224_v6 = vadd.f32 %v3067_v19, %v3066_v12  ;;  %v3035_v12 = vmul.f32 %v6013_v62, %v6013_v62  ;;  %v6230_v19 = vadd.f32 1e-24, %v6133_v9  ;;  %v6238_v62 = vpop.f32.mrf.mxu2  ;;  %v2976_v9 = vmul.f32 %v5803_v46, %v5803_v46 }
 0x2f7   :  { %v6195_v17 = vpop.f32.mrf.mxu0  ;;  %v3148_v31 = vpop.xlane.xlu0 %3147  ;;  %7341 = vst [vmem:[#allocation133_spill] sm:$0xff] %v6238_v62 }
 0x2f8   :  { %7338 = vst [vmem:[#allocation130_spill] sm:$0xff] %v6195_v17  ;;  %v3065_v3 = vmul.f32 %v6195_v17, %v6195_v17  ;;  %v6203_v24 = vadd.f32 1e-24, %v3148_v31  ;;  %v6214_v17 = vadd.f32 1e-24, %v3138_v10  ;;  %v6217_v31 = vpop.f32.mrf.mxu3  ;;  %v6232_v10 = vadd.f32 %v3085_v14, %v2957_v8 }
 0x2f9   :  { %7339 = vst [vmem:[#allocation131_spill] sm:$0xff] %v6217_v31  ;;  %v3070_v18 = vmul.f32 %v6217_v31, %v6217_v31  ;;  %v3225_v21 = vadd.f32 %v3224_v6, %v3068_v43  ;;  %v3184_v43 = vadd.f32 %v3035_v12, %v3034_v49  ;;  %v3036_v6 = vmul.f32 %v6017_v50, %v6017_v50  ;;  %v7344_v31 = vld [vmem:[#allocation83_spill] sm:$0xff] }
 0x2fa   :  { %5189 = vrsqrt.f32 %v6203_v24  ;;  %v3221_v51 = vadd.f32 %v3220_v13, %v3065_v3  ;;  %v2969_v13 = vmul.f32 %v5813_v2, %v5813_v2  ;;  %v3095_v3 = vadd.f32 %v3094_v16, %v2964_v48 }
 0x2fb   :  { %5191 = vrsqrt.f32 %v6193_v42  ;;  %v2965_v48 = vmul.f32 %v5801_v40, %v5801_v40  ;;  %v3229_v49 = vadd.f32 %v3071_v61, %v3070_v18  ;;  %vm3412_vm3 = vweird.f32 %v6203_v24 }
 0x2fc   :  { %3202 = vadd.xlane.f32.xlu0 %v3201_v36  ;;  %3222 = vadd.xlane.f32.xlu1 %v3221_v51  ;;  %v3109_v51 = vadd.f32 %v2975_v37, %v2974_v54  ;;  %v2972_v36 = vmul.f32 %v5791_v35, %v5791_v35  ;;  %5193 = vrsqrt.f32 %v6214_v17  ;;  %v3101_v37 = vadd.f32 %v3100_v20, %v2969_v13 }
 0x2fd   :  { %5195 = vrsqrt.f32 %v6230_v19  ;;  %v3072_v20 = vmul.f32 %v6238_v62, %v6238_v62  ;;  %v2977_v13 = vmul.f32 %v5837_v53, %v5837_v53  ;;  %v6270_v50 = vadd.f32 %v3095_v3, %v2965_v48 }
 0x2fe   :  { %v3105_v27 = vadd.f32 %v3104_v34, %v2972_v36  ;;  %v3050_v3 = vmul.f32 %v6045_v38, %v6045_v38  ;;  %v3037_v36 = vmul.f32 %v6037_v29, %v6037_v29  ;;  %vm3392_vm9 = vweird.f32 %v6214_v17 }
 0x2ff   :  { %v6245_v14 = vpop.f32.mrf.mxu0  ;;  %v3153_v16 = vpop.xlane.xlu0 %3152  ;;  %v3230_v48 = vadd.f32 %v3229_v49, %v3072_v20  ;;  %vm3382_vm12 = vweird.f32 %v6230_v19 }
 0x300   :  { %7342 = vst [vmem:[#allocation134_spill] sm:$0xff] %v6245_v14  ;;  %v6249_v23 = vpop.eup %5189  ;;  %v3069_v15 = vmul.f32 %v6245_v14, %v6245_v14  ;;  %v6253_v54 = vadd.f32 1e-24, %v3153_v16  ;;  %v3110_v16 = vadd.f32 %v3109_v51, %v2976_v9  ;;  %v3042_v14 = vmul.f32 %v6027_v0, %v6027_v0 }
 0x301   :  { %v6255_v8 = vpop.eup %5191  ;;  %v3407_v44 = vmul.f32 %v6249_v23, %v6203_v24  ;;  %v3185_v51 = vadd.f32 %v3184_v43, %v3036_v6  ;;  %v3051_v9 = vmul.f32 %v6047_v41, %v6047_v41  ;;  %v2973_v43 = vmul.f32 %v5825_v59, %v5825_v59 }
 0x302   :  { %5197 = vrsqrt.f32 %v6253_v54  ;;  %v3226_v12 = vadd.f32 %v3225_v21, %v3069_v15  ;;  %v3397_v18 = vmul.f32 %v6255_v8, %v6193_v42  ;;  %v6278_v61 = vpop.eup %5193  ;;  %v6281_v21 = vadd.f32 1e-24, %v6117_v45 }
 0x303   :  { %v3408_v34 = vmul.f32 %v6249_v23, %v3407_v44  ;;  %5199 = vrsqrt.f32 %v6260_v11  ;;  %v6291_v15 = vpop.eup %5195  ;;  %v3022_v45 = vmul.f32 %v5974_v58, %v5974_v58  ;;  %v3111_v44 = vadd.f32 %v3110_v16, %v2977_v13 }
 0x304   :  { %3102 = vadd.xlane.f32.xlu0 %v3101_v37  ;;  %3227 = vadd.xlane.f32.xlu2 %v3226_v12  ;;  %v3023_v37 = vmul.f32 %v5972_v57, %v5972_v57  ;;  %v3194_v29 = vadd.f32 %v3043_v22, %v3042_v14  ;;  %v3387_v56 = vmul.f32 %v6278_v61, %v6214_v17  ;;  %5201 = vrsqrt.f32 %v6281_v21  ;;  %v7364_v17 = vld [vmem:[#allocation59_spill] sm:$0xff] }
 0x305   :  { %v3398_v49 = vmul.f32 %v6255_v8, %v3397_v18  ;;  %v3044_v58 = vmul.f32 %v6033_v39, %v6033_v39  ;;  %v3409_v57 = vmul.f32 0.5, %v3408_v34  ;;  %v3204_v0 = vadd.f32 %v3051_v9, %v3050_v3 }
 0x306   :  { %v3052_v22 = vmul.f32 %v6049_v47, %v6049_v47  ;;  %v3186_v14 = vadd.f32 %v3185_v51, %v3037_v36  ;;  %v3169_v38 = vadd.f32 %v3023_v37, %v3022_v45  ;;  %v3377_v18 = vmul.f32 %v6291_v15, %v6230_v19  ;;  %v7345_v51 = vld [vmem:[#allocation84_spill] sm:$0xff] }
 0x307   :  { %v6297_v12 = vpop.f32.mrf.mxu0  ;;  %v3118_v16 = vpop.xlane.xlu0 %3117  ;;  %v6314_v62 = vadd.f32 %v3105_v27, %v2973_v43  ;;  %v3024_v34 = vmul.f32 %v7344_v31, %v7344_v31  ;;  %v3388_v26 = vmul.f32 %v6278_v61, %v3387_v56  ;;  %v3399_v3 = vmul.f32 0.5, %v3398_v49  ;;  %v7347_v43 = vld [vmem:[#allocation109_spill] sm:$0xff] }
 0x308   :  { %7343 = vst [vmem:[#allocation135_spill] sm:$0xff] %v6297_v12  ;;  %v5198_v6 = vpop.eup %5197  ;;  %v3073_v20 = vmul.f32 %v6297_v12, %v6297_v12  ;;  %v6321_v9 = vadd.f32 1e-24, %v3118_v16  ;;  %v3030_v36 = vmul.f32 %v7345_v51, %v7345_v51  ;;  %v3410_v27 = vsub.f32 1.5, %v3409_v57 }
 0x309   :  { %v3417_v13 = vmul.f32 %v5198_v6, %v6253_v54  ;;  %v6316_v39 = vpop.eup %5199  ;;  %v3195_v49 = vadd.f32 %v3194_v29, %v3044_v58  ;;  %v3205_v16 = vadd.f32 %v3204_v0, %v3052_v22  ;;  %vm3423_vm15 = vweird.f32 %v5198_v6 }
 0x30a   :  { %v3231_v41 = vadd.f32 %v3230_v48, %v3073_v20  ;;  %v7346_v48 = vld [vmem:[#allocation85_spill] sm:$0xff]  ;;  %v3045_v20 = vmul.f32 %v7347_v43, %v7347_v43  ;;  %v6331_v31 = vpop.eup %5201  ;;  %v3389_v57 = vmul.f32 0.5, %v3388_v26  ;;  %5203 = vrsqrt.f32 %v6321_v9 }
 0x30b   :  { %v3418_v12 = vmul.f32 %v5198_v6, %v3417_v13  ;;  %v3031_v45 = vmul.f32 %v7346_v48, %v7346_v48  ;;  %v7348_v13 = vld [vmem:[#allocation116_spill] sm:$0xff]  ;;  %v3411_v48 = vmul.f32 %v6249_v23, %v3410_v27  ;;  %vm3413_vm0 = vweird.f32 %v6249_v23  ;;  %v7351_v27 = vld [vmem:[#allocation67_spill] sm:$0xff] }
 0x30c   :  { %3187 = vadd.xlane.f32.xlu0 %v3186_v14  ;;  %3112 = vadd.xlane.f32.xlu2 %v3111_v44  ;;  %v3053_v56 = vmul.f32 %v7348_v13, %v7348_v13  ;;  %v3367_v44 = vmul.f32 %v6316_v39, %v6260_v11  ;;  %v3378_v14 = vmul.f32 %v6291_v15, %v3377_v18  ;;  %vm3422_vm1 = vweird.f32 %v6253_v54  ;;  %vm3414_vm4 = vmor %vm3412_vm3, %vm3413_vm0  ;;  %v7349_v54 = vld [vmem:[#allocation61_spill] sm:$0xff] }
 0x30d   :  { %v3419_v37 = vmul.f32 0.5, %v3418_v12  ;;  %3232 = vadd.xlane.f32.xlu1 %v3231_v41  ;;  %v3400_v12 = vsub.f32 1.5, %v3399_v3  ;;  %v3170_v41 = vadd.f32 %v3169_v38, %v3024_v34  ;;  %v6340_v0 = vadd.f32 %v3031_v45, %v3030_v36  ;;  %vm3424_vm2 = vmor %vm3422_vm1, %vm3423_vm15  ;;  %v7350_v36 = vld [vmem:[#allocation60_spill] sm:$0xff] }
 0x30e   :  { %v3357_v29 = vmul.f32 %v6331_v31, %v6281_v21  ;;  %v3196_v22 = vadd.f32 %v3195_v49, %v3045_v20  ;;  %v3206_v18 = vadd.f32 %v3205_v16, %v3053_v56  ;;  %v3368_v26 = vmul.f32 %v6316_v39, %v3367_v44  ;;  %v7352_v56 = vld [vmem:[#allocation78_spill] sm:$0xff]  ;;  %v7353_v16 = vld [vmem:[#allocation92_spill] sm:$0xff] }
 0x30f   :  { %v3420_v51 = vsub.f32 1.5, %v3419_v37  ;;  %v3379_v3 = vmul.f32 0.5, %v3378_v14  ;;  %v3390_v34 = vsub.f32 1.5, %v3389_v57  ;;  %v3401_v20 = vmul.f32 %v6255_v8, %v3400_v12  ;;  %v7354_v44 = vld [vmem:[#allocation94_spill] sm:$0xff]  ;;  %v7355_v57 = vld [vmem:[#allocation95_spill] sm:$0xff] }
 0x310   :  { %vm3403_vm5 = vweird.f32 %v6255_v8  ;;  %v3415_v24 = vsel %vm3414_vm4, %v6249_v23, %v3411_v48  ;;  %v3038_v14 = vmul.f32 %v7354_v44, %v7354_v44  ;;  %v3358_v12 = vmul.f32 %v6331_v31, %v3357_v29  ;;  %v7356_v48 = vld [vmem:[#allocation57_spill] sm:$0xff] }
 0x311   :  { %v3421_v58 = vmul.f32 %v5198_v6, %v3420_v51  ;;  %v3391_v23 = vmul.f32 %v6278_v61, %v3390_v34  ;;  %vm3393_vm7 = vweird.f32 %v6278_v61  ;;  %vm3404_vm8 = vmor %vm3402_vm6, %vm3403_vm5  ;;  %vm3383_vm10 = vweird.f32 %v6291_v15 }
 0x312   :  { %vm3394_vm11 = vmor %vm3392_vm9, %vm3393_vm7  ;;  %vm3373_vm13 = vweird.f32 %v6316_v39  ;;  %vm3372_vm15 = vweird.f32 %v6260_v11  ;;  %vm3363_vm0 = vweird.f32 %v6331_v31  ;;  %v7374_v11 = vld [vmem:[#allocation45_spill] sm:$0xff]  ;;  %vm3352_vm5 = vweird.f32 %v6321_v9 }
 0x313   :  { %v3425_v38 = vsel %vm3424_vm2, %v5198_v6, %v3421_v58  ;;  %v6354_v6 = vpop.eup %5203  ;;  %v3039_v58 = vmul.f32 %v7355_v57, %v7355_v57  ;;  %vm3384_vm14 = vmor %vm3382_vm12, %vm3383_vm10  ;;  %vm3362_vm2 = vweird.f32 %v6281_v21  ;;  %v7383_v21 = vld [vmem:[#allocation43_spill] sm:$0xff] }
 0x314   :  { %3087 = vadd.xlane.f32.xlu0 %v6232_v10  ;;  %3197 = vadd.xlane.f32.xlu2 %v3196_v22  ;;  %v3646_v51 = vmul.f32 %v3425_v38, %v7349_v54  ;;  %v3647_v45 = vmul.f32 %v3425_v38, %v7350_v36  ;;  %v3648_v37 = vmul.f32 %v3425_v38, %v7351_v27  ;;  %v3369_v22 = vmul.f32 0.5, %v3368_v26  ;;  %v7357_v54 = vld [vmem:[#allocation56_spill] sm:$0xff]  ;;  %v7358_v26 = vld [vmem:[#allocation63_spill] sm:$0xff]  ;;  %v7359_v36 = vld [vmem:[#allocation74_spill] sm:$0xff] }
 0x315   :  { %3207 = vadd.xlane.f32.xlu1 %v3206_v18  ;;  %v3649_v49 = vmul.f32 %v3425_v38, %v7352_v56  ;;  %v3025_v10 = vmul.f32 %v7353_v16, %v7353_v16  ;;  %v3380_v18 = vsub.f32 1.5, %v3379_v3  ;;  %v3642_v38 = vmul.f32 %v3415_v24, %v7356_v48  ;;  %v7360_v27 = vld [vmem:[#allocation89_spill] sm:$0xff]  ;;  %vm3374_vm1 = vmor %vm3372_vm15, %vm3373_vm13 }
 0x316   :  { %3738 = vmatpush.xpose.msra.mxu3 %v3646_v51  ;;  %3758 = vmatpush.xpose.msrb.mxu1 %v3647_v45  ;;  %v3643_v51 = vmul.f32 %v3415_v24, %v7357_v54  ;;  %v3347_v29 = vmul.f32 %v6354_v6, %v6321_v9  ;;  %v3644_v3 = vmul.f32 %v3415_v24, %v7358_v26  ;;  %v3359_v54 = vmul.f32 0.5, %v3358_v12  ;;  %v7365_v12 = vld [vmem:[#allocation70_spill] sm:$0xff]  ;;  %v7367_v26 = vld [vmem:[#allocation100_spill] sm:$0xff]  ;;  %vm3364_vm3 = vmor %vm3362_vm2, %vm3363_vm0 }
 0x317   :  { %3778 = vmatpush.xpose.msrb.mxu2 %v3648_v37  ;;  %3798 = vmatpush.xpose.msra.mxu0 %v3649_v49  ;;  %v3645_v42 = vmul.f32 %v3415_v24, %v7359_v36  ;;  %v3405_v45 = vsel %vm3404_vm8, %v6255_v8, %v3401_v20  ;;  %v3032_v34 = vmul.f32 %v7360_v27, %v7360_v27  ;;  %v7361_v49 = vld [vmem:[#allocation97_spill] sm:$0xff]  ;;  %v3370_v16 = vsub.f32 1.5, %v3369_v22  ;;  %v7363_v20 = vld [vmem:[#allocation52_spill] sm:$0xff]  ;;  %v7368_v36 = vld [vmem:[#allocation106_spill] sm:$0xff] }
 0x318   :  { %v3189_v37 = vadd.f32 %v3039_v58, %v3038_v14  ;;  %v3171_v56 = vadd.f32 %v3170_v41, %v3025_v10  ;;  %v3040_v48 = vmul.f32 %v7361_v49, %v7361_v49  ;;  %v3381_v24 = vmul.f32 %v6291_v15, %v3380_v18  ;;  %v7362_v8 = vld [vmem:[#allocation53_spill] sm:$0xff] }
 0x319   :  { %v3638_v41 = vmul.f32 %v3405_v45, %v7362_v8  ;;  %v3639_v10 = vmul.f32 %v3405_v45, %v7363_v20  ;;  %v3348_v14 = vmul.f32 %v6354_v6, %v3347_v29  ;;  %v3640_v58 = vmul.f32 %v3405_v45, %v7364_v17  ;;  %v7371_v8 = vld [vmem:[#allocation55_spill] sm:$0xff] }
 0x31a   :  { %3739 = vmatpush.xpose.msra.mxu3 %v3642_v38  ;;  %3759 = vmatpush.xpose.msrb.mxu1 %v3643_v51  ;;  %v3641_v22 = vmul.f32 %v3405_v45, %v7365_v12  ;;  %v3395_v18 = vsel %vm3394_vm11, %v6278_v61, %v3391_v23  ;;  %v7366_v38 = vld [vmem:[#allocation32_spill] sm:$0xff]  ;;  %v3041_v29 = vmul.f32 %v7368_v36, %v7368_v36  ;;  %v7369_v23 = vld [vmem:[#allocation49_spill] sm:$0xff]  ;;  %vm3353_vm4 = vweird.f32 %v6354_v6 }
 0x31b   :  { %3779 = vmatpush.xpose.msrb.mxu2 %v3644_v3  ;;  %3799 = vmatpush.xpose.msra.mxu0 %v3645_v42  ;;  %v2960_v51 = vmul.f32 %v7366_v38, %v7366_v38  ;;  %v3180_v3 = vadd.f32 %v6340_v0, %v3032_v34  ;;  %v3190_v42 = vadd.f32 %v3189_v37, %v3040_v48  ;;  %v3349_v34 = vmul.f32 0.5, %v3348_v14  ;;  %vm3354_vm6 = vmor %vm3352_vm5, %vm3353_vm4 }
 0x31c   :  { %3172 = vadd.xlane.f32.xlu0 %v3171_v56  ;;  %3097 = vadd.xlane.f32.xlu2 %v6270_v50  ;;  %v3033_v50 = vmul.f32 %v7367_v26, %v7367_v26  ;;  %v3371_v61 = vmul.f32 %v6316_v39, %v3370_v16  ;;  %v3634_v45 = vmul.f32 %v3395_v18, %v7369_v23  ;;  %v7370_v56 = vld [vmem:[#allocation48_spill] sm:$0xff]  ;;  %v7381_v23 = vld [vmem:[#allocation81_spill] sm:$0xff] }
 0x31d   :  { %3107 = vadd.xlane.f32.xlu1 %v6314_v62  ;;  %v3360_v62 = vsub.f32 1.5, %v3359_v54  ;;  %v3635_v0 = vmul.f32 %v3395_v18, %v7370_v56  ;;  %v7372_v54 = vld [vmem:[#allocation66_spill] sm:$0xff]  ;;  %v3385_v19 = vsel %vm3384_vm14, %v6291_v15, %v3381_v24  ;;  %v3720_v16 = vadd.f32 %v6165_v33, %v6177_v63 }
 0x31e   :  { %3740 = vmatpush.xpose.msra.mxu3 %v3638_v41  ;;  %3760 = vmatpush.xpose.msrb.mxu1 %v3639_v10  ;;  %v3636_v41 = vmul.f32 %v3395_v18, %v7371_v8  ;;  %v3637_v20 = vmul.f32 %v3395_v18, %v7372_v54  ;;  %v3181_v37 = vadd.f32 %v3180_v3, %v3033_v50  ;;  %v7373_v33 = vld [vmem:[#allocation46_spill] sm:$0xff]  ;;  %v3350_v24 = vsub.f32 1.5, %v3349_v34  ;;  %v7379_v3 = vld [vmem:[#allocation33_spill] sm:$0xff]  ;;  %v7385_v54 = vld [vmem:[#allocation47_spill] sm:$0xff] }
 0x31f   :  { %3780 = vmatpush.xpose.msrb.mxu2 %v3640_v58  ;;  %3800 = vmatpush.xpose.msra.mxu0 %v3641_v22  ;;  %v3191_v48 = vadd.f32 %v3190_v42, %v3041_v29  ;;  %v3080_v10 = vadd.f32 %v6179_v1, %v6169_v5  ;;  %v3090_v14 = vadd.f32 %v6221_v7, %v2960_v51  ;;  %v7375_v58 = vld [vmem:[#allocation51_spill] sm:$0xff]  ;;  %v7376_v5 = vld [vmem:[#allocation62_spill] sm:$0xff]  ;;  %v7377_v22 = vld [vmem:[#allocation73_spill] sm:$0xff] }
 0x320   :  { %v3361_v17 = vmul.f32 %v6331_v31, %v3360_v62  ;;  %v3630_v63 = vmul.f32 %v3385_v19, %v7373_v33  ;;  %v3631_v15 = vmul.f32 %v3385_v19, %v7374_v11  ;;  %v3632_v12 = vmul.f32 %v3385_v19, %v7375_v58  ;;  %v7378_v51 = vld [vmem:[#allocation72_spill] sm:$0xff] }
 0x321   :  { %v3633_v1 = vmul.f32 %v3385_v19, %v7376_v5  ;;  %v3375_v7 = vsel %vm3374_vm1, %v6316_v39, %v3371_v61  ;;  %v3018_v18 = vmul.f32 %v7377_v22, %v7377_v22  ;;  %v3019_v50 = vmul.f32 %v7378_v51, %v7378_v51  ;;  %v7380_v62 = vld [vmem:[#allocation80_spill] sm:$0xff]  ;;  %v7386_v19 = vld [vmem:[#allocation58_spill] sm:$0xff] }
 0x322   :  { %3741 = vmatpush.xpose.msra.mxu3 %v3634_v45  ;;  %3761 = vmatpush.xpose.msrb.mxu1 %v3635_v0  ;;  %v2953_v29 = vmul.f32 %v7379_v3, %v7379_v3  ;;  %v3026_v42 = vmul.f32 %v7380_v62, %v7380_v62  ;;  %v3027_v45 = vmul.f32 %v7381_v23, %v7381_v23  ;;  %v7382_v39 = vld [vmem:[#allocation36_spill] sm:$0xff]  ;;  %v7384_v0 = vld [vmem:[#allocation42_spill] sm:$0xff] }
 0x323   :  { %3781 = vmatpush.xpose.msrb.mxu2 %v3636_v41  ;;  %3801 = vmatpush.xpose.msra.mxu0 %v3637_v20  ;;  %v2961_v61 = vmul.f32 %v7382_v39, %v7382_v39  ;;  %v3626_v56 = vmul.f32 %v3375_v7, %v7383_v21  ;;  %v3627_v34 = vmul.f32 %v3375_v7, %v7384_v0  ;;  %v7396_v21 = vld [vmem:[#allocation88_spill] sm:$0xff] }
 0x324   :  { %3721 = vadd.xlane.f32.xlu0 %v3720_v16  ;;  %3182 = vadd.xlane.f32.xlu2 %v3181_v37  ;;  %v3365_v8 = vsel %vm3364_vm3, %v6331_v31, %v3361_v17  ;;  %v3351_v41 = vmul.f32 %v6354_v6, %v3350_v24  ;;  %v3628_v20 = vmul.f32 %v3375_v7, %v7385_v54  ;;  %v7389_v17 = vld [vmem:[#allocation19_spill] sm:$0xff] }
 0x325   :  { %3192 = vadd.xlane.f32.xlu1 %v3191_v48  ;;  %v3629_v16 = vmul.f32 %v3375_v7, %v7386_v19  ;;  %v3164_v37 = vadd.f32 %v3019_v50, %v3018_v18  ;;  %v7387_v48 = vld [vmem:[#allocation79_spill] sm:$0xff]  ;;  %v3174_v11 = vadd.f32 %v3027_v45, %v3026_v42  ;;  %v3091_v31 = vadd.f32 %v3090_v14, %v2961_v61  ;;  %v7392_v7 = vld [vmem:[#allocation64_spill] sm:$0xff]  ;;  %v7395_v45 = vld [vmem:[#allocation65_spill] sm:$0xff] }
 0x326   :  { %3742 = vmatpush.xpose.msra.mxu3 %v3630_v63  ;;  %3762 = vmatpush.xpose.msrb.mxu1 %v3631_v15  ;;  %v3020_v33 = vmul.f32 %v7387_v48, %v7387_v48  ;;  %v3081_v63 = vadd.f32 %v3080_v10, %v2953_v29  ;;  %v7388_v15 = vld [vmem:[#allocation87_spill] sm:$0xff]  ;;  %v2947_v24 = vmul.f32 %v7389_v17, %v7389_v17  ;;  %v7393_v50 = vld [vmem:[#allocation44_spill] sm:$0xff]  ;;  %v7394_v29 = vld [vmem:[#allocation54_spill] sm:$0xff] }
 0x327   :  { %3782 = vmatpush.xpose.msrb.mxu2 %v3632_v12  ;;  %3802 = vmatpush.xpose.msra.mxu0 %v3633_v1  ;;  %v3028_v58 = vmul.f32 %v7388_v15, %v7388_v15  ;;  %v7390_v12 = vld [vmem:[#allocation40_spill] sm:$0xff]  ;;  %v7391_v1 = vld [vmem:[#allocation39_spill] sm:$0xff]  ;;  %v3011_v18 = vmul.f32 %v7392_v7, %v7392_v7  ;;  %v3624_v9 = vmul.f32 %v3365_v8, %v7393_v50 }
 0x328   :  { %v3622_v5 = vmul.f32 %v3365_v8, %v7390_v12  ;;  %v3623_v10 = vmul.f32 %v3365_v8, %v7391_v1  ;;  %v3625_v42 = vmul.f32 %v3365_v8, %v7394_v29  ;;  %v3355_v14 = vsel %vm3354_vm6, %v6354_v6, %v3351_v41  ;;  %v7400_v41 = vld [vmem:[#allocation37_spill] sm:$0xff]  ;;  %v7402_v1 = vld [vmem:[#allocation50_spill] sm:$0xff]  ;;  %v7404_v29 = vld [vmem:[#allocation23_spill] sm:$0xff] }
 0x329   :  { %v3010_v61 = vmul.f32 %v7395_v45, %v7395_v45  ;;  %v3165_v0 = vadd.f32 %v3164_v37, %v3020_v33  ;;  %v3175_v8 = vadd.f32 %v3174_v11, %v3028_v58  ;;  %v3621_v50 = vmul.f32 %v3355_v14, %v7402_v1  ;;  %v6488_v1 = vld [vmem:[#allocation5] sm:$0xff] }
 0x32a   :  { %3743 = vmatpush.xpose.msra.mxu3 %v3626_v56  ;;  %3763 = vmatpush.xpose.msrb.mxu1 %v3627_v34  ;;  %v3021_v56 = vmul.f32 %v7396_v21, %v7396_v21  ;;  %v7397_v34 = vld [vmem:[#allocation20_spill] sm:$0xff] }
 0x32b   :  { %3783 = vmatpush.xpose.msrb.mxu2 %v3628_v20  ;;  %3803 = vmatpush.xpose.msra.mxu0 %v3629_v16  ;;  %v2946_v54 = vmul.f32 %v7397_v34, %v7397_v34  ;;  %v7398_v20 = vld [vmem:[#allocation96_spill] sm:$0xff]  ;;  %v7399_v16 = vld [vmem:[#allocation38_spill] sm:$0xff] }
 0x32c   :  { %3082 = vadd.xlane.f32.xlu2 %v3081_v63  ;;  %v3029_v19 = vmul.f32 %v7398_v20, %v7398_v20  ;;  %v3618_v6 = vmul.f32 %v3355_v14, %v7399_v16  ;;  %v3619_v63 = vmul.f32 %v3355_v14, %v7400_v41  ;;  %v3166_v33 = vadd.f32 %v3165_v0, %v3021_v56  ;;  %v7408_v56 = vld [vmem:[#allocation31_spill] sm:$0xff] }
 0x32d   :  { %3092 = vadd.xlane.f32.xlu1 %v3091_v31  ;;  %v7401_v31 = vld [vmem:[#allocation41_spill] sm:$0xff]  ;;  %v3074_v58 = vadd.f32 %v2947_v24, %v2946_v54  ;;  %v2949_v0 = vmul.f32 %v7408_v56, %v7408_v56 }
 0x32e   :  { %3744 = vmatpush.xpose.msra.mxu3 %v3622_v5  ;;  %3764 = vmatpush.xpose.msrb.mxu1 %v3623_v10  ;;  %v3620_v12 = vmul.f32 %v3355_v14, %v7401_v31  ;;  %v3154_v5 = vadd.f32 %v3011_v18, %v3010_v61  ;;  %v7403_v10 = vld [vmem:[#allocation71_spill] sm:$0xff]  ;;  %v3176_v11 = vadd.f32 %v3175_v8, %v3029_v19  ;;  %v7406_v14 = vld [vmem:[#allocation69_spill] sm:$0xff]  ;;  %v7407_v61 = vld [vmem:[#allocation68_spill] sm:$0xff] }
 0x32f   :  { %3784 = vmatpush.xpose.msrb.mxu2 %v3624_v9  ;;  %3804 = vmatpush.xpose.msra.mxu0 %v3625_v42  ;;  %v3012_v37 = vmul.f32 %v7403_v10, %v7403_v10  ;;  %v2948_v9 = vmul.f32 %v7404_v29, %v7404_v29  ;;  %v7405_v42 = vld [vmem:[#allocation82_spill] sm:$0xff]  ;;  %v3014_v18 = vmul.f32 %v7406_v14, %v7406_v14 }
 0x330   :  { %v3013_v16 = vmul.f32 %v7405_v42, %v7405_v42 }
 0x331   :  { %v3155_v41 = vadd.f32 %v3154_v5, %v3012_v37  ;;  %v7412_v5 = vld [vmem:[#allocation86_spill] sm:$0xff] }
 0x332   :  { %3745 = vmatpush.xpose.msra.mxu3 %v3618_v6  ;;  %3765 = vmatpush.xpose.msrb.mxu1 %v3619_v63  ;;  %v3015_v6 = vmul.f32 %v7407_v61, %v7407_v61  ;;  %v3075_v63 = vadd.f32 %v3074_v58, %v2948_v9  ;;  %v3017_v37 = vmul.f32 %v7412_v5, %v7412_v5  ;;  %v6500_v58 = vld [vmem:[#allocation5 + $0x28] sm:$0xff] }
 0x333   :  { %3785 = vmatpush.xpose.msrb.mxu2 %v3620_v12  ;;  %3805 = vmatpush.xpose.msra.mxu0 %v3621_v50  ;;  %v7409_v12 = vld [vmem:[#allocation75_spill] sm:$0xff]  ;;  %v3156_v54 = vadd.f32 %v3155_v41, %v3013_v16  ;;  %v6490_v50 = vld [vmem:[#allocation5 + $0x8] sm:$0xff]  ;;  %v3925_v9 = vmul.f32 %v6488_v1, %v6488_v1  ;;  %7413 = vst [vmem:[#allocation61_spill] sm:$0xff] %v6500_v58 }
 0x334   :  { %3167 = vadd.xlane.f32.xlu2 %v3166_v33  ;;  %v3159_v31 = vadd.f32 %v3015_v6, %v3014_v18  ;;  %v3016_v24 = vmul.f32 %v7409_v12, %v7409_v12  ;;  %v3076_v19 = vadd.f32 %v3075_v63, %v2949_v0  ;;  %7410 = vst [vmem:[#allocation109_spill] sm:$0xff] %v6490_v50  ;;  %v6492_v33 = vld [vmem:[#allocation5 + $0x20] sm:$0xff]  ;;  %v6504_v18 = vld [vmem:[#allocation5 + $0x10] sm:$0xff] }
 0x335   :  { %3177 = vadd.xlane.f32.xlu1 %v3176_v11  ;;  %7411 = vst [vmem:[#allocation116_spill] sm:$0xff] %v6492_v33  ;;  %v3926_v11 = vmul.f32 %v6490_v50, %v6490_v50  ;;  %v3949_v16 = vmul.f32 %v6492_v33, %v6492_v33  ;;  %v6506_v6 = vld [vmem:[#allocation5 + $0x30] sm:$0xff]  ;;  %v3950_v41 = vmul.f32 %v6500_v58, %v6500_v58 }
 0x336   :  { %v3160_v8 = vadd.f32 %v3159_v31, %v3016_v24  ;;  %7414 = vst [vmem:[#allocation60_spill] sm:$0xff] %v6504_v18  ;;  %v3927_v0 = vmul.f32 %v6504_v18, %v6504_v18  ;;  %v3951_v31 = vmul.f32 %v6506_v6, %v6506_v6  ;;  %v6514_v24 = vld [vmem:[#allocation5 + $0x18] sm:$0xff] }
 0x337   :  { %7415 = vst [vmem:[#allocation67_spill] sm:$0xff] %v6506_v6  ;;  %v3929_v63 = vadd.f32 %v3926_v11, %v3925_v9  ;;  %v3928_v10 = vmul.f32 %v6514_v24, %v6514_v24 }
 0x338   :  { %7416 = vst [vmem:[#allocation78_spill] sm:$0xff] %v6514_v24  ;;  %v3161_v42 = vadd.f32 %v3160_v8, %v3017_v37 }
 0x339   :  { %v3930_v7 = vadd.f32 %v3929_v63, %v3927_v0 }
 0x33b   :  { %v3931_v45 = vadd.f32 %v3930_v7, %v3928_v10 }
 0x33c   :  { %3157 = vadd.xlane.f32.xlu2 %v3156_v54  ;;  %v6516_v54 = vld [vmem:[#allocation5 + $0x38] sm:$0xff] }
 0x33d   :  { %3077 = vadd.xlane.f32.xlu1 %v3076_v19  ;;  %7417 = vst [vmem:[#allocation94_spill] sm:$0xff] %v6516_v54  ;;  %v3953_v19 = vadd.f32 %v3950_v41, %v3949_v16  ;;  %v3952_v5 = vmul.f32 %v6516_v54, %v6516_v54  ;;  %3932 = vadd.xlane.f32.xlu0 %v3931_v45 }
 0x33f   :  { %v3954_v12 = vadd.f32 %v3953_v19, %v3951_v31 }
 0x341   :  { %v3955_v9 = vadd.f32 %v3954_v12, %v3952_v5 }
 0x345   :  { %3162 = vadd.xlane.f32.xlu1 %v3161_v42 }
 0x34d   :  { %3956 = vadd.xlane.f32.xlu1 %v3955_v9 }
 0x35f   :  { %v3213_v61 = vpop.xlane.xlu2 %3212 }
 0x367   :  { %v3218_v11 = vpop.xlane.xlu0 %3217 }
 0x36f   :  { %v6522_v14 = vpop.xlane.xlu0 %3202  ;;  %v6524_v16 = vpop.xlane.xlu1 %3222 }
 0x377   :  { %v3228_v21 = vpop.xlane.xlu2 %3227  ;;  %v3103_v8 = vpop.xlane.xlu0 %3102 }
 0x378   :  { %v6528_v10 = vadd.f32 1e-24, %v3103_v8 }
 0x37a   :  { %vm3322_vm12 = vweird.f32 %v6528_v10 }
 0x37f   :  { %v3113_v37 = vpop.xlane.xlu2 %3112  ;;  %v6526_v7 = vpop.xlane.xlu0 %3187 }
 0x380   :  { %v3241_v41 = vadd.f32 1e-24, %v3113_v37  ;;  %v3233_v0 = vpop.xlane.xlu1 %3232 }
 0x381   :  { %v6574_v54 = vadd.f32 1e-24, %v3233_v0 }
 0x382   :  { %5205 = vrsqrt.f32 %v3241_v41  ;;  %vm3342_vm8 = vweird.f32 %v3241_v41 }
 0x383   :  { %5207 = vrsqrt.f32 %v6528_v10 }
 0x387   :  { %v6530_v42 = vpop.xlane.xlu2 %3197  ;;  %v3088_v19 = vpop.xlane.xlu0 %3087 }
 0x388   :  { %v6532_v45 = vpop.xlane.xlu1 %3207  ;;  %v5206_v12 = vpop.eup %5205 }
 0x389   :  { %v3337_v5 = vmul.f32 %v5206_v12, %v3241_v41  ;;  %v6535_v48 = vpop.eup %5207  ;;  %vm3343_vm7 = vweird.f32 %v5206_v12 }
 0x38a   :  { %v3317_v20 = vmul.f32 %v6535_v48, %v6528_v10  ;;  %vm3344_vm9 = vmor %vm3342_vm8, %vm3343_vm7  ;;  %vm3323_vm10 = vweird.f32 %v6535_v48 }
 0x38b   :  { %v3338_v63 = vmul.f32 %v5206_v12, %v3337_v5  ;;  %vm3324_vm13 = vmor %vm3322_vm12, %vm3323_vm10 }
 0x38d   :  { %v3339_v31 = vmul.f32 0.5, %v3338_v63  ;;  %v6542_v63 = vadd.f32 1e-24, %v3088_v19  ;;  %v6562_v19 = vadd.f32 1e-24, %v3213_v61 }
 0x38f   :  { %v3098_v9 = vpop.xlane.xlu2 %3097  ;;  %v3340_v37 = vsub.f32 1.5, %v3339_v31  ;;  %v3318_v31 = vmul.f32 %v6535_v48, %v3317_v20  ;;  %v6550_v26 = vpop.xlane.xlu0 %3172  ;;  %vm3292_vm7 = vweird.f32 %v6542_v63 }
 0x390   :  { %v6537_v51 = vadd.f32 1e-24, %v3098_v9  ;;  %v3108_v22 = vpop.xlane.xlu1 %3107 }
 0x391   :  { %v3341_v8 = vmul.f32 %v5206_v12, %v3340_v37  ;;  %v3240_v15 = vadd.f32 1e-24, %v3108_v22 }
 0x392   :  { %5209 = vrsqrt.f32 %v6537_v51  ;;  %vm3312_vm1 = vweird.f32 %v6537_v51 }
 0x393   :  { %v3345_v5 = vsel %vm3344_vm9, %v5206_v12, %v3341_v8  ;;  %5211 = vrsqrt.f32 %v3240_v15  ;;  %v6555_v12 = vadd.f32 1e-24, %v3218_v11  ;;  %vm3332_vm14 = vweird.f32 %v3240_v15 }
 0x394   :  { %v3614_v23 = vmul.f32 %v3345_v5, %v5786_v32  ;;  %v3615_v9 = vmul.f32 %v3345_v5, %v5784_v30  ;;  %v3616_v37 = vmul.f32 %v3345_v5, %v5803_v46  ;;  %v3617_v41 = vmul.f32 %v3345_v5, %v5837_v53 }
 0x395   :  { %5213 = vrsqrt.f32 %v6542_v63  ;;  %v3319_v30 = vmul.f32 0.5, %v3318_v31  ;;  %v6571_v31 = vadd.f32 1e-24, %v3228_v21 }
 0x396   :  { %3746 = vmatpush.xpose.msra.mxu3 %v3614_v23  ;;  %3766 = vmatpush.xpose.msrb.mxu1 %v3615_v9  ;;  %5215 = vrsqrt.f32 %v6555_v12 }
 0x397   :  { %v6548_v62 = vpop.xlane.xlu2 %3182  ;;  %3786 = vmatpush.xpose.msrb.mxu2 %v3616_v37  ;;  %3806 = vmatpush.xpose.msra.mxu0 %v3617_v41  ;;  %v3320_v11 = vsub.f32 1.5, %v3319_v30  ;;  %5217 = vrsqrt.f32 %v6562_v19 }
 0x398   :  { %v6553_v22 = vpop.xlane.xlu1 %3192  ;;  %v6557_v32 = vpop.eup %5209 }
 0x399   :  { %v3307_v46 = vmul.f32 %v6557_v32, %v6537_v51  ;;  %v5212_v20 = vpop.eup %5211  ;;  %vm3313_vm0 = vweird.f32 %v6557_v32 }
 0x39a   :  { %v3327_v23 = vmul.f32 %v5212_v20, %v3240_v15  ;;  %vm3333_vm11 = vweird.f32 %v5212_v20  ;;  %vm3314_vm2 = vmor %vm3312_vm1, %vm3313_vm0  ;;  %vm3572_vm0 = vweird.f32 %v6571_v31  ;;  %vm3582_vm1 = vweird.f32 %v6574_v54 }
 0x39b   :  { %v3308_v53 = vmul.f32 %v6557_v32, %v3307_v46  ;;  %v6566_v9 = vpop.eup %5213  ;;  %v3722_v46 = vpop.xlane.xlu0 %3721  ;;  %vm3334_vm15 = vmor %vm3332_vm14, %vm3333_vm11 }
 0x39c   :  { %v3328_v8 = vmul.f32 %v5212_v20, %v3327_v23  ;;  %v6579_v23 = vpop.eup %5215  ;;  %v3287_v6 = vmul.f32 %v6566_v9, %v6542_v63  ;;  %vm3293_vm4 = vweird.f32 %v6566_v9 }
 0x39d   :  { %v3309_v27 = vmul.f32 0.5, %v3308_v53  ;;  %vm3294_vm8 = vmor %vm3292_vm7, %vm3293_vm4 }
 0x39e   :  { %v3329_v61 = vmul.f32 0.5, %v3328_v8  ;;  %v6586_v8 = vadd.f32 1e-24, %v3722_v46  ;;  %v3288_v10 = vmul.f32 %v6566_v9, %v3287_v6 }
 0x39f   :  { %v3083_v5 = vpop.xlane.xlu2 %3082  ;;  %v3310_v0 = vsub.f32 1.5, %v3309_v27 }
 0x3a0   :  { %v6568_v37 = vadd.f32 1e-24, %v3083_v5  ;;  %v3093_v41 = vpop.xlane.xlu1 %3092  ;;  %v3321_v5 = vmul.f32 %v6535_v48, %v3320_v11  ;;  %v3330_v21 = vsub.f32 1.5, %v3329_v61  ;;  %v6591_v11 = vadd.f32 1e-24, %v6524_v16  ;;  %v6594_v61 = vpop.eup %5217 }
 0x3a1   :  { %v6577_v30 = vadd.f32 1e-24, %v3093_v41  ;;  %v3547_v41 = vmul.f32 %v6579_v23, %v6555_v12  ;;  %v3311_v18 = vmul.f32 %v6557_v32, %v3310_v0  ;;  %vm3730_vm7 = vweird.f32 %v6586_v8 }
 0x3a2   :  { %5219 = vrsqrt.f32 %v6568_v37  ;;  %v3331_v53 = vmul.f32 %v5212_v20, %v3330_v21  ;;  %v3325_v15 = vsel %vm3324_vm13, %v6535_v48, %v3321_v5  ;;  %vm3282_vm10 = vweird.f32 %v6568_v37 }
 0x3a3   :  { %5221 = vrsqrt.f32 %v6577_v30  ;;  %v3606_v0 = vmul.f32 %v3325_v15, %v5762_v25  ;;  %v3609_v51 = vmul.f32 %v3325_v15, %v5813_v2  ;;  %vm3302_vm5 = vweird.f32 %v6577_v30 }
 0x3a4   :  { %5223 = vrsqrt.f32 %v6574_v54  ;;  %v3335_v27 = vsel %vm3334_vm15, %v5212_v20, %v3331_v53  ;;  %vm3562_vm15 = vweird.f32 %v6591_v11 }
 0x3a5   :  { %5225 = vrsqrt.f32 %v6571_v31  ;;  %v3610_v21 = vmul.f32 %v3335_v27, %v5774_v4  ;;  %v3611_v58 = vmul.f32 %v3335_v27, %v5772_v55  ;;  %v3612_v16 = vmul.f32 %v3335_v27, %v5791_v35 }
 0x3a6   :  { %v3613_v33 = vmul.f32 %v3335_v27, %v5825_v59  ;;  %5227 = vrsqrt.f32 %v6586_v8  ;;  %v3537_v55 = vmul.f32 %v6594_v61, %v6562_v19  ;;  %v3548_v4 = vmul.f32 %v6579_v23, %v3547_v41 }
 0x3a7   :  { %3747 = vmatpush.xpose.msra.mxu3 %v3610_v21  ;;  %3767 = vmatpush.xpose.msrb.mxu1 %v3611_v58  ;;  %5229 = vrsqrt.f32 %v6591_v11  ;;  %v3289_v35 = vmul.f32 0.5, %v3288_v10  ;;  %v3607_v58 = vmul.f32 %v3325_v15, %v5760_v52  ;;  %v3608_v41 = vmul.f32 %v3325_v15, %v5779_v28 }
 0x3a8   :  { %v6599_v46 = vpop.eup %5219  ;;  %v6605_v24 = vpop.xlane.xlu1 %3177  ;;  %3787 = vmatpush.xpose.msrb.mxu2 %v3612_v16  ;;  %3807 = vmatpush.xpose.msra.mxu0 %v3613_v33  ;;  %v3315_v33 = vsel %vm3314_vm2, %v6557_v32, %v3311_v18  ;;  %v6632_v10 = vadd.f32 1e-24, %v6522_v14  ;;  %v3538_v25 = vmul.f32 %v6594_v61, %v3537_v55  ;;  %v6638_v52 = vmul.f32 0.5, %v3548_v4  ;;  %v7418_v32 = vld [vmem:[#allocation30_spill] sm:$0xff] }
 0x3a9   :  { %v3277_v48 = vmul.f32 %v6599_v46, %v6568_v37  ;;  %v6612_v6 = vpop.eup %5221  ;;  %v3290_v16 = vsub.f32 1.5, %v3289_v35  ;;  %v3602_v14 = vmul.f32 %v3315_v33, %v5750_v60  ;;  %v3603_v15 = vmul.f32 %v3315_v33, %v7418_v32  ;;  %v7419_v4 = vld [vmem:[#allocation34_spill] sm:$0xff]  ;;  %v7421_v32 = vld [vmem:[#allocation27_spill] sm:$0xff] }
 0x3aa   :  { %v6619_v59 = vpop.eup %5223  ;;  %v3297_v5 = vmul.f32 %v6612_v6, %v6577_v30  ;;  %5231 = vrsqrt.f32 %v6632_v10  ;;  %vm3303_vm3 = vweird.f32 %v6612_v6  ;;  %vm3283_vm9 = vweird.f32 %v6599_v46 }
 0x3ab   :  { %v3278_v20 = vmul.f32 %v6599_v46, %v3277_v48  ;;  %v6626_v53 = vpop.eup %5225  ;;  %3748 = vmatpush.xpose.msra.mxu3 %v3606_v0  ;;  %3768 = vmatpush.xpose.msrb.mxu1 %v3607_v58  ;;  %v3577_v28 = vmul.f32 %v6619_v59, %v6574_v54  ;;  %v3604_v0 = vmul.f32 %v3315_v33, %v7419_v4  ;;  %vm3304_vm6 = vmor %vm3302_vm5, %vm3303_vm3  ;;  %vm3583_vm12 = vweird.f32 %v6619_v59 }
 0x3ac   :  { %v3298_v27 = vmul.f32 %v6612_v6, %v3297_v5  ;;  %v6635_v21 = vpop.eup %5227  ;;  %3788 = vmatpush.xpose.msrb.mxu2 %v3608_v41  ;;  %3808 = vmatpush.xpose.msra.mxu0 %v3609_v51  ;;  %v3567_v55 = vmul.f32 %v6626_v53, %v6571_v31  ;;  %v3605_v58 = vmul.f32 %v3315_v33, %v5801_v40  ;;  %v6662_v33 = vmul.f32 0.5, %v3538_v25  ;;  %vm3284_vm11 = vmor %vm3282_vm10, %vm3283_vm9 }
 0x3ad   :  { %v3279_v2 = vmul.f32 0.5, %v3278_v20  ;;  %v6644_v5 = vpop.eup %5229  ;;  %v3725_v35 = vmul.f32 %v6635_v21, %v6586_v8  ;;  %v3578_v20 = vmul.f32 %v6619_v59, %v3577_v28  ;;  %v3291_v40 = vmul.f32 %v6566_v9, %v3290_v16  ;;  %vm3584_vm2 = vmor %vm3582_vm1, %vm3583_vm12 }
 0x3ae   :  { %v3299_v18 = vmul.f32 0.5, %v3298_v27  ;;  %v3550_v27 = vsub.f32 1.5, %v6638_v52  ;;  %v3557_v28 = vmul.f32 %v6644_v5, %v6591_v11  ;;  %v6672_v16 = vadd.f32 1e-24, %v6532_v45  ;;  %v7420_v52 = vld [vmem:[#allocation28_spill] sm:$0xff]  ;;  %v7437_v11 = vld [vmem:[#allocation127_spill] sm:$0xff] }
 0x3af   :  { %3749 = vmatpush.xpose.msra.mxu3 %v3602_v14  ;;  %3769 = vmatpush.xpose.msrb.mxu1 %v3603_v15  ;;  %v3280_v41 = vsub.f32 1.5, %v3279_v2  ;;  %v3726_v2 = vmul.f32 %v6635_v21, %v3725_v35  ;;  %v3579_v25 = vmul.f32 0.5, %v3578_v20  ;;  %v6691_v35 = vadd.f32 1e-24, %v6526_v7 }
 0x3b0   :  { %v3078_v48 = vpop.xlane.xlu1 %3077  ;;  %v3300_v60 = vsub.f32 1.5, %v3299_v18  ;;  %3789 = vmatpush.xpose.msrb.mxu2 %v3604_v0  ;;  %3809 = vmatpush.xpose.msra.mxu0 %v3605_v58  ;;  %v3568_v18 = vmul.f32 %v6626_v53, %v3567_v55  ;;  %v6681_v55 = vpop.eup %5231  ;;  %v3558_v0 = vmul.f32 %v6644_v5, %v3557_v28  ;;  %v7424_v28 = vld [vmem:[#allocation29_spill] sm:$0xff]  ;;  %vm3563_vm13 = vweird.f32 %v6644_v5 }
 0x3b1   :  { %v6650_v50 = vadd.f32 1e-24, %v3078_v48  ;;  %v3281_v63 = vmul.f32 %v6599_v46, %v3280_v41  ;;  %v3580_v7 = vsub.f32 1.5, %v3579_v25  ;;  %vm3731_vm3 = vweird.f32 %v6635_v21  ;;  %vm3564_vm10 = vmor %vm3562_vm15, %vm3563_vm13 }
 0x3b2   :  { %v3301_v51 = vmul.f32 %v6612_v6, %v3300_v60  ;;  %v3569_v58 = vmul.f32 0.5, %v3568_v18  ;;  %v3727_v60 = vmul.f32 0.5, %v3726_v2  ;;  %v7425_v18 = vld [vmem:[#allocation35_spill] sm:$0xff]  ;;  %vm3573_vm5 = vweird.f32 %v6626_v53 }
 0x3b3   :  { %5233 = vrsqrt.f32 %v6650_v50  ;;  %vm3272_vm4 = vweird.f32 %v6650_v50  ;;  %vm3574_vm9 = vmor %vm3572_vm0, %vm3573_vm5  ;;  %v6777_v31 = vadd.f32 1e-24, %v6548_v62  ;;  %vm3542_vm12 = vweird.f32 %v6562_v19 }
 0x3b4   :  { %v3305_v30 = vsel %vm3304_vm6, %v6612_v6, %v3301_v51  ;;  %v3295_v6 = vsel %vm3294_vm8, %v6566_v9, %v3291_v40  ;;  %5235 = vrsqrt.f32 %v6672_v16  ;;  %v6701_v9 = vmul.f32 %v6579_v23, %v3550_v27  ;;  %v7423_v40 = vld [vmem:[#allocation24_spill] sm:$0xff]  ;;  %vm3732_vm8 = vmor %vm3730_vm7, %vm3731_vm3 }
 0x3b5   :  { %v3598_v14 = vmul.f32 %v3305_v30, %v7420_v52  ;;  %v3599_v15 = vmul.f32 %v3305_v30, %v7421_v32  ;;  %v3600_v48 = vmul.f32 %v3305_v30, %v7366_v38  ;;  %v3601_v45 = vmul.f32 %v3305_v30, %v7382_v39 }
 0x3b6   :  { %v6694_v38 = vadd.f32 1e-24, %v6530_v42  ;;  %v7422_v42 = vld [vmem:[#allocation25_spill] sm:$0xff]  ;;  %v3595_v41 = vmul.f32 %v3295_v6, %v7423_v40  ;;  %v3596_v37 = vmul.f32 %v3295_v6, %v7424_v28  ;;  %v3597_v2 = vmul.f32 %v3295_v6, %v7425_v18 }
 0x3b7   :  { %3750 = vmatpush.xpose.msra.mxu3 %v3598_v14  ;;  %3770 = vmatpush.xpose.msrb.mxu1 %v3599_v15  ;;  %v3594_v20 = vmul.f32 %v3295_v6, %v7422_v42  ;;  %v3285_v30 = vsel %vm3284_vm11, %v6599_v46, %v3281_v63  ;;  %v3517_v27 = vmul.f32 %v6681_v55, %v6632_v10  ;;  %v3559_v52 = vmul.f32 0.5, %v3558_v0 }
 0x3b8   :  { %3790 = vmatpush.xpose.msrb.mxu2 %v3600_v48  ;;  %3810 = vmatpush.xpose.msra.mxu0 %v3601_v45  ;;  %v3570_v25 = vsub.f32 1.5, %v3569_v58  ;;  %5237 = vrsqrt.f32 %v6691_v35  ;;  %v3728_v14 = vsub.f32 1.5, %v3727_v60  ;;  %v3581_v46 = vmul.f32 %v6619_v59, %v3580_v7  ;;  %v7426_v48 = vld [vmem:[#allocation22_spill] sm:$0xff]  ;;  %v7427_v45 = vld [vmem:[#allocation21_spill] sm:$0xff] }
 0x3b9   :  { %v6687_v4 = vpop.eup %5233  ;;  %5239 = vrsqrt.f32 %v6694_v38  ;;  %v6719_v15 = vadd.f32 1e-24, %v6553_v22  ;;  %v3590_v63 = vmul.f32 %v3285_v30, %v7426_v48  ;;  %v3591_v6 = vmul.f32 %v3285_v30, %v7427_v45  ;;  %v7428_v60 = vld [vmem:[#allocation26_spill] sm:$0xff] }
 0x3ba   :  { %v3267_v39 = vmul.f32 %v6687_v4, %v6650_v50  ;;  %v6723_v0 = vpop.eup %5235  ;;  %vm3273_vm14 = vweird.f32 %v6687_v4  ;;  %v3593_v42 = vmul.f32 %v3285_v30, %v7379_v3  ;;  %v3560_v40 = vsub.f32 1.5, %v3559_v52 }
 0x3bb   :  { %3751 = vmatpush.xpose.msra.mxu3 %v3594_v20  ;;  %3771 = vmatpush.xpose.msrb.mxu1 %v3595_v41  ;;  %v3518_v20 = vmul.f32 %v6681_v55, %v3517_v27  ;;  %v3729_v22 = vmul.f32 %v6635_v21, %v3728_v14  ;;  %v3571_v41 = vmul.f32 %v6626_v53, %v3570_v25  ;;  %vm3274_vm6 = vmor %vm3272_vm4, %vm3273_vm14  ;;  %5241 = vrsqrt.f32 %v6719_v15  ;;  %v7431_v14 = vld [vmem:[#allocation133_spill] sm:$0xff] }
 0x3bc   :  { %v3268_v51 = vmul.f32 %v6687_v4, %v3267_v39  ;;  %3791 = vmatpush.xpose.msrb.mxu2 %v3596_v37  ;;  %3811 = vmatpush.xpose.msra.mxu0 %v3597_v2  ;;  %v3592_v39 = vmul.f32 %v3285_v30, %v7428_v60  ;;  %v3527_v54 = vmul.f32 %v6723_v0, %v6672_v16  ;;  %v3540_v60 = vsub.f32 1.5, %v6662_v33 }
 0x3bd   :  { %v3585_v50 = vsel %vm3584_vm2, %v6619_v59, %v3581_v46  ;;  %v6761_v27 = vmul.f32 0.5, %v3518_v20  ;;  %v3561_v59 = vmul.f32 %v6644_v5, %v3560_v40  ;;  %v3575_v52 = vsel %vm3574_vm9, %v6626_v53, %v3571_v41  ;;  %v7433_v53 = vld [vmem:[#allocation122_spill] sm:$0xff]  ;;  %v7436_v40 = vld [vmem:[#allocation125_spill] sm:$0xff] }
 0x3be   :  { %v3269_v32 = vmul.f32 0.5, %v3268_v51  ;;  %v6738_v7 = vpop.eup %5237  ;;  %v6745_v51 = vadd.f32 1e-24, %v6550_v26  ;;  %v3528_v25 = vmul.f32 %v6723_v0, %v3527_v54  ;;  %vm3553_vm11 = vweird.f32 %v6579_v23 }
 0x3bf   :  { %3752 = vmatpush.xpose.msra.mxu3 %v3590_v63  ;;  %3772 = vmatpush.xpose.msrb.mxu1 %v3591_v6  ;;  %v6749_v28 = vpop.eup %5239  ;;  %v3487_v8 = vmul.f32 %v6738_v7, %v6691_v35  ;;  %v6784_v63 = vadd.f32 1e-24, %v6605_v24  ;;  %v7434_v6 = vld [vmem:[#allocation119_spill] sm:$0xff]  ;;  %v3706_v33 = vmul.f32 %v3575_v52, %v7437_v11  ;;  %v3565_v54 = vsel %vm3564_vm10, %v6644_v5, %v3561_v59  ;;  %v7445_v11 = vld [vmem:[#allocation114_spill] sm:$0xff] }
 0x3c0   :  { %v3270_v58 = vsub.f32 1.5, %v3269_v32  ;;  %3792 = vmatpush.xpose.msrb.mxu2 %v3592_v39  ;;  %3812 = vmatpush.xpose.msra.mxu0 %v3593_v42  ;;  %5243 = vrsqrt.f32 %v6745_v51  ;;  %v3712_v32 = vmul.f32 %v3585_v50, %v7431_v14  ;;  %v3507_v48 = vmul.f32 %v6749_v28, %v6694_v38  ;;  %v6800_v39 = vpop.xlane.xlu1 %3162  ;;  %v7435_v42 = vld [vmem:[#allocation124_spill] sm:$0xff]  ;;  %v7443_v14 = vld [vmem:[#allocation123_spill] sm:$0xff] }
 0x3c1   :  { %v3488_v24 = vmul.f32 %v6738_v7, %v3487_v8  ;;  %5245 = vrsqrt.f32 %v6777_v31  ;;  %vm3552_vm13 = vweird.f32 %v6555_v12  ;;  %vm3543_vm14 = vweird.f32 %v6594_v61 }
 0x3c2   :  { %v3271_v3 = vmul.f32 %v6687_v4, %v3270_v58  ;;  %v6792_v58 = vpop.eup %5241  ;;  %5247 = vrsqrt.f32 %v6784_v63  ;;  %vm3554_vm15 = vmor %vm3552_vm13, %vm3553_vm11  ;;  %v3704_v12 = vmul.f32 %v3565_v54, %v7443_v14  ;;  %vm3522_vm0 = vweird.f32 %v6632_v10 }
 0x3c3   :  { %v3489_v5 = vmul.f32 0.5, %v3488_v24  ;;  %v3497_v59 = vmul.f32 %v6792_v58, %v6719_v15  ;;  %vm3523_vm1 = vweird.f32 %v6681_v55  ;;  %vm3532_vm2 = vweird.f32 %v6672_v16  ;;  %v3933_v24 = vpop.xlane.xlu0 %3932  ;;  %vm3544_vm4 = vmor %vm3542_vm12, %vm3543_vm14 }
 0x3c4   :  { %v3275_v37 = vsel %vm3274_vm6, %v6687_v4, %v3271_v3  ;;  %v7438_v3 = vld [vmem:[#allocation128_spill] sm:$0xff]  ;;  %vm3533_vm3 = vweird.f32 %v6723_v0  ;;  %vm3493_vm5 = vweird.f32 %v6738_v7  ;;  %vm3512_vm6 = vweird.f32 %v6694_v38  ;;  %vm3524_vm10 = vmor %vm3522_vm0, %vm3523_vm1  ;;  %v7474_v38 = vld [vmem:[#allocation91_spill] sm:$0xff] }
 0x3c5   :  { %v3586_v18 = vmul.f32 %v3275_v37, %v7397_v34  ;;  %v3587_v26 = vmul.f32 %v3275_v37, %v7389_v17  ;;  %v3588_v2 = vmul.f32 %v3275_v37, %v7404_v29  ;;  %v3589_v30 = vmul.f32 %v3275_v37, %v7408_v56  ;;  %v7429_v17 = vld [vmem:[#allocation131_spill] sm:$0xff]  ;;  %v7430_v56 = vld [vmem:[#allocation132_spill] sm:$0xff]  ;;  %v3168_v37 = vpop.xlane.xlu2 %3167  ;;  %vm3534_vm7 = vmor %vm3532_vm2, %vm3533_vm3 }
 0x3c6   :  { %v3733_v34 = vsel %vm3732_vm8, %v6635_v21, %v3729_v22  ;;  %v3710_v29 = vmul.f32 %v3585_v50, %v7429_v17  ;;  %v3711_v4 = vmul.f32 %v3585_v50, %v7430_v56  ;;  %v7432_v21 = vld [vmem:[#allocation135_spill] sm:$0xff]  ;;  %v3707_v41 = vmul.f32 %v3575_v52, %v7438_v3  ;;  %v6819_v8 = vpop.eup %5243 }
 0x3c7   :  { %3753 = vmatpush.xpose.msra.mxu3 %v3586_v18  ;;  %3773 = vmatpush.xpose.msrb.mxu1 %v3587_v26  ;;  %v3713_v46 = vmul.f32 %v3585_v50, %v7432_v21  ;;  %v6787_v45 = vmul.f32 %v3733_v34, %v7433_v53  ;;  %v6790_v62 = vmul.f32 %v3733_v34, %v7434_v6  ;;  %v3529_v50 = vmul.f32 0.5, %v3528_v25  ;;  %v7439_v18 = vld [vmem:[#allocation129_spill] sm:$0xff]  ;;  %v6844_v6 = vpop.eup %5245  ;;  %v7446_v3 = vld [vmem:[#allocation115_spill] sm:$0xff] }
 0x3c8   :  { %3793 = vmatpush.xpose.msrb.mxu2 %v3588_v2  ;;  %3813 = vmatpush.xpose.msra.mxu0 %v3589_v30  ;;  %v6803_v20 = vmul.f32 %v3733_v34, %v7435_v42  ;;  %v6806_v22 = vmul.f32 %v3733_v34, %v7436_v40  ;;  %v3708_v26 = vmul.f32 %v3575_v52, %v7439_v18  ;;  %v7440_v2 = vld [vmem:[#allocation134_spill] sm:$0xff]  ;;  %v3520_v34 = vsub.f32 1.5, %v6761_v27  ;;  %v3957_v42 = vpop.xlane.xlu1 %3956  ;;  %v6850_v40 = vpop.eup %5247 }
 0x3c9   :  { %v3709_v30 = vmul.f32 %v3575_v52, %v7440_v2  ;;  %v3508_v17 = vmul.f32 %v6749_v28, %v3507_v48  ;;  %v7441_v27 = vld [vmem:[#allocation118_spill] sm:$0xff]  ;;  %v3530_v25 = vsub.f32 1.5, %v3529_v50  ;;  %v6860_v50 = vadd.f32 1e-24, %v3957_v42 }
 0x3ca   :  { %3754 = vmatmul.f32.vlgmr.msra.gmra.mxu3 %v6787_v45  ;;  %3774 = vmatmul.f32.vlgmr.msrb.gmra.mxu1 %v6790_v62  ;;  %v3702_v56 = vmul.f32 %v3565_v54, %v7441_v27  ;;  %v6839_v48 = vmul.f32 %v6681_v55, %v3520_v34  ;;  %v3477_v19 = vmul.f32 %v6844_v6, %v6777_v31  ;;  %vm3492_vm8 = vweird.f32 %v6691_v35 }
 0x3cb   :  { %3830 = vmatpush.xpose.msrb.mxu3 %v3710_v29  ;;  %3850 = vmatpush.xpose.msra.mxu1 %v3711_v4  ;;  %v3541_v29 = vmul.f32 %v6594_v61, %v3540_v60  ;;  %v7442_v4 = vld [vmem:[#allocation121_spill] sm:$0xff]  ;;  %v3509_v53 = vmul.f32 0.5, %v3508_v17  ;;  %v3490_v60 = vsub.f32 1.5, %v3489_v5  ;;  %v3531_v18 = vmul.f32 %v6723_v0, %v3530_v25  ;;  %v7450_v25 = vld [vmem:[#allocation111_spill] sm:$0xff]  ;;  %vm6946_vm0 = vmor %vm3492_vm8, %vm3493_vm5 }
 0x3cc   :  { %3870 = vmatpush.xpose.msra.mxu2 %v3712_v32  ;;  %3890 = vmatpush.xpose.msrb.mxu0 %v3713_v46  ;;  %v3703_v52 = vmul.f32 %v3565_v54, %v7442_v4  ;;  %v7444_v32 = vld [vmem:[#allocation130_spill] sm:$0xff]  ;;  %v3555_v46 = vsel %vm3554_vm15, %v6579_v23, %v6701_v9  ;;  %v3457_v23 = vmul.f32 %v6819_v8, %v6745_v51  ;;  %vm3513_vm9 = vweird.f32 %v6749_v28 }
 0x3cd   :  { %3794 = vmatmul.f32.vlgmr.msrb.gmra.mxu2 %v6803_v20  ;;  %3814 = vmatmul.f32.vlgmr.msra.gmra.mxu0 %v6806_v22  ;;  %v3705_v21 = vmul.f32 %v3565_v54, %v7444_v32  ;;  %v3498_v9 = vmul.f32 %v6792_v58, %v3497_v59  ;;  %v6858_v54 = vadd.f32 1e-24, %v3933_v24  ;;  %v3545_v17 = vsel %vm3544_vm4, %v6594_v61, %v3541_v29  ;;  %v3158_v4 = vpop.xlane.xlu2 %3157  ;;  %vm3514_vm13 = vmor %vm3512_vm6, %vm3513_vm9 }
 0x3ce   :  { %v3510_v5 = vsub.f32 1.5, %v3509_v53  ;;  %v6868_v59 = vadd.f32 1e-24, %v3168_v37  ;;  %v3458_v61 = vmul.f32 %v6819_v8, %v3457_v23  ;;  %v7449_v37 = vld [vmem:[#allocation110_spill] sm:$0xff]  ;;  %v3695_v14 = vmul.f32 %v3545_v17, %v7450_v25 }
 0x3cf   :  { %3831 = vmatpush.xpose.msrb.mxu3 %v3706_v33  ;;  %3851 = vmatpush.xpose.msra.mxu1 %v3707_v41  ;;  %v3698_v33 = vmul.f32 %v3555_v46, %v7445_v11  ;;  %v3699_v41 = vmul.f32 %v3555_v46, %v7446_v3  ;;  %5249 = vrsqrt.f32 %v6858_v54  ;;  %v3499_v27 = vmul.f32 0.5, %v3498_v9  ;;  %v7453_v11 = vld [vmem:[#allocation107_spill] sm:$0xff]  ;;  %v7454_v3 = vld [vmem:[#allocation108_spill] sm:$0xff] }
 0x3d0   :  { %3871 = vmatpush.xpose.msra.mxu2 %v3708_v26  ;;  %3891 = vmatpush.xpose.msrb.mxu0 %v3709_v30  ;;  %v7447_v26 = vld [vmem:[#allocation117_spill] sm:$0xff]  ;;  %v7448_v30 = vld [vmem:[#allocation126_spill] sm:$0xff]  ;;  %5251 = vrsqrt.f32 %v6860_v50  ;;  %v3694_v29 = vmul.f32 %v3545_v17, %v7449_v37  ;;  %v3535_v53 = vsel %vm3534_vm7, %v6723_v0, %v3531_v18  ;;  %v3478_v16 = vmul.f32 %v6844_v6, %v3477_v19 }
 0x3d1   :  { %v3700_v2 = vmul.f32 %v3555_v46, %v7447_v26  ;;  %v3701_v34 = vmul.f32 %v3555_v46, %v7448_v30  ;;  %5253 = vrsqrt.f32 %v6868_v59  ;;  %v6896_v23 = vadd.f32 1e-24, %v3158_v4  ;;  %v7457_v4 = vld [vmem:[#allocation105_spill] sm:$0xff] }
 0x3d2   :  { %v3500_v9 = vsub.f32 1.5, %v3499_v27  ;;  %v6907_v42 = vmul.f32 0.5, %v3458_v61  ;;  %v3525_v10 = vsel %vm3524_vm10, %v6681_v55, %v6839_v48  ;;  %vm3502_vm11 = vweird.f32 %v6719_v15  ;;  %v7456_v27 = vld [vmem:[#allocation104_spill] sm:$0xff]  ;;  %v7458_v37 = vld [vmem:[#allocation113_spill] sm:$0xff] }
 0x3d3   :  { %3832 = vmatpush.xpose.msrb.mxu3 %v3702_v56  ;;  %3852 = vmatpush.xpose.msra.mxu1 %v3703_v52  ;;  %v3467_v56 = vmul.f32 %v6850_v40, %v6784_v63  ;;  %v6875_v52 = vadd.f32 1e-24, %v6800_v39  ;;  %v6887_v39 = vmul.f32 %v6738_v7, %v3490_v60  ;;  %v3511_v60 = vmul.f32 %v6749_v28, %v3510_v5 }
 0x3d4   :  { %3872 = vmatpush.xpose.msra.mxu2 %v3704_v12  ;;  %3892 = vmatpush.xpose.msrb.mxu0 %v3705_v21  ;;  %v7451_v12 = vld [vmem:[#allocation112_spill] sm:$0xff]  ;;  %v3692_v26 = vmul.f32 %v3535_v53, %v6049_v47  ;;  %vm3503_vm12 = vweird.f32 %v6792_v58  ;;  %v3501_v48 = vmul.f32 %v6792_v58, %v3500_v9  ;;  %v7455_v47 = vld [vmem:[#allocation102_spill] sm:$0xff]  ;;  %v3688_v61 = vmul.f32 %v3525_v10, %v7457_v4 }
 0x3d5   :  { %v3696_v32 = vmul.f32 %v3545_v17, %v7451_v12  ;;  %v7452_v21 = vld [vmem:[#allocation120_spill] sm:$0xff]  ;;  %v3468_v0 = vmul.f32 %v6850_v40, %v3467_v56  ;;  %5255 = vrsqrt.f32 %v6875_v52  ;;  %v6905_v24 = vpop.eup %5249  ;;  %v3687_v56 = vmul.f32 %v3525_v10, %v7456_v27  ;;  %vm3504_vm4 = vmor %vm3502_vm11, %vm3503_vm12  ;;  %v7461_v9 = vld [vmem:[#allocation98_spill] sm:$0xff] }
 0x3d6   :  { %v3697_v46 = vmul.f32 %v3545_v17, %v7452_v21  ;;  %v6913_v18 = vpop.eup %5251  ;;  %v3936_v30 = vmul.f32 %v6905_v24, %v6858_v54  ;;  %5257 = vrsqrt.f32 %v6896_v23  ;;  %v3515_v12 = vsel %vm3514_vm13, %v6749_v28, %v3511_v60 }
 0x3d7   :  { %3833 = vmatpush.xpose.msrb.mxu3 %v3698_v33  ;;  %3853 = vmatpush.xpose.msra.mxu1 %v3699_v41  ;;  %v3690_v33 = vmul.f32 %v3535_v53, %v7453_v11  ;;  %v3691_v41 = vmul.f32 %v3535_v53, %v7454_v3  ;;  %v3960_v55 = vmul.f32 %v6913_v18, %v6860_v50  ;;  %v3469_v17 = vmul.f32 0.5, %v3468_v0  ;;  %v6927_v19 = vpop.eup %5253  ;;  %v7462_v11 = vld [vmem:[#allocation99_spill] sm:$0xff] }
 0x3d8   :  { %3873 = vmatpush.xpose.msra.mxu2 %v3700_v2  ;;  %3893 = vmatpush.xpose.msrb.mxu0 %v3701_v34  ;;  %v3693_v2 = vmul.f32 %v3535_v53, %v7348_v13  ;;  %v3479_v34 = vmul.f32 0.5, %v3478_v16  ;;  %v3686_v13 = vmul.f32 %v3525_v10, %v7455_v47  ;;  %v3937_v5 = vmul.f32 %v6905_v24, %v3936_v30 }
 0x3d9   :  { %v3961_v25 = vmul.f32 %v6913_v18, %v3960_v55  ;;  %vm3941_vm14 = vweird.f32 %v6858_v54  ;;  %vm3942_vm15 = vweird.f32 %v6905_v24  ;;  %vm3965_vm1 = vweird.f32 %v6860_v50 }
 0x3da   :  { %v3480_v21 = vsub.f32 1.5, %v3479_v34  ;;  %vm3966_vm2 = vweird.f32 %v6913_v18  ;;  %vm3482_vm3 = vweird.f32 %v6777_v31  ;;  %v3447_v35 = vmul.f32 %v6927_v19, %v6868_v59  ;;  %vm6969_vm5 = vmor %vm3941_vm14, %vm3942_vm15 }
 0x3db   :  { %3834 = vmatpush.xpose.msrb.mxu3 %v3694_v29  ;;  %3854 = vmatpush.xpose.msra.mxu1 %v3695_v14  ;;  %v3689_v29 = vmul.f32 %v3525_v10, %v7458_v37  ;;  %v6937_v14 = vpop.eup %5255  ;;  %v3470_v28 = vsub.f32 1.5, %v3469_v17  ;;  %v3682_v0 = vmul.f32 %v3515_v12, %v7461_v9  ;;  %vm6981_vm6 = vmor %vm3965_vm1, %vm3966_vm2  ;;  %v3460_v54 = vsub.f32 1.5, %v6907_v42  ;;  %v7478_v9 = vld [vmem:[#allocation103_spill] sm:$0xff] }
 0x3dc   :  { %3874 = vmatpush.xpose.msra.mxu2 %v3696_v32  ;;  %3894 = vmatpush.xpose.msrb.mxu0 %v3697_v46  ;;  %v3938_v32 = vmul.f32 0.5, %v3937_v5  ;;  %v3962_v46 = vmul.f32 0.5, %v3961_v25  ;;  %v6959_v16 = vpop.eup %5257  ;;  %v3437_v60 = vmul.f32 %v6937_v14, %v6875_v52  ;;  %v3481_v55 = vmul.f32 %v6844_v6, %v3480_v21  ;;  %v7475_v21 = vld [vmem:[#allocation93_spill] sm:$0xff] }
 0x3dd   :  { %vm3483_vm7 = vweird.f32 %v6844_v6  ;;  %v3448_v50 = vmul.f32 %v6927_v19, %v3447_v35  ;;  %v3471_v17 = vmul.f32 %v6850_v40, %v3470_v28  ;;  %vm3473_vm8 = vweird.f32 %v6850_v40  ;;  %v7476_v35 = vld [vmem:[#allocation67_spill] sm:$0xff] }
 0x3de   :  { %v3939_v53 = vsub.f32 1.5, %v3938_v32  ;;  %v3963_v3 = vsub.f32 1.5, %v3962_v46  ;;  %vm3484_vm9 = vmor %vm3482_vm3, %vm3483_vm7  ;;  %vm3463_vm10 = vweird.f32 %v6819_v8  ;;  %vm3472_vm11 = vweird.f32 %v6784_v63 }
 0x3df   :  { %3835 = vmatpush.xpose.msrb.mxu3 %v3690_v33  ;;  %3855 = vmatpush.xpose.msra.mxu1 %v3691_v41  ;;  %v3683_v33 = vmul.f32 %v3515_v12, %v7462_v11  ;;  %v7465_v41 = vld [vmem:[#allocation101_spill] sm:$0xff]  ;;  %v3485_v11 = vsel %vm3484_vm9, %v6844_v6, %v3481_v55  ;;  %vm3474_vm12 = vmor %vm3472_vm11, %vm3473_vm8  ;;  %vm3462_vm13 = vweird.f32 %v6745_v51  ;;  %vm3453_vm14 = vweird.f32 %v6927_v19 }
 0x3e0   :  { %3875 = vmatpush.xpose.msra.mxu2 %v3692_v26  ;;  %3895 = vmatpush.xpose.msrb.mxu0 %v3693_v2  ;;  %v3684_v10 = vmul.f32 %v3515_v12, %v7465_v41  ;;  %v3685_v26 = vmul.f32 %v3515_v12, %v7347_v43  ;;  %v3505_v2 = vsel %vm3504_vm4, %v6792_v58, %v3501_v48  ;;  %vm3464_vm15 = vmor %vm3462_vm13, %vm3463_vm10  ;;  %vm3443_vm2 = vweird.f32 %v6937_v14 }
 0x3e1   :  { %v3940_v30 = vmul.f32 %v6905_v24, %v3939_v53  ;;  %v3495_v43 = vsel %vm6946_vm0, %v6738_v7, %v6887_v39  ;;  %v3964_v58 = vmul.f32 %v6913_v18, %v3963_v3  ;;  %v3427_v48 = vmul.f32 %v6959_v16, %v6896_v23  ;;  %v7477_v53 = vld [vmem:[#allocation94_spill] sm:$0xff] }
 0x3e2   :  { %v3678_v47 = vmul.f32 %v3505_v2, %v7354_v44  ;;  %v3679_v7 = vmul.f32 %v3505_v2, %v7355_v57  ;;  %v3680_v5 = vmul.f32 %v3505_v2, %v7361_v49  ;;  %v3681_v27 = vmul.f32 %v3505_v2, %v7368_v36  ;;  %v7472_v49 = vld [vmem:[#allocation116_spill] sm:$0xff]  ;;  %v7473_v36 = vld [vmem:[#allocation61_spill] sm:$0xff] }
 0x3e3   :  { %3836 = vmatpush.xpose.msrb.mxu3 %v3686_v13  ;;  %3856 = vmatpush.xpose.msra.mxu1 %v3687_v56  ;;  %v3944_v42 = vsel %vm6969_vm5, %v6905_v24, %v3940_v30  ;;  %v3968_v39 = vsel %vm6981_vm6, %v6913_v18, %v3964_v58  ;;  %v3438_v13 = vmul.f32 %v6937_v14, %v3437_v60  ;;  %v7468_v56 = vld [vmem:[#allocation90_spill] sm:$0xff]  ;;  %v7469_v24 = vld [vmem:[#allocation109_spill] sm:$0xff]  ;;  %v7479_v30 = vld [vmem:[#allocation84_spill] sm:$0xff]  ;;  %vm3452_vm0 = vweird.f32 %v6868_v59 }
 0x3e4   :  { %3876 = vmatpush.xpose.msra.mxu2 %v3688_v61  ;;  %3896 = vmatpush.xpose.msrb.mxu0 %v3689_v29  ;;  %v3674_v4 = vmul.f32 %v3495_v43, %v7468_v56  ;;  %v3945_v44 = vmul.f32 %v3944_v42, %v6488_v1  ;;  %v3946_v57 = vmul.f32 %v3944_v42, %v7469_v24  ;;  %v7470_v61 = vld [vmem:[#allocation60_spill] sm:$0xff]  ;;  %v3449_v29 = vmul.f32 0.5, %v3448_v50  ;;  %v7471_v18 = vld [vmem:[#allocation78_spill] sm:$0xff]  ;;  %v7485_v56 = vld [vmem:[#allocation87_spill] sm:$0xff] }
 0x3e5   :  { %v3947_v37 = vmul.f32 %v3944_v42, %v7470_v61  ;;  %v3948_v25 = vmul.f32 %v3944_v42, %v7471_v18  ;;  %v3969_v12 = vmul.f32 %v3968_v39, %v7472_v49  ;;  %v3970_v32 = vmul.f32 %v3968_v39, %v7473_v36  ;;  %v7482_v50 = vld [vmem:[#allocation100_spill] sm:$0xff]  ;;  %vm3454_vm1 = vmor %vm3452_vm0, %vm3453_vm14  ;;  %v7487_v61 = vld [vmem:[#allocation77_spill] sm:$0xff] }
 0x3e6   :  { %v3675_v1 = vmul.f32 %v3495_v43, %v7474_v38  ;;  %v3676_v46 = vmul.f32 %v3495_v43, %v7475_v21  ;;  %v3971_v28 = vmul.f32 %v3968_v39, %v7476_v35  ;;  %v3972_v60 = vmul.f32 %v3968_v39, %v7477_v53  ;;  %v7493_v35 = vld [vmem:[#allocation79_spill] sm:$0xff]  ;;  %v7494_v53 = vld [vmem:[#allocation88_spill] sm:$0xff] }
 0x3e7   :  { %3837 = vmatpush.xpose.msrb.mxu3 %v3682_v0  ;;  %3857 = vmatpush.xpose.msra.mxu1 %v3683_v33  ;;  %v3677_v0 = vmul.f32 %v3495_v43, %v7478_v9  ;;  %v3973_v33 = vmul.f32 %v3969_v12, %v3945_v44  ;;  %v3974_v15 = vmul.f32 %v3970_v32, %v3946_v57  ;;  %v3450_v41 = vsub.f32 1.5, %v3449_v29  ;;  %v7481_v43 = vld [vmem:[#allocation89_spill] sm:$0xff]  ;;  %v7486_v44 = vld [vmem:[#allocation96_spill] sm:$0xff] }
 0x3e8   :  { %3877 = vmatpush.xpose.msra.mxu2 %v3684_v10  ;;  %3897 = vmatpush.xpose.msrb.mxu0 %v3685_v26  ;;  %v3461_v3 = vmul.f32 %v6819_v8, %v3460_v54  ;;  %v3975_v31 = vmul.f32 %v3971_v28, %v3947_v37  ;;  %v3976_v10 = vmul.f32 %v3972_v60, %v3948_v25  ;;  %v3439_v2 = vmul.f32 0.5, %v3438_v13  ;;  %v7480_v54 = vld [vmem:[#allocation85_spill] sm:$0xff]  ;;  %v7483_v13 = vld [vmem:[#allocation80_spill] sm:$0xff] }
 0x3e9   :  { %v3977_v26 = vadd.f32 %v3974_v15, %v3973_v33  ;;  %v3428_v6 = vmul.f32 %v6959_v16, %v3427_v48  ;;  %v3670_v34 = vmul.f32 %v3485_v11, %v7479_v30  ;;  %v3671_v55 = vmul.f32 %v3485_v11, %v7480_v54  ;;  %v7488_v29 = vld [vmem:[#allocation76_spill] sm:$0xff]  ;;  %v7491_v32 = vld [vmem:[#allocation73_spill] sm:$0xff]  ;;  %v7497_v33 = vld [vmem:[#allocation75_spill] sm:$0xff] }
 0x3ea   :  { %v3672_v58 = vmul.f32 %v3485_v11, %v7481_v43  ;;  %v3673_v42 = vmul.f32 %v3485_v11, %v7482_v50  ;;  %v3475_v63 = vsel %vm3474_vm12, %v6850_v40, %v3471_v17  ;;  %v3440_v17 = vsub.f32 1.5, %v3439_v2  ;;  %v7490_v12 = vld [vmem:[#allocation92_spill] sm:$0xff]  ;;  %v7502_v30 = vld [vmem:[#allocation82_spill] sm:$0xff] }
 0x3eb   :  { %3838 = vmatpush.xpose.msrb.mxu3 %v3678_v47  ;;  %3858 = vmatpush.xpose.msra.mxu1 %v3679_v7  ;;  %v3978_v47 = vadd.f32 %v3977_v26, %v3975_v31  ;;  %v3451_v7 = vmul.f32 %v6927_v19, %v3450_v41  ;;  %v3429_v39 = vmul.f32 0.5, %v3428_v6  ;;  %v3669_v51 = vmul.f32 %v3475_v63, %v7486_v44  ;;  %v7501_v6 = vld [vmem:[#allocation71_spill] sm:$0xff] }
 0x3ec   :  { %3878 = vmatpush.xpose.msra.mxu2 %v3680_v5  ;;  %3898 = vmatpush.xpose.msrb.mxu0 %v3681_v27  ;;  %v3666_v5 = vmul.f32 %v3475_v63, %v7483_v13  ;;  %v7484_v27 = vld [vmem:[#allocation81_spill] sm:$0xff]  ;;  %v3465_v24 = vsel %vm3464_vm15, %v6819_v8, %v3461_v3  ;;  %v3441_v25 = vmul.f32 %v6937_v14, %v3440_v17  ;;  %v7489_v8 = vld [vmem:[#allocation83_spill] sm:$0xff]  ;;  %vm3442_vm3 = vweird.f32 %v6875_v52  ;;  %v7498_v3 = vld [vmem:[#allocation86_spill] sm:$0xff] }
 0x3ed   :  { %v3979_v48 = vadd.f32 %v3978_v47, %v3976_v10  ;;  %v3667_v40 = vmul.f32 %v3475_v63, %v7484_v27  ;;  %v3430_v57 = vsub.f32 1.5, %v3429_v39  ;;  %v3662_v37 = vmul.f32 %v3465_v24, %v7487_v61  ;;  %vm3444_vm5 = vmor %vm3442_vm3, %vm3443_vm2  ;;  %v7495_v52 = vld [vmem:[#allocation69_spill] sm:$0xff] }
 0x3ee   :  { %v3663_v18 = vmul.f32 %v3465_v24, %v7488_v29  ;;  %v3664_v49 = vmul.f32 %v3465_v24, %v7489_v8  ;;  %v3665_v36 = vmul.f32 %v3465_v24, %v7490_v12  ;;  %v3455_v59 = vsel %vm3454_vm1, %v6927_v19, %v3451_v7 }
 0x3ef   :  { %3839 = vmatpush.xpose.msrb.mxu3 %v3674_v4  ;;  %3859 = vmatpush.xpose.msra.mxu1 %v3675_v1  ;;  %v3668_v4 = vmul.f32 %v3475_v63, %v7485_v56  ;;  %vm3433_vm4 = vweird.f32 %v6959_v16  ;;  %v3658_v38 = vmul.f32 %v3455_v59, %v7491_v32  ;;  %v7492_v1 = vld [vmem:[#allocation72_spill] sm:$0xff]  ;;  %v3660_v28 = vmul.f32 %v3455_v59, %v7493_v35 }
 0x3f0   :  { %3879 = vmatpush.xpose.msra.mxu2 %v3676_v46  ;;  %3899 = vmatpush.xpose.msrb.mxu0 %v3677_v0  ;;  %v3659_v21 = vmul.f32 %v3455_v59, %v7492_v1  ;;  %v3431_v46 = vmul.f32 %v6959_v16, %v3430_v57  ;;  %v3661_v60 = vmul.f32 %v3455_v59, %v7494_v53  ;;  %vm3432_vm6 = vweird.f32 %v6896_v23  ;;  %v7496_v0 = vld [vmem:[#allocation68_spill] sm:$0xff] }
 0x3f1   :  { %3980 = vadd.xlane.f32.xlu2 %v3979_v48  ;;  %v3445_v19 = vsel %vm3444_vm5, %v6937_v14, %v3441_v25  ;;  %vm3434_vm7 = vmor %vm3432_vm6, %vm3433_vm4  ;;  %v7499_v14 = vld [vmem:[#allocation65_spill] sm:$0xff]  ;;  %v7500_v23 = vld [vmem:[#allocation64_spill] sm:$0xff]  ;;  %v3822_v54 = vrot.slane %v6787_v45, 4  ;;  %v3825_v43 = vrot.slane %v6806_v22, 4  ;;  %vm3990_vm8 = vcmask 0  }
 0x3f2   :  { %v3654_v9 = vmul.f32 %v3445_v19, %v7495_v52  ;;  %v3655_v11 = vmul.f32 %v3445_v19, %v7496_v0  ;;  %v3656_v15 = vmul.f32 %v3445_v19, %v7497_v33  ;;  %v3657_v31 = vmul.f32 %v3445_v19, %v7498_v3 }
 0x3f3   :  { %3840 = vmatpush.xpose.msrb.mxu3 %v3670_v34  ;;  %3860 = vmatpush.xpose.msra.mxu1 %v3671_v55  ;;  %v3435_v41 = vsel %vm3434_vm7, %v6959_v16, %v3431_v46  ;;  %v3823_v16 = vrot.slane %v6790_v62, 4  ;;  %v3824_v55 = vrot.slane %v6803_v20, 4  ;;  %vm3913_vm9 = vcmask 1043456  }
 0x3f4   :  { %3880 = vmatpush.xpose.msra.mxu2 %v3672_v58  ;;  %3900 = vmatpush.xpose.msrb.mxu0 %v3673_v42  ;;  %v3650_v10 = vmul.f32 %v3435_v41, %v7499_v14  ;;  %v3651_v26 = vmul.f32 %v3435_v41, %v7500_v23  ;;  %v3652_v2 = vmul.f32 %v3435_v41, %v7501_v6 }
 0x3f5   :  { %v3653_v34 = vmul.f32 %v3435_v41, %v7502_v30 }
 0x3f7   :  { %3841 = vmatpush.xpose.msrb.mxu3 %v3666_v5  ;;  %3861 = vmatpush.xpose.msra.mxu1 %v3667_v40 }
 0x3f8   :  { %3881 = vmatpush.xpose.msra.mxu2 %v3668_v4  ;;  %3901 = vmatpush.xpose.msrb.mxu0 %v3669_v51 }
 0x3fb   :  { %3842 = vmatpush.xpose.msrb.mxu3 %v3662_v37  ;;  %3862 = vmatpush.xpose.msra.mxu1 %v3663_v18 }
 0x3fc   :  { %3882 = vmatpush.xpose.msra.mxu2 %v3664_v49  ;;  %3902 = vmatpush.xpose.msrb.mxu0 %v3665_v36 }
 0x3ff   :  { %3843 = vmatpush.xpose.msrb.mxu3 %v3658_v38  ;;  %3863 = vmatpush.xpose.msra.mxu1 %v3659_v21 }
 0x400   :  { %3883 = vmatpush.xpose.msra.mxu2 %v3660_v28  ;;  %3903 = vmatpush.xpose.msrb.mxu0 %v3661_v60 }
 0x403   :  { %3844 = vmatpush.xpose.msrb.mxu3 %v3654_v9  ;;  %3864 = vmatpush.xpose.msra.mxu1 %v3655_v11 }
 0x404   :  { %3884 = vmatpush.xpose.msra.mxu2 %v3656_v15  ;;  %3904 = vmatpush.xpose.msrb.mxu0 %v3657_v31 }
 0x407   :  { %3845 = vmatpush.xpose.msrb.mxu3 %v3650_v10  ;;  %3865 = vmatpush.xpose.msra.mxu1 %v3651_v26 }
 0x408   :  { %3885 = vmatpush.xpose.msra.mxu2 %v3652_v2  ;;  %3905 = vmatpush.xpose.msrb.mxu0 %v3653_v34 }
 0x40a   :  { %3846 = vmatmul.f32.vlgmr.msrb.gmra.mxu3 %v3822_v54  ;;  %3866 = vmatmul.f32.vlgmr.msra.gmra.mxu1 %v3823_v16 }
 0x40b   :  { %3886 = vmatmul.f32.vlgmr.msra.gmra.mxu2 %v3824_v55  ;;  %3906 = vmatmul.f32.vlgmr.msrb.gmra.mxu0 %v3825_v43 }
 0x447   :  { %v3775_v62 = vpop.f32.mrf.mxu1 }
 0x44a   :  { %v3815_v13 = vpop.f32.mrf.mxu0 }
 0x44d   :  { %v3755_v20 = vpop.f32.mrf.mxu3 }
 0x44e   :  { %v3776_v5 = vadd.f32 %v3775_v62, %v3755_v20 }
 0x450   :  { %v3795_v22 = vpop.f32.mrf.mxu2 }
 0x451   :  { %v3796_v4 = vadd.f32 %v3795_v22, %v3776_v5 }
 0x453   :  { %v3816_v57 = vadd.f32 %v3815_v13, %v3796_v4 }
 0x464   :  { %v3981_v58 = vpop.xlane.xlu2 %3980 }
 0x465   :  { %v3982_v50 = vrot.slane %v3981_v58, 4 }
 0x467   :  { %v3983_v42 = vadd.f32 %v3982_v50, %v3981_v58 }
 0x469   :  { %v3984_v63 = vrot.slane %v3983_v42, 2 }
 0x46b   :  { %v3985_v47 = vadd.f32 %v3984_v63, %v3983_v42 }
 0x46d   :  { %v3986_v48 = vrot.slane %v3985_v47, 1 }
 0x46f   :  { %v3987_v7 = vadd.f32 %v3986_v48, %v3985_v47 }
 0x471   :  { %v3988_v39 = vmul.f32 0.16666667, %v3987_v7 }
 0x473   :  { %v3989_v45 = vsub.f32 1.0, %v3988_v39 }
 0x475   :  { %3991 = vst.msk [vmem:[#allocation12] sm:$0x1] %vm3990_vm8, %v3989_v45 }
 0x476   :  { %4013 = dma.vmem_to_hbm [thread:$0]  %s4009_s4, 16, %s4011_s27, [#allocation13]  }
 0x487   :  { %v3867_v27 = vpop.f32.mrf.mxu1 }
 0x488   :  { %v3907_v51 = vpop.f32.mrf.mxu0 }
 0x48d   :  { %v3847_v40 = vpop.f32.mrf.mxu3 }
 0x48e   :  { %v3868_v17 = vadd.f32 %v3867_v27, %v3847_v40  ;;  %v3887_v56 = vpop.f32.mrf.mxu2 }
 0x490   :  { %v3888_v44 = vadd.f32 %v3887_v56, %v3868_v17 }
 0x492   :  { %v3908_v24 = vadd.f32 %v3907_v51, %v3888_v44 }
 0x494   :  { %v3911_v61 = vrot.slane %v3908_v24, 4 }
 0x496   :  { %v3914_v37 = vsel %vm3913_vm9, %v3816_v57, %v3911_v61 }
 0x497   :  { %v3915_v29 = vmul.f32 10.0, %v3914_v37 }
 0x499   :  { %3916 = vst [vmem:[#allocation11] sm:$0xff] %v3915_v29 }
 0x49a   :  { %4002 = dma.vmem_to_hbm [thread:$0]  %s3998_s28, 128, %s4000_s7, [#allocation4]  }
 0x49b   :  { %5433 = dma.done.wait [#allocation4], 128  }
 0x49c   :  { %5434 = vsyncadd [#allocation4], 4294967168 }
 0x49d   :  { %5435 = dma.done.wait [#allocation13], 16  }
 0x49e   :  { %5436 = vsyncadd [#allocation13], 4294967280 }
 0x49f   :  { %4022 = vsyncpa [#allocation3], 1 }
 0x4a0   :  { %4023 = vsyncpa [#allocation6], 1 }
 0x4a1   :  { %4024 = vsyncpa [#allocation9], 1 }
 0x4a2   :  { %4025 = vsyncpa [#allocation4], 1 }
 0x4a3   :  { %4026 = vsyncpa [#allocation13], 1 }

</bundles_post_ra>
